<compile_context>
chip_gen: v5e
topology: v5e:2x2
jax: 0.10.0
libtpu: 0.0.40
codegen_flags: <defaults>
</compile_context>

<pallas_src>
import functools

import jax
import jax.numpy as jnp
from jax.experimental import pallas as pl
from jax.experimental.pallas import tpu as pltpu

LANE = 128     # vreg / MXU lane width
SUBLANE = 8    # vreg sublane count


def _round_up(x, m):
    return ((x + m - 1) // m) * m


def _vmem_capacity_bytes():
    """Physical VMEM per TensorCore; conservative (v7x) fallback if unqueryable."""
    try:
        cap = getattr(pltpu.get_tpu_info(), "vmem_capacity_bytes", None)
        if cap:
            return int(cap)
    except Exception:
        pass
    return 64 * 1024 * 1024


def _aspp_kernel(x_hbm, w_ref, bias_ref, o_ref, xbuf, sem, *,
                 RT, RT_IN, KH, KW, dil, Wo):
    """One grid step = one (batch, row-group, row-tile) output block.

    x_hbm:    (N, Hp, Wp, Cin_p)      padded activation, stays in HBM (pl.ANY)
    w_ref:    (KH, KW, Cin_p, Cout_p) BN-scale-folded conv weights (VMEM)
    bias_ref: (1, Cout_p)             folded BN bias (f32)
    o_ref:    (1, RT, Wo, Cout_p)     output row tile (lane-dense, Wo % 8 == 0)
    xbuf:     (2, RT_IN, Wp, Cin_p)   double-buffered input row window
    sem:      DMA semaphores, one per buffer slot
    """
    n = pl.program_id(0)
    g = pl.program_id(1)
    rg = pl.program_id(2)
    n_rg = pl.num_programs(2)
    row_tile = g * n_rg + rg          # global output row-tile index
    slot = rg % 2

    def window_copy(tile_idx, slot_idx):
        # The identical descriptor (same src slice / dst / semaphore) is rebuilt
        # at .start() and .wait() time so the pair always matches exactly.
        row0 = pl.multiple_of(tile_idx * RT, RT)
        return pltpu.make_async_copy(
            x_hbm.at[n, pl.ds(row0, RT_IN)],
            xbuf.at[slot_idx],
            sem.at[slot_idx],
        )

    # Prime the double buffer at the first tile of every (batch, row-group).
    @pl.when(rg == 0)
    def _():
        window_copy(row_tile, slot).start()

    # Prefetch the next window of this row group BEFORE blocking on the current
    # one, so its DMA overlaps both the wait below and this step's compute.
    # (The other slot's data was fully consumed by the previous grid step.)
    @pl.when(rg + 1 < n_rg)
    def _():
        window_copy(row_tile + 1, 1 - slot).start()

    # Wait for the current halo'd row window.
    window_copy(row_tile, slot).wait()

    Cin_p = xbuf.shape[-1]
    Cout_p = o_ref.shape[-1]

    # Dilated KHxKW conv as KH*KW shifted-window matmuls on the MXU with a
    # clean chained f32 accumulation (no interleaved VPU work between taps).
    # Wo is sublane-aligned so the reshape below is (8,128)-tile aligned; on
    # v6e/v7x the residual kw-offset sublane shift could be removed with a
    # full-width matmul per kh (kw shift applied on the 8x-smaller Cout side)
    # or pltpu.roll, at extra MXU flops — skipped (regression on v5e).
    acc = jnp.zeros((RT * Wo, Cout_p), jnp.float32)
    for kh in range(KH):
        for kw in range(KW):
            patch = xbuf[slot, kh * dil:kh * dil + RT, kw * dil:kw * dil + Wo, :]
            acc = acc + jnp.dot(
                patch.reshape(RT * Wo, Cin_p),
                w_ref[kh, kw],
                preferred_element_type=jnp.float32,
            )

    # BN scale already folded into the weights -> bias add + ReLU in f32.
    y = acc.reshape(RT, Wo, Cout_p) + bias_ref[0]
    o_ref[0] = jnp.maximum(y, 0.0).astype(o_ref.dtype)


def aspp_forward(x_nchw, w_oihw, gamma, beta, running_mean, running_var, *,
                 padding, dilation, eps=1e-5,
                 row_tile=None, row_groups=None,
                 compute_dtype=jnp.bfloat16, out_dtype=None):
    """Matches _ASPPModule.forward semantics on NCHW input (inference BN).

    compute_dtype: MXU operand dtype for activations / BN-folded weights.
        bf16 (default) halves HBM/VMEM traffic and doubles MXU throughput; it
        is an intentional deviation from f32 PyTorch numerics — pass
        jnp.float32 for closer-to-exact results.
    out_dtype: output dtype (default: x dtype).  Use bf16 when the downstream
        ASPP concat / 1x1 conv runs in bf16 to halve output write traffic.
    row_tile / row_groups: None -> auto-sized from the TPU generation's VMEM.
    """
    N, Cin, H, W = x_nchw.shape
    Cout, _, KH, KW = w_oihw.shape
    out_dtype = x_nchw.dtype if out_dtype is None else out_dtype

    halo = dilation * (KH - 1)                    # extra input rows per tile
    Ho = H + 2 * padding - halo
    Wo = W + 2 * padding - dilation * (KW - 1)
    assert Ho > 0 and Wo > 0

    Cin_p = _round_up(Cin, LANE)                  # lane-dense MXU K dim
    Cout_p = _round_up(Cout, LANE)                # lane-dense MXU N dim
    Wo_p = _round_up(Wo, SUBLANE)                 # sublane-aligned output width
    Wp = _round_up(Wo_p + dilation * (KW - 1), SUBLANE)   # input cols in VMEM

    in_b = jnp.dtype(compute_dtype).itemsize
    out_b = jnp.dtype(out_dtype).itemsize
    w_bytes = KH * KW * Cin_p * Cout_p * in_b
    vmem_cap = _vmem_capacity_bytes()

    # ---- generation-aware row-tile selection --------------------------------
    # Big row tiles amortize the halo (RT_IN = RT + halo rows DMA'd per RT rows
    # produced); the per-chip VMEM capacity caps RT (64 MiB/TC on v7x).
    if row_tile is None:
        budget = (vmem_cap * 3) // 5                       # leave compiler headroom
        per_row = 2 * Wp * Cin_p * in_b + Wo_p * Cout_p * (2 * out_b + 4)
        fixed = 2 * w_bytes + 2 * halo * Wp * Cin_p * in_b + (2 << 20)
        rt = (budget - fixed) // per_row if budget > fixed else SUBLANE
        rt = max(SUBLANE, (int(rt) // SUBLANE) * SUBLANE)
        row_tile = int(min(rt, 64, _round_up(Ho, SUBLANE)))
    RT = max(1, min(int(row_tile), _round_up(Ho, SUBLANE)))
    R = (Ho + RT - 1) // RT                       # number of output row tiles
    RT_IN = RT + halo                             # halo'd input rows per tile

    # Second "parallel" axis keeps dual-TC chips busy at batch 1; with batch>=2
    # (or on single-TC v5e) one group per batch means fewer exposed prime DMAs.
    if row_groups is None:
        row_groups = 1 if N >= 2 else 2
    G = row_groups if (row_groups > 1 and R % row_groups == 0) else 1
    Rg = R // G
    Ho_pad = R * RT
    Hp = Ho_pad + halo

    # One fused pad: top/left conv halo, bottom row-tile remainder, right
    # width alignment, channel lanes.
    x_nhwc = jnp.transpose(x_nchw, (0, 2, 3, 1)).astype(compute_dtype)
    xp = jnp.pad(x_nhwc, ((0, 0),
                          (padding, Hp - H - padding),
                          (padding, Wp - W - padding),
                          (0, Cin_p - Cin)))

    # Fold the BN scale into the conv weights; only the bias stays in-kernel.
    inv_std = 1.0 / jnp.sqrt(running_var.astype(jnp.float32) + eps)
    scale = gamma.astype(jnp.float32) * inv_std                        # (Cout,)
    bias = beta.astype(jnp.float32) - running_mean.astype(jnp.float32) * scale
    w_hwio = jnp.transpose(w_oihw, (2, 3, 1, 0)).astype(jnp.float32) * scale
    w_p = jnp.pad(w_hwio.astype(compute_dtype),
                  ((0, 0), (0, 0), (0, Cin_p - Cin), (0, Cout_p - Cout)))
    bias_p = jnp.pad(bias, (0, Cout_p - Cout)).reshape(1, Cout_p)

    kernel = functools.partial(_aspp_kernel, RT=RT, RT_IN=RT_IN,
                               KH=KH, KW=KW, dil=dilation, Wo=Wo_p)

    # Explicit VMEM limit sized from the real footprint (defaults — 16 MiB on
    # v5e / 32 MiB on v6e,v7x — are too small at production Cin), clamped to
    # the physical capacity of this generation.
    xbuf_bytes = 2 * RT_IN * Wp * Cin_p * in_b
    out_blk_bytes = RT * Wo_p * Cout_p * out_b
    acc_bytes = RT * Wo_p * Cout_p * 4
    footprint = xbuf_bytes + 2 * w_bytes + 2 * out_blk_bytes + acc_bytes + (1 << 20)
    vmem_limit = int(min(vmem_cap * 9 // 10,
                         max(32 << 20, footprint + footprint // 4)))

    def call(single_buffer_consts):
        if single_buffer_consts:
            # Weights / bias have a constant index_map: a single resident VMEM
            # buffer is enough (saves a second copy of the weight slab).
            w_spec = pl.BlockSpec((KH, KW, Cin_p, Cout_p),
                                  lambda n, g, r: (0, 0, 0, 0),
                                  pipeline_mode=pl.Buffered(1))
            b_spec = pl.BlockSpec((1, Cout_p), lambda n, g, r: (0, 0),
                                  pipeline_mode=pl.Buffered(1))
        else:
            w_spec = pl.BlockSpec((KH, KW, Cin_p, Cout_p),
                                  lambda n, g, r: (0, 0, 0, 0))
            b_spec = pl.BlockSpec((1, Cout_p), lambda n, g, r: (0, 0))

        grid_spec = pltpu.PrefetchScalarGridSpec(
            num_scalar_prefetch=0,
            grid=(N, G, Rg),
            in_specs=[
                pl.BlockSpec(memory_space=pl.ANY),      # x stays in HBM; manual DMA
                w_spec,
                b_spec,
            ],
            out_specs=pl.BlockSpec((1, RT, Wo_p, Cout_p),
                                   lambda n, g, r: (n, g * Rg + r, 0, 0)),
            scratch_shapes=[
                pltpu.VMEM((2, RT_IN, Wp, Cin_p), compute_dtype),  # dbl-buffered rows
                pltpu.SemaphoreType.DMA((2,)),
            ],
        )
        return pl.pallas_call(
            kernel,
            out_shape=jax.ShapeDtypeStruct((N, Ho_pad, Wo_p, Cout_p), out_dtype),
            grid_spec=grid_spec,
            compiler_params=pltpu.CompilerParams(
                dimension_semantics=("parallel", "parallel", "arbitrary"),
                vmem_limit_bytes=vmem_limit),
        )(xp, w_p, bias_p)

    try:
        out_nhwc = call(True)
    except Exception:
        # pipeline_mode=pl.Buffered(1) unsupported by this Pallas build:
        # fall back to the (still correct) default double-buffered specs.
        out_nhwc = call(False)

    # Drop row / width / channel padding; NHWC -> NCHW (PyTorch convention).
    out_nhwc = out_nhwc[:, :Ho, :Wo, :Cout]
    return jnp.transpose(out_nhwc, (0, 3, 1, 2))


# ----------------------------------------------------------------------------
# Pure-JAX references for correctness checking.
# ----------------------------------------------------------------------------
def _reference_forward(x_nchw, w_oihw, gamma, beta, running_mean, running_var,
                       *, padding, dilation, eps=1e-5):
    """Exact f32 reference of the PyTorch module (inference BN)."""
    x = jnp.transpose(x_nchw, (0, 2, 3, 1))
    w = jnp.transpose(w_oihw, (2, 3, 1, 0))
    y = jax.lax.conv_general_dilated(
        x, w, window_strides=(1, 1),
        padding=((padding, padding), (padding, padding)),
        rhs_dilation=(dilation, dilation),
        dimension_numbers=("NHWC", "HWIO", "NHWC"),
        precision=jax.lax.Precision.HIGHEST)
    inv_std = 1.0 / jnp.sqrt(running_var + eps)
    y = (y - running_mean) * (gamma * inv_std) + beta
    return jnp.transpose(jnp.maximum(y, 0.0), (0, 3, 1, 2))


def _reference_forward_bf16(x_nchw, w_oihw, gamma, beta, running_mean,
                            running_var, *, padding, dilation, eps=1e-5):
    """Reference using the same bf16-quantized operands / folded weights as the
    kernel, so the comparison isolates kernel correctness from bf16 rounding."""
    inv_std = 1.0 / jnp.sqrt(running_var + eps)
    scale = gamma * inv_std
    bias = beta - running_mean * scale
    x = jnp.transpose(x_nchw, (0, 2, 3, 1)).astype(jnp.bfloat16).astype(jnp.float32)
    w = (jnp.transpose(w_oihw, (2, 3, 1, 0)) * scale)
    w = w.astype(jnp.bfloat16).astype(jnp.float32)
    y = jax.lax.conv_general_dilated(
        x, w, window_strides=(1, 1),
        padding=((padding, padding), (padding, padding)),
        rhs_dilation=(dilation, dilation),
        dimension_numbers=("NHWC", "HWIO", "NHWC"),
        precision=jax.lax.Precision.HIGHEST)
    y = jnp.maximum(y + bias, 0.0)
    return jnp.transpose(y, (0, 3, 1, 2))


if __name__ == "__main__":
    # Small ASPP branch: inplanes=4, planes=8, kernel_size=3, dilation=2, padding=2
    N, Cin, H, W = 2, 4, 16, 16
    Cout, KH, KW = 8, 3, 3
    padding, dilation = 2, 2

    key = jax.random.PRNGKey(0)
    kx, kw = jax.random.split(key)

    x = jax.random.normal(kx, (N, Cin, H, W), dtype=jnp.float32)

    # kaiming_normal_ (fan_in, relu): std = sqrt(2 / (Cin * KH * KW))
    fan_in = Cin * KH * KW
    w_conv = jax.random.normal(kw, (Cout, Cin, KH, KW), dtype=jnp.float32)
    w_conv = w_conv * jnp.sqrt(2.0 / fan_in)

    # BatchNorm params per _init_weight: weight=1, bias=0; running stats 0/1.
    gamma = jnp.ones((Cout,), jnp.float32)
    beta = jnp.zeros((Cout,), jnp.float32)
    running_mean = jnp.zeros((Cout,), jnp.float32)
    running_var = jnp.ones((Cout,), jnp.float32)

    # Explicit small tiles: exercises priming, prefetch and both parallel axes
    # (4 row tiles = 2 groups x 2 tiles per batch element).
    out = aspp_forward(x, w_conv, gamma, beta, running_mean, running_var,
                       padding=padding, dilation=dilation,
                       row_tile=4, row_groups=2)
    out = jax.block_until_ready(out)
    assert out.shape == (N, Cout, H, W), out.shape

    # Auto-config path (generation-aware row_tile / row_groups / VMEM limit).
    out_auto = aspp_forward(x, w_conv, gamma, beta, running_mean, running_var,
                            padding=padding, dilation=dilation)
    out_auto = jax.block_until_ready(out_auto)
    assert out_auto.shape == (N, Cout, H, W), out_auto.shape

    ref_q = _reference_forward_bf16(x, w_conv, gamma, beta, running_mean,
                                    running_var, padding=padding, dilation=dilation)
    ref = _reference_forward(x, w_conv, gamma, beta, running_mean, running_var,
                             padding=padding, dilation=dilation)

    # Tight check: same bf16-quantized operands -> validates the kernel itself.
    err_q = float(jnp.max(jnp.abs(out - ref_q)))
    assert jnp.allclose(out, ref_q, atol=2e-3, rtol=2e-3), err_q
    err_qa = float(jnp.max(jnp.abs(out_auto - ref_q)))
    assert jnp.allclose(out_auto, ref_q, atol=2e-3, rtol=2e-3), err_qa
    # Loose check: against the full-f32 module semantics (bf16 compute error).
    err = float(jnp.max(jnp.abs(out - ref)))
    assert jnp.allclose(out, ref, atol=5e-2, rtol=5e-2), err

    print("KERNEL_OK")
</pallas_src>

<mosaic_0001>
module attributes {stable_mosaic.version = 11 : i64} {
  func.func @_aspp_kernel(%arg0: i32, %arg1: i32, %arg2: i32, %arg3: memref<2x20x24x128xbf16, #tpu.memory_space<any>>, %arg4: memref<3x3x128x128xbf16, #tpu.memory_space<vmem>>, %arg5: memref<1x128xf32, #tpu.memory_space<vmem>>, %arg6: memref<1x4x16x128xf32, #tpu.memory_space<vmem>>, %arg7: memref<2x8x24x128xbf16, #tpu.memory_space<vmem>>, %arg8: memref<2x!tpu.dma_semaphore, #tpu.memory_space<semaphore_mem>>) attributes {dimension_semantics = [#tpu.dimension_semantics<parallel>, #tpu.dimension_semantics<parallel>, #tpu.dimension_semantics<arbitrary>], iteration_bounds = array<i64: 2, 2, 2>, scalar_prefetch = 0 : i64, scratch_operands = 2 : i64, tpu.core_type = #tpu.core_type<tc>, window_params = [{}, {pipeline_mode = #tpu.pipeline_mode<synchronous>, transform_indices = @transform_1, window_bounds = array<i64: 3, 3, 128, 128>}, {pipeline_mode = #tpu.pipeline_mode<synchronous>, transform_indices = @transform_2, window_bounds = array<i64: 1, 128>}, {transform_indices = @transform_3, window_bounds = array<i64: 1, 4, 16, 128>}]} {
    %c2_i32 = arith.constant 2 : i32
    %0 = arith.muli %arg1, %c2_i32 : i32
    %1 = arith.addi %0, %arg2 : i32
    %c2_i32_0 = arith.constant 2 : i32
    %c0_i32 = arith.constant 0 : i32
    %2 = arith.cmpi eq, %c2_i32_0, %c0_i32 : i32
    %c1_i32 = arith.constant 1 : i32
    %3 = arith.select %2, %c1_i32, %c2_i32_0 : i32
    %4 = arith.remsi %arg2, %3 : i32
    %c0_i32_1 = arith.constant 0 : i32
    %5 = arith.cmpi ne, %4, %c0_i32_1 : i32
    %c0_i32_2 = arith.constant 0 : i32
    %6 = arith.cmpi slt, %4, %c0_i32_2 : i32
    %c0_i32_3 = arith.constant 0 : i32
    %7 = arith.cmpi slt, %3, %c0_i32_3 : i32
    %8 = arith.xori %6, %7 : i1
    %9 = arith.andi %8, %5 : i1
    %10 = arith.addi %4, %3 : i32
    %11 = arith.select %9, %10, %4 : i32
    %c0_i32_4 = arith.constant 0 : i32
    %12 = arith.cmpi eq, %arg2, %c0_i32_4 : i32
    %13 = arith.extui %12 : i1 to i32
    %c0_i32_5 = arith.constant 0 : i32
    %14 = arith.cmpi ne, %13, %c0_i32_5 : i32
    scf.if %14 {
      %c4_i32_89 = arith.constant 4 : i32
      %111 = arith.muli %1, %c4_i32_89 : i32
      %112 = tpu.assume_multiple %111, 4 : i32
      %c0_i32_90 = arith.constant 0 : i32
      %c0_i32_91 = arith.constant 0 : i32
      %113 = tpu.memref_slice %arg3[%arg0, %112, %c0_i32_90, %c0_i32_91] : memref<2x20x24x128xbf16, #tpu.memory_space<any>> -> memref<1x8x24x128xbf16, #tpu.memory_space<any>>
      %114 = tpu.memref_squeeze %113 : memref<1x8x24x128xbf16, #tpu.memory_space<any>> -> memref<8x24x128xbf16, #tpu.memory_space<any>>
      %c0_i32_92 = arith.constant 0 : i32
      %c0_i32_93 = arith.constant 0 : i32
      %c0_i32_94 = arith.constant 0 : i32
      %115 = tpu.memref_slice %arg7[%11, %c0_i32_92, %c0_i32_93, %c0_i32_94] : memref<2x8x24x128xbf16, #tpu.memory_space<vmem>> -> memref<1x8x24x128xbf16, #tpu.memory_space<vmem>>
      %116 = tpu.memref_squeeze %115 : memref<1x8x24x128xbf16, #tpu.memory_space<vmem>> -> memref<8x24x128xbf16, #tpu.memory_space<vmem>>
      %117 = tpu.memref_slice %arg8[%11] : memref<2x!tpu.dma_semaphore, #tpu.memory_space<semaphore_mem>> -> memref<1x!tpu.dma_semaphore, #tpu.memory_space<semaphore_mem>>
      %118 = tpu.memref_squeeze %117 : memref<1x!tpu.dma_semaphore, #tpu.memory_space<semaphore_mem>> -> memref<!tpu.dma_semaphore, #tpu.memory_space<semaphore_mem>>
      tpu.enqueue_dma source(%114 : memref<8x24x128xbf16, #tpu.memory_space<any>>) target(%116 : memref<8x24x128xbf16, #tpu.memory_space<vmem>>) target_semaphore(%118 : memref<!tpu.dma_semaphore, #tpu.memory_space<semaphore_mem>>)
    } else {
    }
    %c1_i32_6 = arith.constant 1 : i32
    %15 = arith.addi %arg2, %c1_i32_6 : i32
    %c2_i32_7 = arith.constant 2 : i32
    %16 = arith.cmpi slt, %15, %c2_i32_7 : i32
    %17 = arith.extui %16 : i1 to i32
    %c0_i32_8 = arith.constant 0 : i32
    %18 = arith.cmpi ne, %17, %c0_i32_8 : i32
    scf.if %18 {
      %c1_i32_89 = arith.constant 1 : i32
      %111 = arith.addi %1, %c1_i32_89 : i32
      %c1_i32_90 = arith.constant 1 : i32
      %112 = arith.subi %c1_i32_90, %11 : i32
      %c4_i32_91 = arith.constant 4 : i32
      %113 = arith.muli %111, %c4_i32_91 : i32
      %114 = tpu.assume_multiple %113, 4 : i32
      %c0_i32_92 = arith.constant 0 : i32
      %c0_i32_93 = arith.constant 0 : i32
      %115 = tpu.memref_slice %arg3[%arg0, %114, %c0_i32_92, %c0_i32_93] : memref<2x20x24x128xbf16, #tpu.memory_space<any>> -> memref<1x8x24x128xbf16, #tpu.memory_space<any>>
      %116 = tpu.memref_squeeze %115 : memref<1x8x24x128xbf16, #tpu.memory_space<any>> -> memref<8x24x128xbf16, #tpu.memory_space<any>>
      %c0_i32_94 = arith.constant 0 : i32
      %c0_i32_95 = arith.constant 0 : i32
      %c0_i32_96 = arith.constant 0 : i32
      %117 = tpu.memref_slice %arg7[%112, %c0_i32_94, %c0_i32_95, %c0_i32_96] : memref<2x8x24x128xbf16, #tpu.memory_space<vmem>> -> memref<1x8x24x128xbf16, #tpu.memory_space<vmem>>
      %118 = tpu.memref_squeeze %117 : memref<1x8x24x128xbf16, #tpu.memory_space<vmem>> -> memref<8x24x128xbf16, #tpu.memory_space<vmem>>
      %119 = tpu.memref_slice %arg8[%112] : memref<2x!tpu.dma_semaphore, #tpu.memory_space<semaphore_mem>> -> memref<1x!tpu.dma_semaphore, #tpu.memory_space<semaphore_mem>>
      %120 = tpu.memref_squeeze %119 : memref<1x!tpu.dma_semaphore, #tpu.memory_space<semaphore_mem>> -> memref<!tpu.dma_semaphore, #tpu.memory_space<semaphore_mem>>
      tpu.enqueue_dma source(%116 : memref<8x24x128xbf16, #tpu.memory_space<any>>) target(%118 : memref<8x24x128xbf16, #tpu.memory_space<vmem>>) target_semaphore(%120 : memref<!tpu.dma_semaphore, #tpu.memory_space<semaphore_mem>>)
    } else {
    }
    %c4_i32 = arith.constant 4 : i32
    %19 = arith.muli %1, %c4_i32 : i32
    %20 = tpu.assume_multiple %19, 4 : i32
    %c0_i32_9 = arith.constant 0 : i32
    %c0_i32_10 = arith.constant 0 : i32
    %21 = tpu.memref_slice %arg3[%arg0, %20, %c0_i32_9, %c0_i32_10] : memref<2x20x24x128xbf16, #tpu.memory_space<any>> -> memref<1x8x24x128xbf16, #tpu.memory_space<any>>
    %22 = tpu.memref_squeeze %21 : memref<1x8x24x128xbf16, #tpu.memory_space<any>> -> memref<8x24x128xbf16, #tpu.memory_space<any>>
    %c0_i32_11 = arith.constant 0 : i32
    %c0_i32_12 = arith.constant 0 : i32
    %c0_i32_13 = arith.constant 0 : i32
    %23 = tpu.memref_slice %arg7[%11, %c0_i32_11, %c0_i32_12, %c0_i32_13] : memref<2x8x24x128xbf16, #tpu.memory_space<vmem>> -> memref<1x8x24x128xbf16, #tpu.memory_space<vmem>>
    %24 = tpu.memref_squeeze %23 : memref<1x8x24x128xbf16, #tpu.memory_space<vmem>> -> memref<8x24x128xbf16, #tpu.memory_space<vmem>>
    %25 = tpu.memref_slice %arg8[%11] : memref<2x!tpu.dma_semaphore, #tpu.memory_space<semaphore_mem>> -> memref<1x!tpu.dma_semaphore, #tpu.memory_space<semaphore_mem>>
    %26 = tpu.memref_squeeze %25 : memref<1x!tpu.dma_semaphore, #tpu.memory_space<semaphore_mem>> -> memref<!tpu.dma_semaphore, #tpu.memory_space<semaphore_mem>>
    tpu.wait_dma2 semaphore(%26 : memref<!tpu.dma_semaphore, #tpu.memory_space<semaphore_mem>>) src(%22 : memref<8x24x128xbf16, #tpu.memory_space<any>>) dst(%24 : memref<8x24x128xbf16, #tpu.memory_space<vmem>>)
    %cst = arith.constant 0.000000e+00 : f32
    %27 = vector.broadcast %cst : f32 to vector<64x128xf32>
    %28 = arith.index_cast %11 : i32 to index
    %c0 = arith.constant 0 : index
    %c0_14 = arith.constant 0 : index
    %c0_15 = arith.constant 0 : index
    %29 = vector.load %arg7[%28, %c0, %c0_14, %c0_15] : memref<2x8x24x128xbf16, #tpu.memory_space<vmem>>, vector<1x4x16x128xbf16>
    %30 = vector.shape_cast %29 : vector<1x4x16x128xbf16> to vector<4x16x128xbf16>
    %31 = vector.shape_cast %30 : vector<4x16x128xbf16> to vector<64x128xbf16>
    %c0_16 = arith.constant 0 : index
    %c0_17 = arith.constant 0 : index
    %c0_18 = arith.constant 0 : index
    %c0_19 = arith.constant 0 : index
    %32 = vector.load %arg4[%c0_16, %c0_17, %c0_18, %c0_19] : memref<3x3x128x128xbf16, #tpu.memory_space<vmem>>, vector<1x1x128x128xbf16>
    %33 = vector.shape_cast %32 : vector<1x1x128x128xbf16> to vector<128x128xbf16>
    %cst_20 = arith.constant dense<0.000000e+00> : vector<64x128xf32>
    %34 = tpu.matmul %31, %33, %cst_20 {dimension_numbers = #tpu.dot_dimension_numbers<[1], [0], [0], [1], [0, 0, 1, 1], [], []>} : vector<64x128xbf16>, vector<128x128xbf16>, vector<64x128xf32> -> vector<64x128xf32>
    %35 = arith.addf %27, %34 : vector<64x128xf32>
    %36 = arith.index_cast %11 : i32 to index
    %c0_21 = arith.constant 0 : index
    %c2 = arith.constant 2 : index
    %c0_22 = arith.constant 0 : index
    %37 = vector.load %arg7[%36, %c0_21, %c2, %c0_22] : memref<2x8x24x128xbf16, #tpu.memory_space<vmem>>, vector<1x4x16x128xbf16>
    %38 = vector.shape_cast %37 : vector<1x4x16x128xbf16> to vector<4x16x128xbf16>
    %39 = vector.shape_cast %38 : vector<4x16x128xbf16> to vector<64x128xbf16>
    %c0_23 = arith.constant 0 : index
    %c1 = arith.constant 1 : index
    %c0_24 = arith.constant 0 : index
    %c0_25 = arith.constant 0 : index
    %40 = vector.load %arg4[%c0_23, %c1, %c0_24, %c0_25] : memref<3x3x128x128xbf16, #tpu.memory_space<vmem>>, vector<1x1x128x128xbf16>
    %41 = vector.shape_cast %40 : vector<1x1x128x128xbf16> to vector<128x128xbf16>
    %cst_26 = arith.constant dense<0.000000e+00> : vector<64x128xf32>
    %42 = tpu.matmul %39, %41, %cst_26 {dimension_numbers = #tpu.dot_dimension_numbers<[1], [0], [0], [1], [0, 0, 1, 1], [], []>} : vector<64x128xbf16>, vector<128x128xbf16>, vector<64x128xf32> -> vector<64x128xf32>
    %43 = arith.addf %35, %42 : vector<64x128xf32>
    %44 = arith.index_cast %11 : i32 to index
    %c0_27 = arith.constant 0 : index
    %c4 = arith.constant 4 : index
    %c0_28 = arith.constant 0 : index
    %45 = vector.load %arg7[%44, %c0_27, %c4, %c0_28] : memref<2x8x24x128xbf16, #tpu.memory_space<vmem>>, vector<1x4x16x128xbf16>
    %46 = vector.shape_cast %45 : vector<1x4x16x128xbf16> to vector<4x16x128xbf16>
    %47 = vector.shape_cast %46 : vector<4x16x128xbf16> to vector<64x128xbf16>
    %c0_29 = arith.constant 0 : index
    %c2_30 = arith.constant 2 : index
    %c0_31 = arith.constant 0 : index
    %c0_32 = arith.constant 0 : index
    %48 = vector.load %arg4[%c0_29, %c2_30, %c0_31, %c0_32] : memref<3x3x128x128xbf16, #tpu.memory_space<vmem>>, vector<1x1x128x128xbf16>
    %49 = vector.shape_cast %48 : vector<1x1x128x128xbf16> to vector<128x128xbf16>
    %cst_33 = arith.constant dense<0.000000e+00> : vector<64x128xf32>
    %50 = tpu.matmul %47, %49, %cst_33 {dimension_numbers = #tpu.dot_dimension_numbers<[1], [0], [0], [1], [0, 0, 1, 1], [], []>} : vector<64x128xbf16>, vector<128x128xbf16>, vector<64x128xf32> -> vector<64x128xf32>
    %51 = arith.addf %43, %50 : vector<64x128xf32>
    %52 = arith.index_cast %11 : i32 to index
    %c2_34 = arith.constant 2 : index
    %c0_35 = arith.constant 0 : index
    %c0_36 = arith.constant 0 : index
    %53 = vector.load %arg7[%52, %c2_34, %c0_35, %c0_36] : memref<2x8x24x128xbf16, #tpu.memory_space<vmem>>, vector<1x4x16x128xbf16>
    %54 = vector.shape_cast %53 : vector<1x4x16x128xbf16> to vector<4x16x128xbf16>
    %55 = vector.shape_cast %54 : vector<4x16x128xbf16> to vector<64x128xbf16>
    %c1_37 = arith.constant 1 : index
    %c0_38 = arith.constant 0 : index
    %c0_39 = arith.constant 0 : index
    %c0_40 = arith.constant 0 : index
    %56 = vector.load %arg4[%c1_37, %c0_38, %c0_39, %c0_40] : memref<3x3x128x128xbf16, #tpu.memory_space<vmem>>, vector<1x1x128x128xbf16>
    %57 = vector.shape_cast %56 : vector<1x1x128x128xbf16> to vector<128x128xbf16>
    %cst_41 = arith.constant dense<0.000000e+00> : vector<64x128xf32>
    %58 = tpu.matmul %55, %57, %cst_41 {dimension_numbers = #tpu.dot_dimension_numbers<[1], [0], [0], [1], [0, 0, 1, 1], [], []>} : vector<64x128xbf16>, vector<128x128xbf16>, vector<64x128xf32> -> vector<64x128xf32>
    %59 = arith.addf %51, %58 : vector<64x128xf32>
    %60 = arith.index_cast %11 : i32 to index
    %c2_42 = arith.constant 2 : index
    %c2_43 = arith.constant 2 : index
    %c0_44 = arith.constant 0 : index
    %61 = vector.load %arg7[%60, %c2_42, %c2_43, %c0_44] : memref<2x8x24x128xbf16, #tpu.memory_space<vmem>>, vector<1x4x16x128xbf16>
    %62 = vector.shape_cast %61 : vector<1x4x16x128xbf16> to vector<4x16x128xbf16>
    %63 = vector.shape_cast %62 : vector<4x16x128xbf16> to vector<64x128xbf16>
    %c1_45 = arith.constant 1 : index
    %c1_46 = arith.constant 1 : index
    %c0_47 = arith.constant 0 : index
    %c0_48 = arith.constant 0 : index
    %64 = vector.load %arg4[%c1_45, %c1_46, %c0_47, %c0_48] : memref<3x3x128x128xbf16, #tpu.memory_space<vmem>>, vector<1x1x128x128xbf16>
    %65 = vector.shape_cast %64 : vector<1x1x128x128xbf16> to vector<128x128xbf16>
    %cst_49 = arith.constant dense<0.000000e+00> : vector<64x128xf32>
    %66 = tpu.matmul %63, %65, %cst_49 {dimension_numbers = #tpu.dot_dimension_numbers<[1], [0], [0], [1], [0, 0, 1, 1], [], []>} : vector<64x128xbf16>, vector<128x128xbf16>, vector<64x128xf32> -> vector<64x128xf32>
    %67 = arith.addf %59, %66 : vector<64x128xf32>
    %68 = arith.index_cast %11 : i32 to index
    %c2_50 = arith.constant 2 : index
    %c4_51 = arith.constant 4 : index
    %c0_52 = arith.constant 0 : index
    %69 = vector.load %arg7[%68, %c2_50, %c4_51, %c0_52] : memref<2x8x24x128xbf16, #tpu.memory_space<vmem>>, vector<1x4x16x128xbf16>
    %70 = vector.shape_cast %69 : vector<1x4x16x128xbf16> to vector<4x16x128xbf16>
    %71 = vector.shape_cast %70 : vector<4x16x128xbf16> to vector<64x128xbf16>
    %c1_53 = arith.constant 1 : index
    %c2_54 = arith.constant 2 : index
    %c0_55 = arith.constant 0 : index
    %c0_56 = arith.constant 0 : index
    %72 = vector.load %arg4[%c1_53, %c2_54, %c0_55, %c0_56] : memref<3x3x128x128xbf16, #tpu.memory_space<vmem>>, vector<1x1x128x128xbf16>
    %73 = vector.shape_cast %72 : vector<1x1x128x128xbf16> to vector<128x128xbf16>
    %cst_57 = arith.constant dense<0.000000e+00> : vector<64x128xf32>
    %74 = tpu.matmul %71, %73, %cst_57 {dimension_numbers = #tpu.dot_dimension_numbers<[1], [0], [0], [1], [0, 0, 1, 1], [], []>} : vector<64x128xbf16>, vector<128x128xbf16>, vector<64x128xf32> -> vector<64x128xf32>
    %75 = arith.addf %67, %74 : vector<64x128xf32>
    %76 = arith.index_cast %11 : i32 to index
    %c4_58 = arith.constant 4 : index
    %c0_59 = arith.constant 0 : index
    %c0_60 = arith.constant 0 : index
    %77 = vector.load %arg7[%76, %c4_58, %c0_59, %c0_60] : memref<2x8x24x128xbf16, #tpu.memory_space<vmem>>, vector<1x4x16x128xbf16>
    %78 = vector.shape_cast %77 : vector<1x4x16x128xbf16> to vector<4x16x128xbf16>
    %79 = vector.shape_cast %78 : vector<4x16x128xbf16> to vector<64x128xbf16>
    %c2_61 = arith.constant 2 : index
    %c0_62 = arith.constant 0 : index
    %c0_63 = arith.constant 0 : index
    %c0_64 = arith.constant 0 : index
    %80 = vector.load %arg4[%c2_61, %c0_62, %c0_63, %c0_64] : memref<3x3x128x128xbf16, #tpu.memory_space<vmem>>, vector<1x1x128x128xbf16>
    %81 = vector.shape_cast %80 : vector<1x1x128x128xbf16> to vector<128x128xbf16>
    %cst_65 = arith.constant dense<0.000000e+00> : vector<64x128xf32>
    %82 = tpu.matmul %79, %81, %cst_65 {dimension_numbers = #tpu.dot_dimension_numbers<[1], [0], [0], [1], [0, 0, 1, 1], [], []>} : vector<64x128xbf16>, vector<128x128xbf16>, vector<64x128xf32> -> vector<64x128xf32>
    %83 = arith.addf %75, %82 : vector<64x128xf32>
    %84 = arith.index_cast %11 : i32 to index
    %c4_66 = arith.constant 4 : index
    %c2_67 = arith.constant 2 : index
    %c0_68 = arith.constant 0 : index
    %85 = vector.load %arg7[%84, %c4_66, %c2_67, %c0_68] : memref<2x8x24x128xbf16, #tpu.memory_space<vmem>>, vector<1x4x16x128xbf16>
    %86 = vector.shape_cast %85 : vector<1x4x16x128xbf16> to vector<4x16x128xbf16>
    %87 = vector.shape_cast %86 : vector<4x16x128xbf16> to vector<64x128xbf16>
    %c2_69 = arith.constant 2 : index
    %c1_70 = arith.constant 1 : index
    %c0_71 = arith.constant 0 : index
    %c0_72 = arith.constant 0 : index
    %88 = vector.load %arg4[%c2_69, %c1_70, %c0_71, %c0_72] : memref<3x3x128x128xbf16, #tpu.memory_space<vmem>>, vector<1x1x128x128xbf16>
    %89 = vector.shape_cast %88 : vector<1x1x128x128xbf16> to vector<128x128xbf16>
    %cst_73 = arith.constant dense<0.000000e+00> : vector<64x128xf32>
    %90 = tpu.matmul %87, %89, %cst_73 {dimension_numbers = #tpu.dot_dimension_numbers<[1], [0], [0], [1], [0, 0, 1, 1], [], []>} : vector<64x128xbf16>, vector<128x128xbf16>, vector<64x128xf32> -> vector<64x128xf32>
    %91 = arith.addf %83, %90 : vector<64x128xf32>
    %92 = arith.index_cast %11 : i32 to index
    %c4_74 = arith.constant 4 : index
    %c4_75 = arith.constant 4 : index
    %c0_76 = arith.constant 0 : index
    %93 = vector.load %arg7[%92, %c4_74, %c4_75, %c0_76] : memref<2x8x24x128xbf16, #tpu.memory_space<vmem>>, vector<1x4x16x128xbf16>
    %94 = vector.shape_cast %93 : vector<1x4x16x128xbf16> to vector<4x16x128xbf16>
    %95 = vector.shape_cast %94 : vector<4x16x128xbf16> to vector<64x128xbf16>
    %c2_77 = arith.constant 2 : index
    %c2_78 = arith.constant 2 : index
    %c0_79 = arith.constant 0 : index
    %c0_80 = arith.constant 0 : index
    %96 = vector.load %arg4[%c2_77, %c2_78, %c0_79, %c0_80] : memref<3x3x128x128xbf16, #tpu.memory_space<vmem>>, vector<1x1x128x128xbf16>
    %97 = vector.shape_cast %96 : vector<1x1x128x128xbf16> to vector<128x128xbf16>
    %cst_81 = arith.constant dense<0.000000e+00> : vector<64x128xf32>
    %98 = tpu.matmul %95, %97, %cst_81 {dimension_numbers = #tpu.dot_dimension_numbers<[1], [0], [0], [1], [0, 0, 1, 1], [], []>} : vector<64x128xbf16>, vector<128x128xbf16>, vector<64x128xf32> -> vector<64x128xf32>
    %99 = arith.addf %91, %98 : vector<64x128xf32>
    %100 = vector.shape_cast %99 : vector<64x128xf32> to vector<4x16x128xf32>
    %c0_82 = arith.constant 0 : index
    %c0_83 = arith.constant 0 : index
    %101 = vector.load %arg5[%c0_82, %c0_83] : memref<1x128xf32, #tpu.memory_space<vmem>>, vector<1x128xf32>
    %102 = vector.shape_cast %101 : vector<1x128xf32> to vector<128xf32>
    %103 = vector.shape_cast %102 : vector<128xf32> to vector<1x1x128xf32>
    %104 = vector.broadcast %103 : vector<1x1x128xf32> to vector<4x16x128xf32>
    %105 = arith.addf %100, %104 : vector<4x16x128xf32>
    %cst_84 = arith.constant 0.000000e+00 : f32
    %106 = vector.broadcast %cst_84 : f32 to vector<4x16x128xf32>
    %107 = arith.maximumf %105, %106 : vector<4x16x128xf32>
    %c0_85 = arith.constant 0 : index
    %c0_86 = arith.constant 0 : index
    %c0_87 = arith.constant 0 : index
    %c0_88 = arith.constant 0 : index
    %108 = vector.load %arg6[%c0_85, %c0_86, %c0_87, %c0_88] : memref<1x4x16x128xf32, #tpu.memory_space<vmem>>, vector<1x4x16x128xf32>
    %109 = vector.shape_cast %108 : vector<1x4x16x128xf32> to vector<4x16x128xf32>
    %110 = vector.shape_cast %107 : vector<4x16x128xf32> to vector<1x4x16x128xf32>
    tpu.vector_store %arg6[%c0_85, %c0_86, %c0_87, %c0_88], %110 {strides = array<i32>} : memref<1x4x16x128xf32, #tpu.memory_space<vmem>>, vector<1x4x16x128xf32>,
    return
  }
  func.func @transform_1(%arg0: i32, %arg1: i32, %arg2: i32) -> (i32, i32, i32, i32) {
    %c0_i32 = arith.constant 0 : i32
    %c0_i32_0 = arith.constant 0 : i32
    %c0_i32_1 = arith.constant 0 : i32
    %c0_i32_2 = arith.constant 0 : i32
    %c0_i32_3 = arith.constant 0 : i32
    return %c0_i32, %c0_i32_0, %c0_i32_1, %c0_i32_2 : i32, i32, i32, i32
  }
  func.func @transform_2(%arg0: i32, %arg1: i32, %arg2: i32) -> (i32, i32) {
    %c0_i32 = arith.constant 0 : i32
    %c0_i32_0 = arith.constant 0 : i32
    %c0_i32_1 = arith.constant 0 : i32
    return %c0_i32, %c0_i32_0 : i32, i32
  }
  func.func @transform_3(%arg0: i32, %arg1: i32, %arg2: i32) -> (i32, i32, i32, i32) {
    %c2_i32 = arith.constant 2 : i32
    %0 = arith.muli %arg1, %c2_i32 : i32
    %1 = arith.addi %0, %arg2 : i32
    %c0_i32 = arith.constant 0 : i32
    %c0_i32_0 = arith.constant 0 : i32
    %c0_i32_1 = arith.constant 0 : i32
    return %arg0, %1, %c0_i32, %c0_i32_0 : i32, i32, i32, i32
  }
}

module attributes {stable_mosaic.version = 11 : i64} {
  func.func @_aspp_kernel(%arg0: i32, %arg1: i32, %arg2: i32, %arg3: memref<2x20x24x128xbf16, #tpu.memory_space<any>>, %arg4: memref<3x3x128x128xbf16, #tpu.memory_space<vmem>>, %arg5: memref<1x128xf32, #tpu.memory_space<vmem>>, %arg6: memref<1x4x16x128xf32, #tpu.memory_space<vmem>>, %arg7: memref<2x8x24x128xbf16, #tpu.memory_space<vmem>>, %arg8: memref<2x!tpu.dma_semaphore, #tpu.memory_space<semaphore_mem>>) attributes {dimension_semantics = [#tpu.dimension_semantics<parallel>, #tpu.dimension_semantics<parallel>, #tpu.dimension_semantics<arbitrary>], iteration_bounds = array<i64: 2, 2, 2>, scalar_prefetch = 0 : i64, scratch_operands = 2 : i64, tpu.core_type = #tpu.core_type<tc>, window_params = [{}, {pipeline_mode = #tpu.pipeline_mode<synchronous>, transform_indices = @transform_1, window_bounds = array<i64: 3, 3, 128, 128>}, {pipeline_mode = #tpu.pipeline_mode<synchronous>, transform_indices = @transform_2, window_bounds = array<i64: 1, 128>}, {transform_indices = @transform_3, window_bounds = array<i64: 1, 4, 16, 128>}]} {
    %c2_i32 = arith.constant 2 : i32
    %0 = arith.muli %arg1, %c2_i32 : i32
    %1 = arith.addi %0, %arg2 : i32
    %c2_i32_0 = arith.constant 2 : i32
    %c0_i32 = arith.constant 0 : i32
    %2 = arith.cmpi eq, %c2_i32_0, %c0_i32 : i32
    %c1_i32 = arith.constant 1 : i32
    %3 = arith.select %2, %c1_i32, %c2_i32_0 : i32
    %4 = arith.remsi %arg2, %3 : i32
    %c0_i32_1 = arith.constant 0 : i32
    %5 = arith.cmpi ne, %4, %c0_i32_1 : i32
    %c0_i32_2 = arith.constant 0 : i32
    %6 = arith.cmpi slt, %4, %c0_i32_2 : i32
    %c0_i32_3 = arith.constant 0 : i32
    %7 = arith.cmpi slt, %3, %c0_i32_3 : i32
    %8 = arith.xori %6, %7 : i1
    %9 = arith.andi %8, %5 : i1
    %10 = arith.addi %4, %3 : i32
    %11 = arith.select %9, %10, %4 : i32
    %c0_i32_4 = arith.constant 0 : i32
    %12 = arith.cmpi eq, %arg2, %c0_i32_4 : i32
    %13 = arith.extui %12 : i1 to i32
    %c0_i32_5 = arith.constant 0 : i32
    %14 = arith.cmpi ne, %13, %c0_i32_5 : i32
    scf.if %14 {
      %c4_i32_89 = arith.constant 4 : i32
      %111 = arith.muli %1, %c4_i32_89 : i32
      %112 = tpu.assume_multiple %111, 4 : i32
      %c0_i32_90 = arith.constant 0 : i32
      %c0_i32_91 = arith.constant 0 : i32
      %113 = tpu.memref_slice %arg3[%arg0, %112, %c0_i32_90, %c0_i32_91] : memref<2x20x24x128xbf16, #tpu.memory_space<any>> -> memref<1x8x24x128xbf16, #tpu.memory_space<any>>
      %114 = tpu.memref_squeeze %113 : memref<1x8x24x128xbf16, #tpu.memory_space<any>> -> memref<8x24x128xbf16, #tpu.memory_space<any>>
      %c0_i32_92 = arith.constant 0 : i32
      %c0_i32_93 = arith.constant 0 : i32
      %c0_i32_94 = arith.constant 0 : i32
      %115 = tpu.memref_slice %arg7[%11, %c0_i32_92, %c0_i32_93, %c0_i32_94] : memref<2x8x24x128xbf16, #tpu.memory_space<vmem>> -> memref<1x8x24x128xbf16, #tpu.memory_space<vmem>>
      %116 = tpu.memref_squeeze %115 : memref<1x8x24x128xbf16, #tpu.memory_space<vmem>> -> memref<8x24x128xbf16, #tpu.memory_space<vmem>>
      %117 = tpu.memref_slice %arg8[%11] : memref<2x!tpu.dma_semaphore, #tpu.memory_space<semaphore_mem>> -> memref<1x!tpu.dma_semaphore, #tpu.memory_space<semaphore_mem>>
      %118 = tpu.memref_squeeze %117 : memref<1x!tpu.dma_semaphore, #tpu.memory_space<semaphore_mem>> -> memref<!tpu.dma_semaphore, #tpu.memory_space<semaphore_mem>>
      tpu.enqueue_dma source(%114 : memref<8x24x128xbf16, #tpu.memory_space<any>>) target(%116 : memref<8x24x128xbf16, #tpu.memory_space<vmem>>) target_semaphore(%118 : memref<!tpu.dma_semaphore, #tpu.memory_space<semaphore_mem>>)
    } else {
    }
    %c1_i32_6 = arith.constant 1 : i32
    %15 = arith.addi %arg2, %c1_i32_6 : i32
    %c2_i32_7 = arith.constant 2 : i32
    %16 = arith.cmpi slt, %15, %c2_i32_7 : i32
    %17 = arith.extui %16 : i1 to i32
    %c0_i32_8 = arith.constant 0 : i32
    %18 = arith.cmpi ne, %17, %c0_i32_8 : i32
    scf.if %18 {
      %c1_i32_89 = arith.constant 1 : i32
      %111 = arith.addi %1, %c1_i32_89 : i32
      %c1_i32_90 = arith.constant 1 : i32
      %112 = arith.subi %c1_i32_90, %11 : i32
      %c4_i32_91 = arith.constant 4 : i32
      %113 = arith.muli %111, %c4_i32_91 : i32
      %114 = tpu.assume_multiple %113, 4 : i32
      %c0_i32_92 = arith.constant 0 : i32
      %c0_i32_93 = arith.constant 0 : i32
      %115 = tpu.memref_slice %arg3[%arg0, %114, %c0_i32_92, %c0_i32_93] : memref<2x20x24x128xbf16, #tpu.memory_space<any>> -> memref<1x8x24x128xbf16, #tpu.memory_space<any>>
      %116 = tpu.memref_squeeze %115 : memref<1x8x24x128xbf16, #tpu.memory_space<any>> -> memref<8x24x128xbf16, #tpu.memory_space<any>>
      %c0_i32_94 = arith.constant 0 : i32
      %c0_i32_95 = arith.constant 0 : i32
      %c0_i32_96 = arith.constant 0 : i32
      %117 = tpu.memref_slice %arg7[%112, %c0_i32_94, %c0_i32_95, %c0_i32_96] : memref<2x8x24x128xbf16, #tpu.memory_space<vmem>> -> memref<1x8x24x128xbf16, #tpu.memory_space<vmem>>
      %118 = tpu.memref_squeeze %117 : memref<1x8x24x128xbf16, #tpu.memory_space<vmem>> -> memref<8x24x128xbf16, #tpu.memory_space<vmem>>
      %119 = tpu.memref_slice %arg8[%112] : memref<2x!tpu.dma_semaphore, #tpu.memory_space<semaphore_mem>> -> memref<1x!tpu.dma_semaphore, #tpu.memory_space<semaphore_mem>>
      %120 = tpu.memref_squeeze %119 : memref<1x!tpu.dma_semaphore, #tpu.memory_space<semaphore_mem>> -> memref<!tpu.dma_semaphore, #tpu.memory_space<semaphore_mem>>
      tpu.enqueue_dma source(%116 : memref<8x24x128xbf16, #tpu.memory_space<any>>) target(%118 : memref<8x24x128xbf16, #tpu.memory_space<vmem>>) target_semaphore(%120 : memref<!tpu.dma_semaphore, #tpu.memory_space<semaphore_mem>>)
    } else {
    }
    %c4_i32 = arith.constant 4 : i32
    %19 = arith.muli %1, %c4_i32 : i32
    %20 = tpu.assume_multiple %19, 4 : i32
    %c0_i32_9 = arith.constant 0 : i32
    %c0_i32_10 = arith.constant 0 : i32
    %21 = tpu.memref_slice %arg3[%arg0, %20, %c0_i32_9, %c0_i32_10] : memref<2x20x24x128xbf16, #tpu.memory_space<any>> -> memref<1x8x24x128xbf16, #tpu.memory_space<any>>
    %22 = tpu.memref_squeeze %21 : memref<1x8x24x128xbf16, #tpu.memory_space<any>> -> memref<8x24x128xbf16, #tpu.memory_space<any>>
    %c0_i32_11 = arith.constant 0 : i32
    %c0_i32_12 = arith.constant 0 : i32
    %c0_i32_13 = arith.constant 0 : i32
    %23 = tpu.memref_slice %arg7[%11, %c0_i32_11, %c0_i32_12, %c0_i32_13] : memref<2x8x24x128xbf16, #tpu.memory_space<vmem>> -> memref<1x8x24x128xbf16, #tpu.memory_space<vmem>>
    %24 = tpu.memref_squeeze %23 : memref<1x8x24x128xbf16, #tpu.memory_space<vmem>> -> memref<8x24x128xbf16, #tpu.memory_space<vmem>>
    %25 = tpu.memref_slice %arg8[%11] : memref<2x!tpu.dma_semaphore, #tpu.memory_space<semaphore_mem>> -> memref<1x!tpu.dma_semaphore, #tpu.memory_space<semaphore_mem>>
    %26 = tpu.memref_squeeze %25 : memref<1x!tpu.dma_semaphore, #tpu.memory_space<semaphore_mem>> -> memref<!tpu.dma_semaphore, #tpu.memory_space<semaphore_mem>>
    tpu.wait_dma2 semaphore(%26 : memref<!tpu.dma_semaphore, #tpu.memory_space<semaphore_mem>>) src(%22 : memref<8x24x128xbf16, #tpu.memory_space<any>>) dst(%24 : memref<8x24x128xbf16, #tpu.memory_space<vmem>>)
    %cst = arith.constant 0.000000e+00 : f32
    %27 = vector.broadcast %cst : f32 to vector<64x128xf32>
    %28 = arith.index_cast %11 : i32 to index
    %c0 = arith.constant 0 : index
    %c0_14 = arith.constant 0 : index
    %c0_15 = arith.constant 0 : index
    %29 = vector.load %arg7[%28, %c0, %c0_14, %c0_15] : memref<2x8x24x128xbf16, #tpu.memory_space<vmem>>, vector<1x4x16x128xbf16>
    %30 = vector.shape_cast %29 : vector<1x4x16x128xbf16> to vector<4x16x128xbf16>
    %31 = vector.shape_cast %30 : vector<4x16x128xbf16> to vector<64x128xbf16>
    %c0_16 = arith.constant 0 : index
    %c0_17 = arith.constant 0 : index
    %c0_18 = arith.constant 0 : index
    %c0_19 = arith.constant 0 : index
    %32 = vector.load %arg4[%c0_16, %c0_17, %c0_18, %c0_19] : memref<3x3x128x128xbf16, #tpu.memory_space<vmem>>, vector<1x1x128x128xbf16>
    %33 = vector.shape_cast %32 : vector<1x1x128x128xbf16> to vector<128x128xbf16>
    %cst_20 = arith.constant dense<0.000000e+00> : vector<64x128xf32>
    %34 = tpu.matmul %31, %33, %cst_20 {dimension_numbers = #tpu.dot_dimension_numbers<[1], [0], [0], [1], [0, 0, 1, 1], [], []>} : vector<64x128xbf16>, vector<128x128xbf16>, vector<64x128xf32> -> vector<64x128xf32>
    %35 = arith.addf %27, %34 : vector<64x128xf32>
    %36 = arith.index_cast %11 : i32 to index
    %c0_21 = arith.constant 0 : index
    %c2 = arith.constant 2 : index
    %c0_22 = arith.constant 0 : index
    %37 = vector.load %arg7[%36, %c0_21, %c2, %c0_22] : memref<2x8x24x128xbf16, #tpu.memory_space<vmem>>, vector<1x4x16x128xbf16>
    %38 = vector.shape_cast %37 : vector<1x4x16x128xbf16> to vector<4x16x128xbf16>
    %39 = vector.shape_cast %38 : vector<4x16x128xbf16> to vector<64x128xbf16>
    %c0_23 = arith.constant 0 : index
    %c1 = arith.constant 1 : index
    %c0_24 = arith.constant 0 : index
    %c0_25 = arith.constant 0 : index
    %40 = vector.load %arg4[%c0_23, %c1, %c0_24, %c0_25] : memref<3x3x128x128xbf16, #tpu.memory_space<vmem>>, vector<1x1x128x128xbf16>
    %41 = vector.shape_cast %40 : vector<1x1x128x128xbf16> to vector<128x128xbf16>
    %cst_26 = arith.constant dense<0.000000e+00> : vector<64x128xf32>
    %42 = tpu.matmul %39, %41, %cst_26 {dimension_numbers = #tpu.dot_dimension_numbers<[1], [0], [0], [1], [0, 0, 1, 1], [], []>} : vector<64x128xbf16>, vector<128x128xbf16>, vector<64x128xf32> -> vector<64x128xf32>
    %43 = arith.addf %35, %42 : vector<64x128xf32>
    %44 = arith.index_cast %11 : i32 to index
    %c0_27 = arith.constant 0 : index
    %c4 = arith.constant 4 : index
    %c0_28 = arith.constant 0 : index
    %45 = vector.load %arg7[%44, %c0_27, %c4, %c0_28] : memref<2x8x24x128xbf16, #tpu.memory_space<vmem>>, vector<1x4x16x128xbf16>
    %46 = vector.shape_cast %45 : vector<1x4x16x128xbf16> to vector<4x16x128xbf16>
    %47 = vector.shape_cast %46 : vector<4x16x128xbf16> to vector<64x128xbf16>
    %c0_29 = arith.constant 0 : index
    %c2_30 = arith.constant 2 : index
    %c0_31 = arith.constant 0 : index
    %c0_32 = arith.constant 0 : index
    %48 = vector.load %arg4[%c0_29, %c2_30, %c0_31, %c0_32] : memref<3x3x128x128xbf16, #tpu.memory_space<vmem>>, vector<1x1x128x128xbf16>
    %49 = vector.shape_cast %48 : vector<1x1x128x128xbf16> to vector<128x128xbf16>
    %cst_33 = arith.constant dense<0.000000e+00> : vector<64x128xf32>
    %50 = tpu.matmul %47, %49, %cst_33 {dimension_numbers = #tpu.dot_dimension_numbers<[1], [0], [0], [1], [0, 0, 1, 1], [], []>} : vector<64x128xbf16>, vector<128x128xbf16>, vector<64x128xf32> -> vector<64x128xf32>
    %51 = arith.addf %43, %50 : vector<64x128xf32>
    %52 = arith.index_cast %11 : i32 to index
    %c2_34 = arith.constant 2 : index
    %c0_35 = arith.constant 0 : index
    %c0_36 = arith.constant 0 : index
    %53 = vector.load %arg7[%52, %c2_34, %c0_35, %c0_36] : memref<2x8x24x128xbf16, #tpu.memory_space<vmem>>, vector<1x4x16x128xbf16>
    %54 = vector.shape_cast %53 : vector<1x4x16x128xbf16> to vector<4x16x128xbf16>
    %55 = vector.shape_cast %54 : vector<4x16x128xbf16> to vector<64x128xbf16>
    %c1_37 = arith.constant 1 : index
    %c0_38 = arith.constant 0 : index
    %c0_39 = arith.constant 0 : index
    %c0_40 = arith.constant 0 : index
    %56 = vector.load %arg4[%c1_37, %c0_38, %c0_39, %c0_40] : memref<3x3x128x128xbf16, #tpu.memory_space<vmem>>, vector<1x1x128x128xbf16>
    %57 = vector.shape_cast %56 : vector<1x1x128x128xbf16> to vector<128x128xbf16>
    %cst_41 = arith.constant dense<0.000000e+00> : vector<64x128xf32>
    %58 = tpu.matmul %55, %57, %cst_41 {dimension_numbers = #tpu.dot_dimension_numbers<[1], [0], [0], [1], [0, 0, 1, 1], [], []>} : vector<64x128xbf16>, vector<128x128xbf16>, vector<64x128xf32> -> vector<64x128xf32>
    %59 = arith.addf %51, %58 : vector<64x128xf32>
    %60 = arith.index_cast %11 : i32 to index
    %c2_42 = arith.constant 2 : index
    %c2_43 = arith.constant 2 : index
    %c0_44 = arith.constant 0 : index
    %61 = vector.load %arg7[%60, %c2_42, %c2_43, %c0_44] : memref<2x8x24x128xbf16, #tpu.memory_space<vmem>>, vector<1x4x16x128xbf16>
    %62 = vector.shape_cast %61 : vector<1x4x16x128xbf16> to vector<4x16x128xbf16>
    %63 = vector.shape_cast %62 : vector<4x16x128xbf16> to vector<64x128xbf16>
    %c1_45 = arith.constant 1 : index
    %c1_46 = arith.constant 1 : index
    %c0_47 = arith.constant 0 : index
    %c0_48 = arith.constant 0 : index
    %64 = vector.load %arg4[%c1_45, %c1_46, %c0_47, %c0_48] : memref<3x3x128x128xbf16, #tpu.memory_space<vmem>>, vector<1x1x128x128xbf16>
    %65 = vector.shape_cast %64 : vector<1x1x128x128xbf16> to vector<128x128xbf16>
    %cst_49 = arith.constant dense<0.000000e+00> : vector<64x128xf32>
    %66 = tpu.matmul %63, %65, %cst_49 {dimension_numbers = #tpu.dot_dimension_numbers<[1], [0], [0], [1], [0, 0, 1, 1], [], []>} : vector<64x128xbf16>, vector<128x128xbf16>, vector<64x128xf32> -> vector<64x128xf32>
    %67 = arith.addf %59, %66 : vector<64x128xf32>
    %68 = arith.index_cast %11 : i32 to index
    %c2_50 = arith.constant 2 : index
    %c4_51 = arith.constant 4 : index
    %c0_52 = arith.constant 0 : index
    %69 = vector.load %arg7[%68, %c2_50, %c4_51, %c0_52] : memref<2x8x24x128xbf16, #tpu.memory_space<vmem>>, vector<1x4x16x128xbf16>
    %70 = vector.shape_cast %69 : vector<1x4x16x128xbf16> to vector<4x16x128xbf16>
    %71 = vector.shape_cast %70 : vector<4x16x128xbf16> to vector<64x128xbf16>
    %c1_53 = arith.constant 1 : index
    %c2_54 = arith.constant 2 : index
    %c0_55 = arith.constant 0 : index
    %c0_56 = arith.constant 0 : index
    %72 = vector.load %arg4[%c1_53, %c2_54, %c0_55, %c0_56] : memref<3x3x128x128xbf16, #tpu.memory_space<vmem>>, vector<1x1x128x128xbf16>
    %73 = vector.shape_cast %72 : vector<1x1x128x128xbf16> to vector<128x128xbf16>
    %cst_57 = arith.constant dense<0.000000e+00> : vector<64x128xf32>
    %74 = tpu.matmul %71, %73, %cst_57 {dimension_numbers = #tpu.dot_dimension_numbers<[1], [0], [0], [1], [0, 0, 1, 1], [], []>} : vector<64x128xbf16>, vector<128x128xbf16>, vector<64x128xf32> -> vector<64x128xf32>
    %75 = arith.addf %67, %74 : vector<64x128xf32>
    %76 = arith.index_cast %11 : i32 to index
    %c4_58 = arith.constant 4 : index
    %c0_59 = arith.constant 0 : index
    %c0_60 = arith.constant 0 : index
    %77 = vector.load %arg7[%76, %c4_58, %c0_59, %c0_60] : memref<2x8x24x128xbf16, #tpu.memory_space<vmem>>, vector<1x4x16x128xbf16>
    %78 = vector.shape_cast %77 : vector<1x4x16x128xbf16> to vector<4x16x128xbf16>
    %79 = vector.shape_cast %78 : vector<4x16x128xbf16> to vector<64x128xbf16>
    %c2_61 = arith.constant 2 : index
    %c0_62 = arith.constant 0 : index
    %c0_63 = arith.constant 0 : index
    %c0_64 = arith.constant 0 : index
    %80 = vector.load %arg4[%c2_61, %c0_62, %c0_63, %c0_64] : memref<3x3x128x128xbf16, #tpu.memory_space<vmem>>, vector<1x1x128x128xbf16>
    %81 = vector.shape_cast %80 : vector<1x1x128x128xbf16> to vector<128x128xbf16>
    %cst_65 = arith.constant dense<0.000000e+00> : vector<64x128xf32>
    %82 = tpu.matmul %79, %81, %cst_65 {dimension_numbers = #tpu.dot_dimension_numbers<[1], [0], [0], [1], [0, 0, 1, 1], [], []>} : vector<64x128xbf16>, vector<128x128xbf16>, vector<64x128xf32> -> vector<64x128xf32>
    %83 = arith.addf %75, %82 : vector<64x128xf32>
    %84 = arith.index_cast %11 : i32 to index
    %c4_66 = arith.constant 4 : index
    %c2_67 = arith.constant 2 : index
    %c0_68 = arith.constant 0 : index
    %85 = vector.load %arg7[%84, %c4_66, %c2_67, %c0_68] : memref<2x8x24x128xbf16, #tpu.memory_space<vmem>>, vector<1x4x16x128xbf16>
    %86 = vector.shape_cast %85 : vector<1x4x16x128xbf16> to vector<4x16x128xbf16>
    %87 = vector.shape_cast %86 : vector<4x16x128xbf16> to vector<64x128xbf16>
    %c2_69 = arith.constant 2 : index
    %c1_70 = arith.constant 1 : index
    %c0_71 = arith.constant 0 : index
    %c0_72 = arith.constant 0 : index
    %88 = vector.load %arg4[%c2_69, %c1_70, %c0_71, %c0_72] : memref<3x3x128x128xbf16, #tpu.memory_space<vmem>>, vector<1x1x128x128xbf16>
    %89 = vector.shape_cast %88 : vector<1x1x128x128xbf16> to vector<128x128xbf16>
    %cst_73 = arith.constant dense<0.000000e+00> : vector<64x128xf32>
    %90 = tpu.matmul %87, %89, %cst_73 {dimension_numbers = #tpu.dot_dimension_numbers<[1], [0], [0], [1], [0, 0, 1, 1], [], []>} : vector<64x128xbf16>, vector<128x128xbf16>, vector<64x128xf32> -> vector<64x128xf32>
    %91 = arith.addf %83, %90 : vector<64x128xf32>
    %92 = arith.index_cast %11 : i32 to index
    %c4_74 = arith.constant 4 : index
    %c4_75 = arith.constant 4 : index
    %c0_76 = arith.constant 0 : index
    %93 = vector.load %arg7[%92, %c4_74, %c4_75, %c0_76] : memref<2x8x24x128xbf16, #tpu.memory_space<vmem>>, vector<1x4x16x128xbf16>
    %94 = vector.shape_cast %93 : vector<1x4x16x128xbf16> to vector<4x16x128xbf16>
    %95 = vector.shape_cast %94 : vector<4x16x128xbf16> to vector<64x128xbf16>
    %c2_77 = arith.constant 2 : index
    %c2_78 = arith.constant 2 : index
    %c0_79 = arith.constant 0 : index
    %c0_80 = arith.constant 0 : index
    %96 = vector.load %arg4[%c2_77, %c2_78, %c0_79, %c0_80] : memref<3x3x128x128xbf16, #tpu.memory_space<vmem>>, vector<1x1x128x128xbf16>
    %97 = vector.shape_cast %96 : vector<1x1x128x128xbf16> to vector<128x128xbf16>
    %cst_81 = arith.constant dense<0.000000e+00> : vector<64x128xf32>
    %98 = tpu.matmul %95, %97, %cst_81 {dimension_numbers = #tpu.dot_dimension_numbers<[1], [0], [0], [1], [0, 0, 1, 1], [], []>} : vector<64x128xbf16>, vector<128x128xbf16>, vector<64x128xf32> -> vector<64x128xf32>
    %99 = arith.addf %91, %98 : vector<64x128xf32>
    %100 = vector.shape_cast %99 : vector<64x128xf32> to vector<4x16x128xf32>
    %c0_82 = arith.constant 0 : index
    %c0_83 = arith.constant 0 : index
    %101 = vector.load %arg5[%c0_82, %c0_83] : memref<1x128xf32, #tpu.memory_space<vmem>>, vector<1x128xf32>
    %102 = vector.shape_cast %101 : vector<1x128xf32> to vector<128xf32>
    %103 = vector.shape_cast %102 : vector<128xf32> to vector<1x1x128xf32>
    %104 = vector.broadcast %103 : vector<1x1x128xf32> to vector<4x16x128xf32>
    %105 = arith.addf %100, %104 : vector<4x16x128xf32>
    %cst_84 = arith.constant 0.000000e+00 : f32
    %106 = vector.broadcast %cst_84 : f32 to vector<4x16x128xf32>
    %107 = arith.maximumf %105, %106 : vector<4x16x128xf32>
    %c0_85 = arith.constant 0 : index
    %c0_86 = arith.constant 0 : index
    %c0_87 = arith.constant 0 : index
    %c0_88 = arith.constant 0 : index
    %108 = vector.load %arg6[%c0_85, %c0_86, %c0_87, %c0_88] : memref<1x4x16x128xf32, #tpu.memory_space<vmem>>, vector<1x4x16x128xf32>
    %109 = vector.shape_cast %108 : vector<1x4x16x128xf32> to vector<4x16x128xf32>
    %110 = vector.shape_cast %107 : vector<4x16x128xf32> to vector<1x4x16x128xf32>
    tpu.vector_store %arg6[%c0_85, %c0_86, %c0_87, %c0_88], %110 {strides = array<i32>} : memref<1x4x16x128xf32, #tpu.memory_space<vmem>>, vector<1x4x16x128xf32>,
    return
  }
  func.func @transform_1(%arg0: i32, %arg1: i32, %arg2: i32) -> (i32, i32, i32, i32) {
    %c0_i32 = arith.constant 0 : i32
    %c0_i32_0 = arith.constant 0 : i32
    %c0_i32_1 = arith.constant 0 : i32
    %c0_i32_2 = arith.constant 0 : i32
    %c0_i32_3 = arith.constant 0 : i32
    return %c0_i32, %c0_i32_0, %c0_i32_1, %c0_i32_2 : i32, i32, i32, i32
  }
  func.func @transform_2(%arg0: i32, %arg1: i32, %arg2: i32) -> (i32, i32) {
    %c0_i32 = arith.constant 0 : i32
    %c0_i32_0 = arith.constant 0 : i32
    %c0_i32_1 = arith.constant 0 : i32
    return %c0_i32, %c0_i32_0 : i32, i32
  }
  func.func @transform_3(%arg0: i32, %arg1: i32, %arg2: i32) -> (i32, i32, i32, i32) {
    %c2_i32 = arith.constant 2 : i32
    %0 = arith.muli %arg1, %c2_i32 : i32
    %1 = arith.addi %0, %arg2 : i32
    %c0_i32 = arith.constant 0 : i32
    %c0_i32_0 = arith.constant 0 : i32
    %c0_i32_1 = arith.constant 0 : i32
    return %arg0, %1, %c0_i32, %c0_i32_0 : i32, i32, i32, i32
  }
}

</mosaic_0001>

<bundles_post_ra>
// kernel: tpu_custom_call.1
= control target key start
LH: loop header
LB: loop body
LE: loop exit
PB: predicated region body
PF: predicated region fallthrough
CT: control target
= control target key end

     0   :  { %s3237_s0 = inlined_call_operand.hbm [shape: bf16[2,20,24,128], index: 0, kind: input, shape index: {}]   ;;  %s3238_s1 = inlined_call_operand.hbm [shape: bf16[3,3,128,128], index: 1, kind: input, shape index: {}]   ;;  %s3239_s2 = inlined_call_operand.vmem [shape: f32[1,128], index: 2, kind: input, shape index: {}]   ;;  %s3240_s3 = inlined_call_operand.hbm [shape: f32[2,16,16,128], index: 3, kind: output, shape index: {}]  }
   0x1   :  { %3249 = sst [smem:[#allocation23_spill]] %s3238_s1 }
   0x2   :  { %8 = vsyncpa [#allocation5], 0 }
   0x3   :  { %9 = vsyncpa [#allocation6], 0 }
   0x4   :  { %11 = vsyncpa [#allocation6 + $0x1], 0  ;;  %s2706_s12 = smov 0   ;;  %s2708_s13 = smov 0  }
   0x5   :  { %s2710_s14 = smov 0   ;;  %s2712_s15 = smov 0  }
   0x6   :  { %s2714_s16 = smov 0   ;;  %s2716_s17 = smov 0  }
   0x7   :  { %s2718_s18 = smov 0   ;;  %s2720_s19 = smov 0  }
   0x8   :  { %s2722_s20 = smov 0   ;;  %s2724_s21 = smov 0  }
   0x9 LB: > { %3250 = sst [smem:[#allocation17_spill]] %s2666_s18  ;;  %s1812_s22 = sadd.s32 4294967295, %s2678_s21   ;;  %s2678_s21 = sphi %s2724_s21, %s17_s21   ;;  %s2674_s20 = sphi %s2722_s20, %s3277_s20   ;;  %s2670_s19 = sphi %s2720_s19, %s3276_s19   ;;  %s2666_s18 = sphi %s2718_s18, %s3275_s18   ;;  %s2662_s17 = sphi %s2716_s17, %s3274_s17   ;;  %s2658_s16 = sphi %s2714_s16, %s3273_s16   ;;  %s2654_s15 = sphi %s2712_s15, %s3272_s15   ;;  %s2650_s14 = sphi %s2710_s14, %s3280_s14   ;;  %s2646_s13 = sphi %s2708_s13, %s3279_s13   ;;  %s2642_s12 = sphi %s2706_s12, %s3278_s12  }
   0xa   : > { %3251 = sst [smem:[#allocation18_spill]] %s2670_s19  ;;  %s1813_s23 = sadd.s32 4294967294, %s2678_s21  }
   0xb   : > { %3252 = sst [smem:[#allocation19_spill]] %s2674_s20  ;;  %s29_s24 = sadd.s32 1, %s2666_s18 }
   0xc   : > { %s32_s25 = sadd.s32 1, %s2670_s19  ;;  %p30_p0 = scmp.ge.s32.totalorder %s29_s24, 2 }
   0xd   : > { %s36_s26 = sadd.s32 1, %s2674_s20  ;;  %s1814_s27 = sshll.u32 %s2670_s19, 1 }
   0xe   : > { %s91_s28 = sadd.s32 1, %s2650_s14  ;;  %s3282_s24 = smov (%p30_p0, %s29_s24), 0 }
   0xf   : > { %3253 = sst [smem:[#allocation20_spill]] %s3282_s24  ;;  %s3284_s25 = smov (!%p30_p0, %s32_s25), %s2670_s19 }
  0x10   : > { %s83_s29 = sadd.s32 %s2666_s18, %s1814_s27  ;;  %p101_p1 = scmp.ne.s32.totalorder %s2650_s14, %s2646_s13 }
  0x11   : > { %p34_p2 = scmp.ge.s32.totalorder %s3284_s25, 2  ;;  %p102_p3 = scmp.eq.s32.totalorder %s1812_s22, 7 }
  0x12   : > { %p107_p4 = scmp.ne.s32.totalorder %s2646_s13, %s2642_s12  ;;  %p108_p5 = scmp.eq.s32.totalorder %s1813_s23, 7 }
  0x13   : > { %s3286_s25 = smov (%p34_p2, %s3284_s25), 0  ;;  %s3288_s26 = smov (!%p34_p2, %s36_s26), %s2674_s20 }
  0x14   : > { %3254 = sst [smem:[#allocation21_spill]] %s3286_s25  ;;  %s1815_s30 = sshll.u32 %s3286_s25, 1 }
  0x15   : > { %p2777_p6 = por %p102_p3, %p101_p1  ;;  %p38_p7 = scmp.ge.s32.totalorder %s3288_s26, 2 }
  0x16   : > { %s85_s5 = sadd.s32 %s1815_s30, %s3282_s24  ;;  %p2782_p8 = por %p108_p5, %p107_p4 }
  0x17   : > { %s87_s6 = ssub.s32 %s83_s29, %s85_s5  ;;  %s3290_s26 = smov (%p38_p7, %s3288_s26), 0 }
  0x18   : > { %s3256_s7 = scalar_select %p2782_p8, 1, 0 }
  0x19   : > { %3257 = sst [smem:[#allocation22_spill]] %s3290_s26  ;;  %p1816_p9 = scmp.ge.s32.totalorder %s2678_s21, 1 }
  0x1a   : > { %p115_p10 = scmp.lt.s32.totalorder %s2678_s21, 9  ;;  %s86_s8 = ssub.s32 %s2674_s20, %s3290_s26 }
  0x1b   : > { %s88_s9 = sor.u32 %s87_s6, %s86_s8  ;;  %p2798_p13 = scmp.eq.s32.totalorder %s1812_s22, 0 }
  0x1c   : > { %p2792_p11 = pnand %p1816_p9, %p115_p10  ;;  %p89_p12 = scmp.eq.s32.totalorder %s88_s9, 0 }
  0x1d   : > { %s3260_s1 = sld [smem:[#allocation23_spill]]  ;;  %s2680_s5 = smov [#allocation4]  }
  0x1e   : > { %p2377_p0 = pneg %p2792_p11  ;;  %s128_s6 = sshll.u32 %s2680_s5, 4  ;;  %s129_s6 = int_to_ptr.vmem [resolvable:$true] %s128_s6 }
  0x1f   : > { %s2808_s30 = scalar_select %p89_p12, %s2650_s14, %s91_s28  }
  0x20   : > { %p2378_p1 = pnand %p2798_p13, %p2377_p0  ;;  %s2681_s8 = smov 64  }
  0x21   : > { %s2682_s22 = smov 4   ;;  %147 = sbr.rel (%p2792_p11) target bundleno = 429 (0x1ad), region = 28 }
  0x23   : > { %s126_s29 = sshll.u32 %s3260_s1, 4  ;;  %s127_s29 = int_to_ptr.hbm [resolvable:$true] %s126_s29 }
  0x24   : > { %2380 = dma.hbm_to_vmem [thread:$0]  (!%p2378_p1), %s127_s29, 9216, %s129_s6, [#allocation5], %s2681_s8, %s2681_s8, %s2682_s22  }
  0x26   : > { %2631 = dma.done.wait (%p2798_p13), [#allocation5], 9216  }
  0x27   : > { %2633 = vsyncadd (%p2798_p13), [#allocation5], 4294958080  ;;  %s3242_s28 = sand.u32 1, %s2646_s13   ;;  %s1821_s9 = sshll.u32 %s2658_s16, 1 }
  0x28   : > { %s2822_s10 = sshll.u32 %s3242_s28, 6  ;;  %s2825_s23 = sadd.s32 %s2654_s15, %s1821_s9 }
  0x29   : > { %p170_p2 = scmp.lt.s32.totalorder %s2654_s15, 0  ;;  %s171_s11 = ssub.s32 0, %s2654_s15 }
  0x2a   : > { %s1822_s27 = smin.u32 %s2654_s15, %s171_s11  ;;  %s1827_s5 = smul.u32 12, %s2825_s23 }
  0x2b   : > { %s173_s29 = sand.u32 1, %s1822_s27   ;;  %s188_s8 = smul.u32 60, %s2662_s17 }
  0x2c   : > { %s174_s6 = ssub.s32 0, %s173_s29  ;;  %p2387_p4 = scmp.eq.s32.totalorder %s2654_s15, 0 }
  0x2d   : > { %s3292_s6 = smov (!%p170_p2, %s174_s6), %s173_s29  ;;  %s189_s22 = sadd.s32 %s1827_s5, %s188_s8 }
  0x2e   : > { %p1824_p3 = scmp.lt.s32.totalorder %s3292_s6, 0  ;;  %s180_s26 = sadd.s32 2, %s3292_s6 }
  0x2f   : > { %s1828_s16 = sshll.u32 %s189_s22, 2 }
  0x30   : > { %s3294_s26 = smov (!%p1824_p3, %s180_s26), %s3292_s6  ;;  %s191_s11 = scalar_lea.hbm %s3237_s0, %s1828_s16 }
  0x31   : > { %s2263_s27 = smul.u32 96, %s3294_s26  ;;  %s203_s25 = sshll.u32 %s191_s11, 4  ;;  %s2840_s25 = int_to_ptr.hbm [resolvable:$true] %s203_s25 }
  0x32   : > { %s1743_s24 = scalar_lea.hbm %s191_s11, 48  ;;  %s2851_s22 = scalar_lea.sflag [#allocation3], %s3294_s26 }
  0x33   : > { %s2842_s29 = scalar_lea.vmem [#allocation2], %s2263_s27  ;;  %s2845_s6 = sshll.u32 %s1743_s24, 4  ;;  %s234_s6 = int_to_ptr.hbm [resolvable:$true] %s2845_s6 }
  0x34   : > { %s205_s5 = sshll.u32 %s2842_s29, 4  ;;  %s2506_s28 = sshra.s32 %s2840_s25, 4  ;;  %s2847_s5 = int_to_ptr.vmem [resolvable:$true] %s205_s5  ;;  %s2507_s28 = int_to_ptr.hbm [resolvable:$true] %s2506_s28 }
  0x35   : > { %s2508_s16 = scalar_lea.hbm %s2507_s28, 96  ;;  %s3248_s27 = scalar_lea.hbm %s3237_s0, 480 }
  0x36   : > { %p2509_p5 = scmp.ne.s32.totalorder %s2507_s28, %s2508_s16  ;;  %p2513_p10 = scmp.lt.s32.totalorder %s2507_s28, %s3237_s0 }
  0x37   : > { %p2514_p11 = scmp.lt.s32.totalorder %s3248_s27, %s2508_s16 }
  0x38   : > { %p2510_p7 = pnand %p2509_p5, %p2387_p4 }
  0x39   : > { %p2515_p12 = por %p2514_p11, %p2513_p10 }
  0x3a   : > { %p2511_p9 = pneg %p2510_p7 }
  0x3c   : > { %p2516_p13 = pnand %p2515_p12, %p2511_p9 }
  0x3e   : > { %2519 = shalt.err (!%p2516_p13)  }
  0x3f   : > { %s2520_s8 = sshra.s32 %s2847_s5, 4  ;;  %s2683_s9 = smov [#allocation2]   ;;  %s2521_s8 = int_to_ptr.vmem [resolvable:$true] %s2520_s8 }
  0x40   : > { %s2522_s18 = scalar_lea.vmem %s2521_s8, 96  ;;  %s2869_s1 = scalar_lea.vmem %s2683_s9, 192 }
  0x41   : > { %p2523_p0 = scmp.ne.s32.totalorder %s2521_s8, %s2522_s18  ;;  %p2527_p3 = scmp.lt.s32.totalorder %s2521_s8, [#allocation2] }
  0x42   : > { %p2528_p5 = scmp.lt.s32.totalorder %s2869_s1, %s2522_s18 }
  0x43   : > { %p2524_p1 = pnand %p2523_p0, %p2387_p4 }
  0x44   : > { %p2529_p7 = por %p2528_p5, %p2527_p3 }
  0x45   : > { %p2525_p2 = pneg %p2524_p1 }
  0x47   : > { %p2530_p8 = pnand %p2529_p7, %p2525_p2 }
  0x49   : > { %2533 = shalt.err (!%p2530_p8)  }
  0x4a   : > { %2372 = dma.hbm_to_vmem [thread:$0]  (%p2387_p4), %s2840_s25, 1536, %s2847_s5, %s2851_s22 }
  0x4b   : > { %s3261_s19 = ssub.s32 1, %s3294_s26  ;;  %s3262_s28 = sadd.s32 1, %s2654_s15 }
  0x4c   : > { %s2264_s20 = smul.u32 96, %s3261_s19  ;;  %p2881_p9 = scmp.lt.s32.totalorder %s3262_s28, 2 }
  0x4d   : > { %s3264_s11 = smov %s3261_s19  ;;  %s2534_s9 = sshra.s32 %s234_s6, 4  ;;  %s2535_s9 = int_to_ptr.hbm [resolvable:$true] %s2534_s9 }
  0x4e   : > { %s224_s18 = scalar_lea.vmem [#allocation2], %s2264_s20  ;;  %s225_s24 = scalar_lea.sflag [#allocation3], %s3264_s11 }
  0x4f   : > { %s235_s8 = sshll.u32 %s224_s18, 4  ;;  %s2536_s27 = scalar_lea.hbm %s2535_s9, 96  ;;  %s236_s8 = int_to_ptr.vmem [resolvable:$true] %s235_s8 }
  0x50   : > { %p2537_p8 = scmp.ne.s32.totalorder %s2535_s9, %s2536_s27  ;;  %p2541_p11 = scmp.lt.s32.totalorder %s2535_s9, %s3237_s0 }
  0x51   : > { %s3265_s28 = scalar_lea.hbm %s3237_s0, 480 }
  0x52   : > { %p2538_p4 = pnand %p2537_p8, %p2881_p9  ;;  %p2542_p12 = scmp.lt.s32.totalorder %s3265_s28, %s2536_s27 }
  0x54   : > { %p2539_p10 = pneg %p2538_p4  ;;  %p2543_p13 = por %p2542_p12, %p2541_p11 }
  0x56   : > { %p2544_p0 = pnand %p2543_p13, %p2539_p10 }
  0x58   : > { %2547 = shalt.err (!%p2544_p0)  }
  0x59   : > { %s2548_s26 = sshra.s32 %s236_s8, 4  ;;  %s2549_s26 = int_to_ptr.vmem [resolvable:$true] %s2548_s26 }
  0x5a   : > { %s2550_s20 = scalar_lea.vmem %s2549_s26, 96  ;;  %p2555_p5 = scmp.lt.s32.totalorder %s2549_s26, [#allocation2] }
  0x5b   : > { %p2551_p1 = scmp.ne.s32.totalorder %s2549_s26, %s2550_s20  ;;  %p2556_p7 = scmp.lt.s32.totalorder %s2869_s1, %s2550_s20 }
  0x5d   : > { %p2552_p2 = pnand %p2551_p1, %p2881_p9  ;;  %p2557_p8 = por %p2556_p7, %p2555_p5 }
  0x5f   : > { %p2553_p3 = pneg %p2552_p2 }
  0x61   : > { %p2558_p4 = pnand %p2557_p8, %p2553_p3 }
  0x63   : > { %2561 = shalt.err (!%p2558_p4)  }
  0x64   : > { %2374 = dma.hbm_to_vmem [thread:$0]  (%p2881_p9), %s234_s6, 1536, %s236_s8, %s225_s24 }
  0x65   : > { %s2903_s27 = scalar_lea.vmem [#allocation7], %s2822_s10 }
  0x66   : > { %2634 = dma.done.wait %s2851_s22, 1536 }
  0x67   : > { %2635 = vsyncadd %s2851_s22, 4294965760  ;;  %v2285_v0 = vld [vmem:[#allocation4 + $0x78] sm:$0xff]  ;;  %v2284_v2 = vld [vmem:[#allocation4 + $0x70] sm:$0xff]  ;;  %vm293_vm0 = vcmask 1042432   ;;  %vm294_vm1 = vcmask 1046532   ;;  %vm547_vm2 = vcmask 1041408  }
  0x68   : > { %v2293_v1 = vld [vmem:[#allocation4 + $0xb8] sm:$0xff]  ;;  %2351 = vmatpush.bf16.msra.mxu1 %v2285_v0  ;;  %405 = vmatpush.bf16.msra.mxu0 %v2285_v0  ;;  %v2292_v3 = vld [vmem:[#allocation4 + $0xb0] sm:$0xff]  ;;  %v2283_v6 = vld [vmem:[#allocation4 + $0x68] sm:$0xff]  ;;  %vm548_vm3 = vcmask 1045508   ;;  %s2350_s6 = sshll.u32 %s2825_s23, 3  ;;  %s2257_s22 = sshll.u32 %s2662_s17, 5 }
  0x69   : > { %659 = vmatpush.bf16.msra.mxu2 %v2293_v1  ;;  %v2305_v4 = vld [vmem:[#allocation4 + $0xf8] sm:$0xff]  ;;  %v2304_v5 = vld [vmem:[#allocation4 + $0xf0] sm:$0xff]  ;;  %v2291_v7 = vld [vmem:[#allocation4 + $0xa8] sm:$0xff]  ;;  %s1677_s1 = sadd.s32 %s2350_s6, %s2257_s22  ;;  %s1680_s8 = sshll.u32 %s2903_s27, 4  ;;  %s1681_s8 = int_to_ptr.vmem [resolvable:$true] %s1680_s8 }
  0x6a   : > { %796 = vmatpush.bf16.msra.mxu3 %v2305_v4  ;;  %v2303_v8 = vld [vmem:[#allocation4 + $0xe8] sm:$0xff]  ;;  %v2282_v9 = vld [vmem:[#allocation4 + $0x60] sm:$0xff]  ;;  %v2908_v11 = vld [vmem:[%s2842_s29 + $0x1c] sm:$0xf]  ;;  %s2258_s16 = sshll.u32 %s1677_s1, 3  ;;  %s3270_s24 = sand.u32 1, %s2646_s13  }
  0x6b   : > { %v2290_v10 = vld [vmem:[#allocation4 + $0xa0] sm:$0xff]  ;;  %v2281_v13 = vld [vmem:[#allocation4 + $0x58] sm:$0xff]  ;;  %v312_v17 = vrot.slane %v2908_v11, 5  ;;  %v274_v21 = vld [vmem:[%s2842_s29 + $0x8] sm:$0x1]  ;;  %s1679_s18 = scalar_lea.hbm %s3240_s3, %s2258_s16  ;;  %s1663_s9 = scalar_lea.sflag [#allocation6], %s3270_s24 }
  0x6c   : > { %2352 = vmatpush.bf16.msra.mxu1 %v2284_v2  ;;  %406 = vmatpush.bf16.msra.mxu0 %v2284_v2  ;;  %v250_v12 = vld [vmem:[%s2842_s29 + $0x4] sm:$0xf]  ;;  %v277_v14 = vld [vmem:[%s2842_s29 + $0x18] sm:$0xe]  ;;  %v278_v16 = vld [vmem:[%s2842_s29 + $0x20] sm:$0x1] }
  0x6d   : > { %660 = vmatpush.bf16.msra.mxu2 %v2292_v3  ;;  %v2302_v15 = vld [vmem:[#allocation4 + $0xe0] sm:$0xff]  ;;  %v298_v18 = vrot.slane %v250_v12, 5  ;;  %v2289_v19 = vld [vmem:[#allocation4 + $0x98] sm:$0xff]  ;;  %v552_v22 = vrot.slane %v250_v12, 6  ;;  %v532_v24 = vld [vmem:[%s2842_s29 + $0x8] sm:$0x3] }
  0x6e   : > { %797 = vmatpush.bf16.msra.mxu3 %v2304_v5  ;;  %v273_v20 = vld [vmem:[%s2842_s29] sm:$0xe]  ;;  %v1837_v25 = vrot.slane %v277_v14, 9  ;;  %v315_v26 = vrot.slane %v278_v16, 5  ;;  %v2301_v27 = vld [vmem:[#allocation4 + $0xd8] sm:$0xff]  ;;  %v2280_v28 = vld [vmem:[#allocation4 + $0x50] sm:$0xff] }
  0x6f   : > { %v531_v23 = vld [vmem:[%s2842_s29] sm:$0xc]  ;;  %vm2920_vm4 = vmor %vm293_vm0, %vm294_vm1  ;;  %v314_v30 = vrot.slane %v312_v17, 4  ;;  %v1835_v31 = vrot.slane %v273_v20, 9  ;;  %v300_v32 = vrot.slane %v298_v18, 4  ;;  %v301_v33 = vrot.slane %v274_v21, 5 }
  0x70   : > { %2353 = vmatpush.bf16.msra.mxu1 %v2283_v6  ;;  %407 = vmatpush.bf16.msra.mxu0 %v2283_v6  ;;  %v2288_v34 = vld [vmem:[#allocation4 + $0x90] sm:$0xff]  ;;  %v1919_v35 = vrot.slane %v531_v23, 10  ;;  %v554_v36 = vrot.slane %v552_v22, 4  ;;  %v555_v37 = vrot.slane %v532_v24, 6  ;;  %vm2925_vm5 = vmor %vm547_vm2, %vm548_vm3  ;;  %v313_v39 = vsel %vm2920_vm4, %v1837_v25, %v312_v17  ;;  %v2279_v41 = vld [vmem:[#allocation4 + $0x48] sm:$0xff]  ;;  %s1682_s11 = sshll.u32 %s1679_s18, 4  ;;  %s1683_s11 = int_to_ptr.hbm [resolvable:$true] %s1682_s11 }
  0x71   : > { %661 = vmatpush.bf16.msra.mxu2 %v2291_v7  ;;  %v2300_v40 = vld [vmem:[#allocation4 + $0xd0] sm:$0xff]  ;;  %v316_v42 = vsel %vm2920_vm4, %v314_v30, %v315_v26  ;;  %v299_v43 = vsel %vm2920_vm4, %v1835_v31, %v298_v18  ;;  %v302_v44 = vsel %vm2920_vm4, %v300_v32, %v301_v33  ;;  %v2287_v45 = vld [vmem:[#allocation4 + $0x88] sm:$0xff]  ;;  %v345_v48 = vunpack.c.l.b16 %v313_v39  ;;  %v2278_v53 = vld [vmem:[#allocation4 + $0x40] sm:$0xff]  ;;  %s2576_s25 = sshra.s32 %s1683_s11, 4  ;;  %s2582_s28 = scalar_lea.hbm %s3240_s3, 512  ;;  %s2577_s25 = int_to_ptr.hbm [resolvable:$true] %s2576_s25 }
  0x72   : > { %798 = vmatpush.bf16.msra.mxu3 %v2303_v8  ;;  %v553_v46 = vsel %vm2925_vm5, %v1919_v35, %v552_v22  ;;  %v556_v47 = vsel %vm2925_vm5, %v554_v36, %v555_v37  ;;  %v346_v49 = vunpack.c.l.b16 %v316_v42  ;;  %v341_v50 = vunpack.c.l.b16 %v299_v43  ;;  %v2299_v52 = vld [vmem:[#allocation4 + $0xc8] sm:$0xff]  ;;  %v2277_v54 = vld [vmem:[#allocation4 + $0x38] sm:$0xff]  ;;  %v2286_v57 = vld [vmem:[#allocation4 + $0x80] sm:$0xff]  ;;  %s2578_s15 = scalar_lea.hbm %s2577_s25, 64  ;;  %p2583_p12 = scmp.lt.s32.totalorder %s2577_s25, %s3240_s3 }
  0x73   : > { %v342_v51 = vunpack.c.l.b16 %v302_v44  ;;  %v595_v55 = vunpack.c.l.b16 %v553_v46  ;;  %v596_v56 = vunpack.c.l.b16 %v556_v47  ;;  %v2942_v58 = vld [vmem:[%s2842_s29 + $0x28] sm:$0xf]  ;;  %v252_v59 = vld [vmem:[%s2842_s29 + $0x10] sm:$0xf]  ;;  %v2313_v60 = vld [vmem:[#allocation4 + $0x138] sm:$0xff]  ;;  %p2579_p9 = scmp.ne.s32.totalorder %s2577_s25, %s2578_s15  ;;  %p2584_p13 = scmp.lt.s32.totalorder %s2582_s28, %s2578_s15 }
  0x74   : > { %2354 = vmatpush.bf16.msra.mxu1 %v2282_v9  ;;  %408 = vmatpush.bf16.msra.mxu0 %v2282_v9  ;;  %v2333_v61 = vld [vmem:[#allocation4 + $0x1b8] sm:$0xff]  ;;  %v351_v62 = vpack.c.b16 %v346_v49, %v345_v48  ;;  %v2276_v63 = vld [vmem:[#allocation4 + $0x30] sm:$0xff]  ;;  %v279_v1 = vld [vmem:[%s2842_s29 + $0x24] sm:$0xe]  ;;  %v319_v5 = vrot.slane %v2942_v58, 5  ;;  %v305_v7 = vrot.slane %v252_v59, 5 }
  0x75   : > { %662 = vmatpush.bf16.msra.mxu2 %v2290_v10  ;;  %v349_v0 = vpack.c.b16 %v342_v51, %v341_v50  ;;  %v603_v2 = vpack.c.b16 %v596_v56, %v595_v55  ;;  %v2312_v3 = vld [vmem:[#allocation4 + $0x130] sm:$0xff]  ;;  %v280_v4 = vld [vmem:[%s2842_s29 + $0x2c] sm:$0x1]  ;;  %v2298_v6 = vld [vmem:[#allocation4 + $0xc0] sm:$0xff]  ;;  %v559_v10 = vrot.slane %v252_v59, 6  ;;  %v1838_v16 = vrot.slane %v279_v1, 9  ;;  %p2580_p10 = pnand %p2579_p9, %p2777_p6  ;;  %p2585_p0 = por %p2584_p13, %p2583_p12 }
  0x76   : > { %799 = vmatpush.bf16.msra.mxu3 %v2302_v15  ;;  %v275_v8 = vld [vmem:[%s2842_s29 + $0xc] sm:$0xe]  ;;  %v276_v9 = vld [vmem:[%s2842_s29 + $0x14] sm:$0x1]  ;;  %v2341_v12 = vld [vmem:[#allocation4 + $0x1f8] sm:$0xff]  ;;  %v322_v17 = vrot.slane %v280_v4, 5 }
  0x77   : > { %v534_v14 = vld [vmem:[%s2842_s29 + $0x14] sm:$0x3]  ;;  %v2294_v18 = vld [vmem:[%s2842_s29 + $0x18] sm:$0xff]  ;;  %v1836_v20 = vrot.slane %v275_v8, 9  ;;  %v307_v21 = vrot.slane %v305_v7, 4  ;;  %v308_v22 = vrot.slane %v276_v9, 5  ;;  %v320_v31 = vsel %vm2920_vm4, %v1838_v16, %v319_v5  ;;  %p2581_p11 = pneg %p2580_p10 }
  0x78   : > { %2355 = vmatpush.bf16.msra.mxu1 %v2281_v13  ;;  %409 = vmatpush.bf16.msra.mxu0 %v2281_v13  ;;  %v533_v13 = vld [vmem:[%s2842_s29 + $0xc] sm:$0xc]  ;;  %v2332_v15 = vld [vmem:[#allocation4 + $0x1b0] sm:$0xff]  ;;  %v561_v25 = vrot.slane %v559_v10, 4  ;;  %v562_v26 = vrot.slane %v534_v14, 6  ;;  %v2274_v35 = vld [vmem:[#allocation4 + $0x20] sm:$0xff]  ;;  %v347_v42 = vunpack.c.l.b16 %v320_v31 }
  0x79   : > { %663 = vmatpush.bf16.msra.mxu2 %v2289_v19  ;;  %v321_v19 = vrot.slane %v319_v5, 4  ;;  %v2275_v23 = vld [vmem:[#allocation4 + $0x28] sm:$0xff]  ;;  %v1920_v24 = vrot.slane %v533_v13, 10  ;;  %v306_v33 = vsel %vm2920_vm4, %v1836_v20, %v305_v7  ;;  %v2273_v48 = vld [vmem:[#allocation4 + $0x18] sm:$0xff]  ;;  %v2272_v55 = vld [vmem:[#allocation4 + $0x10] sm:$0xff]  ;;  %v566_v59 = vrot.slane %v2908_v11, 6  ;;  %p2586_p1 = pnand %p2585_p0, %p2581_p11 }
  0x7a   : > { %800 = vmatpush.bf16.msra.mxu3 %v2301_v27  ;;  %v2340_v27 = vld [vmem:[#allocation4 + $0x1f0] sm:$0xff]  ;;  %v2331_v30 = vld [vmem:[#allocation4 + $0x1a8] sm:$0xff]  ;;  %v563_v37 = vsel %vm2925_vm5, %v561_v25, %v562_v26  ;;  %v343_v44 = vunpack.c.l.b16 %v306_v33  ;;  %v2966_v49 = vld [vmem:[%s2842_s29 + $0x1c] sm:$0xf] }
  0x7b   : > { %v323_v32 = vsel %vm2920_vm4, %v321_v19, %v322_v17  ;;  %v560_v36 = vsel %vm2925_vm5, %v1920_v24, %v559_v10  ;;  %v2339_v39 = vld [vmem:[#allocation4 + $0x1e8] sm:$0xff]  ;;  %v598_v47 = vunpack.c.l.b16 %v563_v37  ;;  %v2309_v50 = vld [vmem:[#allocation4 + $0x118] sm:$0xff]  ;;  %v2338_v4 = vld [vmem:[#allocation4 + $0x1e0] sm:$0xff]  ;;  %v568_v7 = vrot.slane %v566_v59, 4 }
  0x7c   : > { %2356 = vmatpush.bf16.msra.mxu1 %v2280_v28  ;;  %410 = vmatpush.bf16.msra.mxu0 %v2280_v28  ;;  %v2311_v28 = vld [vmem:[#allocation4 + $0x128] sm:$0xff]  ;;  %v348_v43 = vunpack.c.l.b16 %v323_v32  ;;  %v597_v46 = vunpack.c.l.b16 %v560_v36  ;;  %v2012_v56 = vld [vmem:[%s2842_s29 + $0x18] sm:$0xe]  ;;  %v2328_v11 = vld [vmem:[#allocation4 + $0x190] sm:$0xff] }
  0x7d   : > { %664 = vmatpush.bf16.msra.mxu2 %v2288_v34  ;;  %v309_v34 = vsel %vm2920_vm4, %v307_v21, %v308_v22  ;;  %v2024_v1 = vrot.slane %v2012_v56, 9  ;;  %v2271_v5 = vld [vmem:[#allocation4 + $0x8] sm:$0xff]  ;;  %v2337_v10 = vld [vmem:[#allocation4 + $0x1d8] sm:$0xff]  ;;  %v2270_v14 = vld [vmem:[#allocation4] sm:$0xff] }
  0x7e   : > { %801 = vmatpush.bf16.msra.mxu3 %v2300_v40  ;;  %v2310_v40 = vld [vmem:[#allocation4 + $0x120] sm:$0xff]  ;;  %v352_v51 = vpack.c.b16 %v348_v43, %v347_v42  ;;  %v2307_v9 = vld [vmem:[#allocation4 + $0x108] sm:$0xff]  ;;  %v2321_v17 = vld [vmem:[#allocation4 + $0x178] sm:$0xff] }
  0x7f   : > { %v2349_v21 = vld [vmem:[#allocation4 + $0x238] sm:$0xff]  ;;  %v2984_v24 = vld [vmem:[%s2842_s29 + $0x28] sm:$0xf]  ;;  %v2320_v25 = vld [vmem:[#allocation4 + $0x170] sm:$0xff] }
  0x80   : > { %2357 = vmatpush.bf16.msra.mxu1 %v2279_v41  ;;  %411 = vmatpush.bf16.msra.mxu0 %v2279_v41  ;;  %v2330_v41 = vld [vmem:[#allocation4 + $0x1a0] sm:$0xff]  ;;  %v2348_v31 = vld [vmem:[#allocation4 + $0x230] sm:$0xff]  ;;  %v2319_v32 = vld [vmem:[#allocation4 + $0x168] sm:$0xff] }
  0x81   : > { %665 = vmatpush.bf16.msra.mxu2 %v2287_v45  ;;  %v344_v45 = vunpack.c.l.b16 %v309_v34  ;;  %v2266_v26 = vld [vmem:[%s2842_s29] sm:$0xff]  ;;  %v2017_v34 = vld [vmem:[%s2842_s29 + $0x2c] sm:$0x1] }
  0x82   : > { %802 = vmatpush.bf16.msra.mxu3 %v2299_v52  ;;  %v2015_v33 = vld [vmem:[%s2842_s29 + $0x24] sm:$0xe]  ;;  %v538_v37 = vld [vmem:[%s2842_s29 + $0x2c] sm:$0x3]  ;;  %v869_v43 = vrot.slane %v2017_v34, 5 }
  0x83   : > { %v350_v52 = vpack.c.b16 %v344_v45, %v343_v44  ;;  %v537_v36 = vld [vmem:[%s2842_s29 + $0x24] sm:$0xc]  ;;  %v2336_v44 = vld [vmem:[#allocation4 + $0x1d0] sm:$0xff]  ;;  %v2347_v45 = vld [vmem:[#allocation4 + $0x228] sm:$0xff] }
  0x84   : > { %2358 = vmatpush.bf16.msra.mxu1 %v2278_v53  ;;  %412 = vmatpush.bf16.msra.mxu0 %v2278_v53  ;;  %v604_v53 = vpack.c.b16 %v598_v47, %v597_v46  ;;  %v1922_v46 = vrot.slane %v537_v36, 10 }
  0x85   : > { %666 = vmatpush.bf16.msra.mxu2 %v2286_v57  ;;  %v2014_v57 = vld [vmem:[%s2842_s29 + $0x20] sm:$0x1] }
  0x86   : > { %803 = vmatpush.bf16.msra.mxu3 %v2298_v6 }
  0x87   : > { %423 = vmatmul.bf16.vlgmr.msra.gmra.mxu1 %v351_v62  ;;  %413 = vmatmul.bf16.vlgmr.msra.gmra.mxu0 %v349_v0  ;;  %v536_v62 = vld [vmem:[%s2842_s29 + $0x20] sm:$0x3]  ;;  %v2329_v0 = vld [vmem:[#allocation4 + $0x198] sm:$0xff] }
  0x88   : > { %502 = vmatpush.bf16.msrb.mxu1 %v2277_v54  ;;  %966 = vmatpush.bf16.msrb.mxu0 %v2313_v60  ;;  %v859_v54 = vrot.slane %v2966_v49, 5  ;;  %v2308_v60 = vld [vmem:[#allocation4 + $0x110] sm:$0xff]  ;;  %v569_v8 = vrot.slane %v536_v62, 6 }
  0x89   : > { %1265 = vmatpush.bf16.msrb.mxu2 %v2333_v61  ;;  %804 = vmatmul.bf16.vlgmr.msra.gmra.mxu3 %v2294_v18  ;;  %v535_v61 = vld [vmem:[%s2842_s29 + $0x18] sm:$0xc]  ;;  %v2306_v18 = vld [vmem:[#allocation4 + $0x100] sm:$0xff] }
  0x8a   : > { %667 = vmatmul.bf16.vlgmr.msra.gmra.mxu2 %v603_v2  ;;  %1435 = vmatpush.bf16.msrb.mxu3 %v2341_v12  ;;  %v861_v2 = vrot.slane %v859_v54, 4  ;;  %v1921_v6 = vrot.slane %v535_v61, 10  ;;  %v860_v12 = vsel %vm2920_vm4, %v2024_v1, %v859_v54  ;;  %v570_v16 = vsel %vm2925_vm5, %v568_v7, %v569_v8  ;;  %v2346_v54 = vld [vmem:[#allocation4 + $0x220] sm:$0xff]  ;;  %v2267_v1 = vld [vmem:[%s2842_s29 + $0xc] sm:$0xff]  ;;  %v3010_v7 = vld [vmem:[%s2842_s29 + $0x34] sm:$0xf] }
  0x8b   : > { %v902_v19 = vunpack.c.l.b16 %v860_v12  ;;  %v2297_v8 = vld [vmem:[%s2842_s29 + $0x3c] sm:$0xff] }
  0x8c   : > { %503 = vmatpush.bf16.msrb.mxu1 %v2276_v63  ;;  %967 = vmatpush.bf16.msrb.mxu0 %v2312_v3  ;;  %v2295_v63 = vld [vmem:[%s2842_s29 + $0x24] sm:$0xff]  ;;  %v862_v3 = vrot.slane %v2014_v57, 5  ;;  %v2317_v57 = vld [vmem:[#allocation4 + $0x158] sm:$0xff] }
  0x8d   : > { %1266 = vmatpush.bf16.msrb.mxu2 %v2332_v15  ;;  %v567_v15 = vsel %vm2925_vm5, %v1921_v6, %v566_v59  ;;  %v2020_v6 = vld [vmem:[%s2842_s29 + $0x38] sm:$0x1] }
  0x8e   : > { %1436 = vmatpush.bf16.msrb.mxu3 %v2340_v27  ;;  %v863_v13 = vsel %vm2920_vm4, %v861_v2, %v862_v3  ;;  %v599_v22 = vunpack.c.l.b16 %v567_v15  ;;  %v2345_v12 = vld [vmem:[#allocation4 + $0x218] sm:$0xff]  ;;  %v1328_v15 = vrot.slane %v3010_v7, 5 }
  0x8f   : > { %v903_v20 = vunpack.c.l.b16 %v863_v13 }
  0x90   : > { %504 = vmatpush.bf16.msrb.mxu1 %v2275_v23  ;;  %968 = vmatpush.bf16.msrb.mxu0 %v2311_v28  ;;  %v600_v23 = vunpack.c.l.b16 %v570_v16  ;;  %v2161_v16 = vld [vmem:[%s2842_s29 + $0x30] sm:$0xe] }
  0x91   : > { %1267 = vmatpush.bf16.msrb.mxu2 %v2331_v30  ;;  %v910_v27 = vpack.c.b16 %v903_v20, %v902_v19  ;;  %v866_v30 = vrot.slane %v2984_v24, 5  ;;  %v2314_v19 = vld [vmem:[#allocation4 + $0x140] sm:$0xff] }
  0x92   : > { %1437 = vmatpush.bf16.msrb.mxu3 %v2339_v39  ;;  %v605_v28 = vpack.c.b16 %v600_v23, %v599_v22  ;;  %v2327_v39 = vld [vmem:[#allocation4 + $0x188] sm:$0xff]  ;;  %v2173_v22 = vrot.slane %v2161_v16, 9  ;;  %v1330_v23 = vrot.slane %v1328_v15, 4 }
  0x93   : > { %v868_v42 = vrot.slane %v866_v30, 4 }
  0x94   : > { %505 = vmatpush.bf16.msrb.mxu1 %v2274_v35  ;;  %969 = vmatpush.bf16.msrb.mxu0 %v2310_v40  ;;  %v573_v35 = vrot.slane %v2942_v58, 6  ;;  %v2296_v40 = vld [vmem:[%s2842_s29 + $0x30] sm:$0xff]  ;;  %v2318_v58 = vld [vmem:[#allocation4 + $0x160] sm:$0xff] }
  0x95   : > { %1268 = vmatpush.bf16.msrb.mxu2 %v2330_v41  ;;  %v2025_v41 = vrot.slane %v2015_v33, 9  ;;  %v2268_v33 = vld [vmem:[%s2842_s29 + $0x18] sm:$0xff] }
  0x96   : > { %1438 = vmatpush.bf16.msrb.mxu3 %v2338_v4  ;;  %v575_v47 = vrot.slane %v573_v35, 4  ;;  %v2018_v4 = vld [vmem:[%s2842_s29 + $0x30] sm:$0xe] }
  0x97   : > { %428 = vmatmul.bf16.gmra.mxu1 %v352_v51  ;;  %418 = vmatmul.bf16.gmra.mxu0 %v350_v52  ;;  %v2335_v51 = vld [vmem:[#allocation4 + $0x1c8] sm:$0xff]  ;;  %v867_v52 = vsel %vm2920_vm4, %v2025_v41, %v866_v30  ;;  %v1329_v30 = vsel %vm2920_vm4, %v2173_v22, %v1328_v15  ;;  %v2023_v41 = vld [vmem:[%s2842_s29 + $0x44] sm:$0x1] }
  0x98   : > { %506 = vmatpush.bf16.msrb.mxu1 %v2273_v48  ;;  %970 = vmatpush.bf16.msrb.mxu0 %v2309_v50  ;;  %v576_v48 = vrot.slane %v538_v37, 6  ;;  %v2326_v50 = vld [vmem:[#allocation4 + $0x180] sm:$0xff]  ;;  %v904_v59 = vunpack.c.l.b16 %v867_v52  ;;  %v2322_v37 = vld [vmem:[%s2842_s29 + $0x30] sm:$0xff] }
  0x99   : > { %1269 = vmatpush.bf16.msrb.mxu2 %v2329_v0  ;;  %809 = vmatmul.bf16.gmra.mxu3 %v2295_v63  ;;  %v3003_v63 = vld [vmem:[%s2842_s29 + $0x34] sm:$0xf] }
  0x9a   : > { %672 = vmatmul.bf16.gmra.mxu2 %v604_v53  ;;  %1439 = vmatpush.bf16.msrb.mxu3 %v2337_v10  ;;  %v870_v53 = vsel %vm2920_vm4, %v868_v42, %v869_v43  ;;  %v577_v56 = vsel %vm2925_vm5, %v575_v47, %v576_v48  ;;  %v2316_v0 = vld [vmem:[#allocation4 + $0x150] sm:$0xff]  ;;  %v2334_v10 = vld [vmem:[#allocation4 + $0x1c0] sm:$0xff]  ;;  %v883_v47 = vrot.slane %v2023_v41, 5 }
  0x9b   : > { %v602_v62 = vunpack.c.l.b16 %v577_v56  ;;  %v3033_v42 = vld [vmem:[%s2842_s29 + $0x40] sm:$0xf] }
  0x9c   : > { %507 = vmatpush.bf16.msrb.mxu1 %v2272_v55  ;;  %971 = vmatpush.bf16.msrb.mxu0 %v2308_v60  ;;  %v574_v55 = vsel %vm2925_vm5, %v1922_v46, %v573_v35  ;;  %v905_v60 = vunpack.c.l.b16 %v870_v53  ;;  %v1371_v35 = vunpack.c.l.b16 %v1329_v30  ;;  %v1335_v48 = vrot.slane %v3033_v42, 5 }
  0x9d   : > { %1270 = vmatpush.bf16.msrb.mxu2 %v2328_v11  ;;  %v601_v61 = vunpack.c.l.b16 %v574_v55  ;;  %v2026_v11 = vrot.slane %v2018_v4, 9 }
  0x9e   : > { %1440 = vmatpush.bf16.msrb.mxu3 %v2336_v44  ;;  %v911_v2 = vpack.c.b16 %v905_v60, %v904_v59 }
  0x9f   : > { %v606_v3 = vpack.c.b16 %v602_v62, %v601_v61  ;;  %v1021_v61 = vrot.slane %v2966_v49, 6  ;;  %v2269_v62 = vld [vmem:[%s2842_s29 + $0x24] sm:$0xff] }
  0xa0   : > { %508 = vmatpush.bf16.msrb.mxu1 %v2271_v5  ;;  %972 = vmatpush.bf16.msrb.mxu0 %v2307_v9  ;;  %v873_v5 = vrot.slane %v3003_v63, 5  ;;  %v2315_v9 = vld [vmem:[#allocation4 + $0x148] sm:$0xff] }
  0xa1   : > { %1271 = vmatpush.bf16.msrb.mxu2 %v2327_v39  ;;  %v2021_v39 = vld [vmem:[%s2842_s29 + $0x3c] sm:$0xe] }
  0xa2   : > { %1441 = vmatpush.bf16.msrb.mxu3 %v2335_v51  ;;  %v875_v13 = vrot.slane %v873_v5, 4  ;;  %v874_v20 = vsel %vm2920_vm4, %v2026_v11, %v873_v5  ;;  %v2027_v43 = vrot.slane %v2021_v39, 9  ;;  %v2060_v5 = vld [vmem:[%s2842_s29 + $0x18] sm:$0xc]  ;;  %v2210_v11 = vld [vmem:[%s2842_s29 + $0x38] sm:$0x3] }
  0xa3   : > { %v1493_v15 = vrot.slane %v2210_v11, 6  ;;  %v1028_v39 = vrot.slane %v2984_v24, 6 }
  0xa4   : > { %509 = vmatpush.bf16.msrb.mxu1 %v2270_v14  ;;  %973 = vmatpush.bf16.msrb.mxu0 %v2306_v18  ;;  %v876_v14 = vrot.slane %v2020_v6, 5  ;;  %v2344_v18 = vld [vmem:[#allocation4 + $0x210] sm:$0xff]  ;;  %v2061_v6 = vld [vmem:[%s2842_s29 + $0x20] sm:$0x3] }
  0xa5   : > { %1272 = vmatpush.bf16.msrb.mxu2 %v2326_v50  ;;  %v2164_v50 = vld [vmem:[%s2842_s29 + $0x3c] sm:$0xe]  ;;  %v1024_v49 = vrot.slane %v2061_v6, 6 }
  0xa6   : > { %1442 = vmatpush.bf16.msrb.mxu3 %v2334_v10  ;;  %v2174_v53 = vrot.slane %v2164_v50, 9  ;;  %v1023_v10 = vrot.slane %v1021_v61, 4 }
  0xa7   : > { %510 = vmatmul.bf16.vlgmr.msrb.gmra.mxu1 %v2266_v26  ;;  %974 = vmatmul.bf16.vlgmr.msrb.gmra.mxu0 %v910_v27  ;;  %v2343_v26 = vld [vmem:[#allocation4 + $0x208] sm:$0xff]  ;;  %v906_v27 = vunpack.c.l.b16 %v874_v20 }
  0xa8   : > { %1128 = vmatpush.bf16.msra.mxu1 %v2321_v17  ;;  %1597 = vmatpush.bf16.msra.mxu0 %v2349_v21  ;;  %v2163_v17 = vld [vmem:[%s2842_s29 + $0x38] sm:$0x1]  ;;  %v1336_v59 = vsel %vm2920_vm4, %v2174_v53, %v1335_v48  ;;  %v1025_v20 = vsel %vm2925_vm5, %v1023_v10, %v1024_v49 }
  0xa9   : > { %814 = vmatmul.bf16.gmra.mxu3 %v2296_v40  ;;  %2359 = vmatpush.bf16.msra.mxu2 %v2349_v21  ;;  %v877_v21 = vsel %vm2920_vm4, %v875_v13, %v876_v14 }
  0xaa   : > { %677 = vmatmul.bf16.gmra.mxu2 %v605_v28  ;;  %v907_v28 = vunpack.c.l.b16 %v877_v21 }
  0xac   : > { %1129 = vmatpush.bf16.msra.mxu1 %v2320_v25  ;;  %1598 = vmatpush.bf16.msra.mxu0 %v2348_v31  ;;  %v1331_v25 = vrot.slane %v2163_v17, 5  ;;  %v912_v34 = vpack.c.b16 %v907_v28, %v906_v27  ;;  %v2167_v17 = vld [vmem:[%s2842_s29 + $0x48] sm:$0xe]  ;;  %v1065_v28 = vunpack.c.l.b16 %v1025_v20  ;;  %v2215_v20 = vld [vmem:[%s2842_s29 + $0x54] sm:$0xc] }
  0xad   : > { %2360 = vmatpush.bf16.msra.mxu2 %v2348_v31 }
  0xae   : > { %v1332_v31 = vsel %vm2920_vm4, %v1330_v23, %v1331_v25  ;;  %v2175_v23 = vrot.slane %v2167_v17, 9 }
  0xaf   : > { %v1372_v36 = vunpack.c.l.b16 %v1332_v31 }
  0xb0   : > { %1130 = vmatpush.bf16.msra.mxu1 %v2319_v32  ;;  %1599 = vmatpush.bf16.msra.mxu0 %v2347_v45  ;;  %v3025_v32 = vld [vmem:[%s2842_s29 + $0x40] sm:$0xf] }
  0xb1   : > { %2361 = vmatpush.bf16.msra.mxu2 %v2347_v45  ;;  %v880_v40 = vrot.slane %v3025_v32, 5  ;;  %v1379_v44 = vpack.c.b16 %v1372_v36, %v1371_v35  ;;  %v2342_v45 = vld [vmem:[#allocation4 + $0x200] sm:$0xff] }
  0xb3   : > { %v882_v46 = vrot.slane %v880_v40, 4  ;;  %v881_v51 = vsel %vm2920_vm4, %v2027_v43, %v880_v40  ;;  %v2324_v43 = vld [vmem:[%s2842_s29 + $0x48] sm:$0xff] }
  0xb4   : > { %1131 = vmatpush.bf16.msra.mxu1 %v2318_v58  ;;  %1600 = vmatpush.bf16.msra.mxu0 %v2346_v54  ;;  %v2166_v58 = vld [vmem:[%s2842_s29 + $0x44] sm:$0x1]  ;;  %v908_v56 = vunpack.c.l.b16 %v881_v51 }
  0xb5   : > { %2362 = vmatpush.bf16.msra.mxu2 %v2346_v54  ;;  %v884_v52 = vsel %vm2920_vm4, %v882_v46, %v883_v47  ;;  %v1337_v54 = vrot.slane %v1335_v48, 4  ;;  %v1338_v55 = vrot.slane %v2166_v58, 5  ;;  %v1497_v46 = vrot.slane %v3033_v42, 6  ;;  %v2212_v47 = vld [vmem:[%s2842_s29 + $0x44] sm:$0x3] }
  0xb6   : > { %v2171_v48 = vld [vmem:[%s2842_s29 + $0x58] sm:$0xf]  ;;  %v1030_v58 = vrot.slane %v1028_v39, 4 }
  0xb7   : > { %515 = vmatmul.bf16.gmra.mxu1 %v2267_v1  ;;  %979 = vmatmul.bf16.gmra.mxu0 %v911_v2  ;;  %v1339_v60 = vsel %vm2920_vm4, %v1337_v54, %v1338_v55  ;;  %v1490_v1 = vrot.slane %v3010_v7, 6  ;;  %v2323_v2 = vld [vmem:[%s2842_s29 + $0x3c] sm:$0xff]  ;;  %v1499_v24 = vrot.slane %v1497_v46, 4  ;;  %v1500_v54 = vrot.slane %v2212_v47, 6 }
  0xb8   : > { %1132 = vmatpush.bf16.msra.mxu1 %v2317_v57  ;;  %1601 = vmatpush.bf16.msra.mxu0 %v2345_v12  ;;  %v909_v57 = vunpack.c.l.b16 %v884_v52  ;;  %v1374_v4 = vunpack.c.l.b16 %v1339_v60  ;;  %v1349_v55 = vrot.slane %v2171_v48, 5  ;;  %v1511_v17 = vrot.slane %v2171_v48, 6 }
  0xb9   : > { %819 = vmatmul.bf16.gmra.mxu3 %v2297_v8  ;;  %2363 = vmatpush.bf16.msra.mxu2 %v2345_v12  ;;  %v2209_v8 = vld [vmem:[%s2842_s29 + $0x30] sm:$0xc]  ;;  %v2068_v12 = vrot.slane %v2060_v5, 10  ;;  %v1492_v7 = vrot.slane %v1490_v1, 4 }
  0xba   : > { %682 = vmatmul.bf16.gmra.mxu2 %v606_v3  ;;  %v1373_v3 = vunpack.c.l.b16 %v1336_v59  ;;  %v2217_v14 = vrot.slane %v2209_v8, 10 }
  0xbb   : > { %v1494_v22 = vsel %vm2925_vm5, %v1492_v7, %v1493_v15  ;;  %v2064_v7 = vld [vmem:[%s2842_s29 + $0x30] sm:$0xc]  ;;  %v2065_v15 = vld [vmem:[%s2842_s29 + $0x38] sm:$0x3] }
  0xbc   : > { %1133 = vmatpush.bf16.msra.mxu1 %v2316_v0  ;;  %1602 = vmatpush.bf16.msra.mxu0 %v2344_v18  ;;  %v913_v0 = vpack.c.b16 %v909_v57, %v908_v56  ;;  %v1380_v13 = vpack.c.b16 %v1374_v4, %v1373_v3  ;;  %v1491_v21 = vsel %vm2925_vm5, %v2217_v14, %v1490_v1  ;;  %v1534_v31 = vunpack.c.l.b16 %v1494_v22  ;;  %v2170_v56 = vld [vmem:[%s2842_s29 + $0x54] sm:$0xe]  ;;  %v2172_v57 = vld [vmem:[%s2842_s29 + $0x5c] sm:$0x1] }
  0xbd   : > { %2364 = vmatpush.bf16.msra.mxu2 %v2344_v18  ;;  %v2169_v18 = vld [vmem:[%s2842_s29 + $0x50] sm:$0x1]  ;;  %v1533_v30 = vunpack.c.l.b16 %v1491_v21  ;;  %v1352_v1 = vrot.slane %v2172_v57, 5  ;;  %v2325_v14 = vld [vmem:[%s2842_s29 + $0x54] sm:$0xff]  ;;  %v2216_v21 = vld [vmem:[%s2842_s29 + $0x5c] sm:$0x3] }
  0xbe   : > { %v2070_v29 = vrot.slane %v2064_v7, 10 }
  0xbf   : > { %v1541_v36 = vpack.c.b16 %v1534_v31, %v1533_v30  ;;  %v2220_v30 = vrot.slane %v2215_v20, 10  ;;  %v1514_v31 = vrot.slane %v2216_v21, 6 }
  0xc0   : > { %1134 = vmatpush.bf16.msra.mxu1 %v2315_v9  ;;  %1603 = vmatpush.bf16.msra.mxu0 %v2343_v26  ;;  %v3055_v9 = vld [vmem:[%s2842_s29 + $0x4c] sm:$0xf] }
  0xc1   : > { %2365 = vmatpush.bf16.msra.mxu2 %v2343_v26  ;;  %v1342_v16 = vrot.slane %v3055_v9, 5  ;;  %v1345_v26 = vrot.slane %v2169_v18, 5  ;;  %v2213_v18 = vld [vmem:[%s2842_s29 + $0x48] sm:$0xc] }
  0xc3   : > { %v1344_v25 = vrot.slane %v1342_v16, 4 }
  0xc4   : > { %1135 = vmatpush.bf16.msra.mxu1 %v2314_v19  ;;  %1604 = vmatpush.bf16.msra.mxu0 %v2342_v45  ;;  %v1022_v19 = vsel %vm2925_vm5, %v2068_v12, %v1021_v61  ;;  %v1501_v61 = vsel %vm2925_vm5, %v1499_v24, %v1500_v54  ;;  %v1035_v12 = vrot.slane %v3003_v63, 6  ;;  %v2219_v63 = vrot.slane %v2213_v18, 10 }
  0xc5   : > { %2366 = vmatpush.bf16.msra.mxu2 %v2342_v45  ;;  %v1064_v27 = vunpack.c.l.b16 %v1022_v19  ;;  %v2211_v45 = vld [vmem:[%s2842_s29 + $0x3c] sm:$0xc]  ;;  %v1536_v5 = vunpack.c.l.b16 %v1501_v61  ;;  %v2214_v19 = vld [vmem:[%s2842_s29 + $0x50] sm:$0x3] }
  0xc6   : > { %v2218_v53 = vrot.slane %v2211_v45, 10  ;;  %v1037_v22 = vrot.slane %v1035_v12, 4 }
  0xc7   : > { %520 = vmatmul.bf16.gmra.mxu1 %v2268_v33  ;;  %984 = vmatmul.bf16.gmra.mxu0 %v912_v34  ;;  %v1343_v33 = vsel %vm2920_vm4, %v2175_v23, %v1342_v16  ;;  %v1346_v34 = vsel %vm2920_vm4, %v1344_v25, %v1345_v26  ;;  %v1072_v35 = vpack.c.b16 %v1065_v28, %v1064_v27  ;;  %v1504_v16 = vrot.slane %v3055_v9, 6 }
  0xc8   : > { %v1375_v40 = vunpack.c.l.b16 %v1343_v33  ;;  %v1376_v41 = vunpack.c.l.b16 %v1346_v34  ;;  %v1498_v60 = vsel %vm2925_vm5, %v2218_v53, %v1497_v46  ;;  %v1038_v25 = vrot.slane %v2065_v15, 6  ;;  %v2067_v53 = vld [vmem:[%s2842_s29 + $0x44] sm:$0x3] }
  0xc9   : > { %1443 = vmatmul.bf16.vlgmr.msrb.gmra.mxu3 %v1379_v44  ;;  %v2063_v44 = vld [vmem:[%s2842_s29 + $0x2c] sm:$0x3]  ;;  %v1535_v4 = vunpack.c.l.b16 %v1498_v60  ;;  %v1506_v26 = vrot.slane %v1504_v16, 4  ;;  %v1507_v27 = vrot.slane %v2214_v19, 6  ;;  %v1513_v28 = vrot.slane %v1511_v17, 4 }
  0xca   : > { %1273 = vmatmul.bf16.vlgmr.msrb.gmra.mxu2 %v2322_v37  ;;  %v2062_v37 = vld [vmem:[%s2842_s29 + $0x24] sm:$0xc]  ;;  %v1031_v51 = vrot.slane %v2063_v44, 6  ;;  %v1381_v52 = vpack.c.b16 %v1376_v41, %v1375_v40  ;;  %v1036_v9 = vsel %vm2925_vm5, %v2070_v29, %v1035_v12  ;;  %v1039_v33 = vsel %vm2925_vm5, %v1037_v22, %v1038_v25 }
  0xcb   : > { %v2069_v50 = vrot.slane %v2062_v37, 10  ;;  %v1542_v10 = vpack.c.b16 %v1536_v5, %v1535_v4  ;;  %v1505_v34 = vsel %vm2925_vm5, %v2219_v63, %v1504_v16  ;;  %v1515_v37 = vsel %vm2925_vm5, %v1513_v28, %v1514_v31 }
  0xcc   : > { %v1032_v42 = vsel %vm2925_vm5, %v1030_v58, %v1031_v51  ;;  %v1069_v40 = vunpack.c.l.b16 %v1039_v33  ;;  %v1537_v41 = vunpack.c.l.b16 %v1505_v34  ;;  %v1540_v45 = vunpack.c.l.b16 %v1515_v37 }
  0xcd   : > { %v1029_v59 = vsel %vm2925_vm5, %v2069_v50, %v1028_v39  ;;  %v1067_v3 = vunpack.c.l.b16 %v1032_v42  ;;  %v1068_v39 = vunpack.c.l.b16 %v1036_v9  ;;  %v1042_v51 = vrot.slane %v3025_v32, 6 }
  0xcf   : > { %v1074_v46 = vpack.c.b16 %v1069_v40, %v1068_v39  ;;  %v1044_v54 = vrot.slane %v1042_v51, 4 }
  0xd7   : > { %525 = vmatmul.bf16.gmra.mxu1 %v2269_v62  ;;  %989 = vmatmul.bf16.gmra.mxu0 %v913_v0  ;;  %v2176_v62 = vrot.slane %v2170_v56, 9  ;;  %v1351_v0 = vrot.slane %v1349_v55, 4 }
  0xd9   : > { %1448 = vmatmul.bf16.gmra.mxu3 %v1380_v13  ;;  %v1350_v6 = vsel %vm2920_vm4, %v2176_v62, %v1349_v55  ;;  %v1353_v8 = vsel %vm2920_vm4, %v1351_v0, %v1352_v1  ;;  %v1045_v55 = vrot.slane %v2067_v53, 6 }
  0xda   : > { %1278 = vmatmul.bf16.gmra.mxu2 %v2323_v2  ;;  %v1066_v2 = vunpack.c.l.b16 %v1029_v59  ;;  %v1377_v49 = vunpack.c.l.b16 %v1350_v6  ;;  %v1378_v13 = vunpack.c.l.b16 %v1353_v8 }
  0xdb   : > { %v1046_v60 = vsel %vm2925_vm5, %v1044_v54, %v1045_v55 }
  0xdc   : > { %v1073_v11 = vpack.c.b16 %v1067_v3, %v1066_v2  ;;  %v1382_v23 = vpack.c.b16 %v1378_v13, %v1377_v49  ;;  %v1071_v32 = vunpack.c.l.b16 %v1046_v60 }
  0xe7   : > { %1136 = vmatmul.bf16.vlgmr.msra.gmra.mxu1 %v1072_v35  ;;  %1605 = vmatmul.bf16.vlgmr.msra.gmra.mxu0 %v1541_v36  ;;  %v1508_v35 = vsel %vm2925_vm5, %v1506_v26, %v1507_v27  ;;  %v1512_v36 = vsel %vm2925_vm5, %v2220_v30, %v1511_v17 }
  0xe8   : > { %v1539_v44 = vunpack.c.l.b16 %v1512_v36 }
  0xe9   : > { %1453 = vmatmul.bf16.gmra.mxu3 %v1381_v52  ;;  %v2066_v52 = vld [vmem:[%s2842_s29 + $0x3c] sm:$0xc] }
  0xea   : > { %1283 = vmatmul.bf16.gmra.mxu2 %v2324_v43  ;;  %v1538_v43 = vunpack.c.l.b16 %v1508_v35  ;;  %v1544_v58 = vpack.c.b16 %v1540_v45, %v1539_v44  ;;  %v2071_v24 = vrot.slane %v2066_v52, 10 }
  0xec   : > { %v1543_v47 = vpack.c.b16 %v1538_v43, %v1537_v41  ;;  %v1043_v42 = vsel %vm2925_vm5, %v2071_v24, %v1042_v51 }
  0xed   : > { %v1070_v62 = vunpack.c.l.b16 %v1043_v42 }
  0xef   : > { %v1075_v0 = vpack.c.b16 %v1071_v32, %v1070_v62 }
  0xf7   : > { %1141 = vmatmul.bf16.gmra.mxu1 %v1073_v11  ;;  %1610 = vmatmul.bf16.gmra.mxu0 %v1542_v10 }
  0xf9   : > { %1458 = vmatmul.bf16.gmra.mxu3 %v1382_v23 }
  0xfa   : > { %1288 = vmatmul.bf16.gmra.mxu2 %v2325_v14 }
 0x104   : > { %v424_v48 = vpop.f32.mrf.mxu1  ;;  %v414_v50 = vpop.f32.mrf.mxu0 }
 0x107   : > { %1146 = vmatmul.bf16.gmra.mxu1 %v1074_v46  ;;  %1615 = vmatmul.bf16.gmra.mxu0 %v1543_v47 }
 0x10a   : > { %1620 = vmatmul.bf16.vlgmr.msra.gmra.mxu2 %v1544_v58 }
 0x10c   : > { %v426_v57 = vpop.f32.mrf.mxu1  ;;  %v416_v59 = vpop.f32.mrf.mxu0 }
 0x10d   : > { %v668_v56 = vpop.f32.mrf.mxu2  ;;  %v805_v61 = vpop.f32.mrf.mxu3 }
 0x114   : > { %v429_v2 = vpop.f32.mrf.mxu1  ;;  %v419_v3 = vpop.f32.mrf.mxu0 }
 0x115   : > { %v670_v1 = vpop.f32.mrf.mxu2  ;;  %v807_v4 = vpop.f32.mrf.mxu3 }
 0x117   : > { %1151 = vmatmul.bf16.gmra.mxu1 %v1075_v0 }
 0x11c   : > { %v431_v6 = vpop.f32.mrf.mxu1  ;;  %v421_v8 = vpop.f32.mrf.mxu0 }
 0x11d   : > { %v673_v5 = vpop.f32.mrf.mxu2  ;;  %v3122_v11 = vpop.f32.mrf.mxu3 }
 0x124   : > { %v511_v12 = vpop.f32.mrf.mxu1  ;;  %v975_v49 = vpop.f32.mrf.mxu0 }
 0x125   : > { %v675_v10 = vpop.f32.mrf.mxu2  ;;  %v512_v13 = vadd.f32 %v511_v12, %v414_v50  ;;  %v3124_v14 = vpop.f32.mrf.mxu3 }
 0x127   : > { %v688_v38 = vadd.f32 %v668_v56, %v512_v13 }
 0x129   : > { %v825_v54 = vadd.f32 %v805_v61, %v688_v38 }
 0x12b   : > { %v995_v56 = vadd.f32 %v975_v49, %v825_v54 }
 0x12c   : > { %v513_v15 = vpop.f32.mrf.mxu1  ;;  %v977_v16 = vpop.f32.mrf.mxu0 }
 0x12d   : > { %v678_v7 = vpop.f32.mrf.mxu2  ;;  %v514_v17 = vadd.f32 %v513_v15, %v416_v59  ;;  %v3126_v19 = vpop.f32.mrf.mxu3 }
 0x12f   : > { %v689_v18 = vadd.f32 %v670_v1, %v514_v17 }
 0x131   : > { %v826_v32 = vadd.f32 %v807_v4, %v689_v18 }
 0x134   : > { %v516_v21 = vpop.f32.mrf.mxu1  ;;  %v980_v29 = vpop.f32.mrf.mxu0 }
 0x135   : > { %v680_v20 = vpop.f32.mrf.mxu2  ;;  %v517_v22 = vadd.f32 %v516_v21, %v419_v3  ;;  %v3128_v63 = vpop.f32.mrf.mxu3  ;;  %v996_v3 = vadd.f32 %v977_v16, %v826_v32 }
 0x137   : > { %v690_v23 = vadd.f32 %v673_v5, %v517_v22 }
 0x139   : > { %v827_v49 = vadd.f32 %v3122_v11, %v690_v23 }
 0x13b   : > { %v997_v15 = vadd.f32 %v980_v29, %v827_v49 }
 0x13c   : > { %v518_v26 = vpop.f32.mrf.mxu1  ;;  %v3130_v27 = vpop.f32.mrf.mxu0 }
 0x13d   : > { %v683_v25 = vpop.f32.mrf.mxu2  ;;  %v519_v28 = vadd.f32 %v518_v26, %v421_v8  ;;  %v3134_v35 = vpop.f32.mrf.mxu3 }
 0x13f   : > { %v691_v30 = vadd.f32 %v675_v10, %v519_v28 }
 0x141   : > { %v828_v22 = vadd.f32 %v3124_v14, %v691_v30 }
 0x144   : > { %v521_v9 = vpop.f32.mrf.mxu1  ;;  %v3132_v33 = vpop.f32.mrf.mxu0 }
 0x145   : > { %v685_v31 = vpop.f32.mrf.mxu2  ;;  %v522_v34 = vadd.f32 %v521_v9, %v424_v48  ;;  %v3140_v44 = vpop.f32.mrf.mxu3 }
 0x147   : > { %v692_v36 = vadd.f32 %v678_v7, %v522_v34 }
 0x14c   : > { %v523_v39 = vpop.f32.mrf.mxu1  ;;  %v3136_v40 = vpop.f32.mrf.mxu0 }
 0x14d   : > { %v1274_v37 = vpop.f32.mrf.mxu2  ;;  %v524_v41 = vadd.f32 %v523_v39, %v426_v57  ;;  %v1444_v48 = vpop.f32.mrf.mxu3 }
 0x14f   : > { %v3138_v43 = vadd.f32 %v680_v20, %v524_v41  ;;  %v829_v41 = vadd.f32 %v3126_v19, %v692_v36 }
 0x154   : > { %v526_v46 = vpop.f32.mrf.mxu1  ;;  %v3142_v47 = vpop.f32.mrf.mxu0 }
 0x155   : > { %v1276_v45 = vpop.f32.mrf.mxu2  ;;  %v527_v50 = vadd.f32 %v526_v46, %v429_v2  ;;  %v1446_v57 = vpop.f32.mrf.mxu3  ;;  %v3153_v2 = vld [vmem:[%s3239_s2] ss:$0 sm:$0xff] }
 0x157   : > { %v3144_v58 = vadd.f32 %v683_v25, %v527_v50  ;;  %v999_v50 = vadd.f32 %v3132_v33, %v829_v41 }
 0x15c   : > { %v528_v52 = vpop.f32.mrf.mxu1  ;;  %v3146_v53 = vpop.f32.mrf.mxu0 }
 0x15d   : > { %v1279_v51 = vpop.f32.mrf.mxu2  ;;  %v529_v24 = vadd.f32 %v528_v52, %v431_v6  ;;  %v1449_v12 = vpop.f32.mrf.mxu3 }
 0x15f   : > { %v3148_v55 = vadd.f32 %v685_v31, %v529_v24  ;;  %v998_v31 = vadd.f32 %v3130_v27, %v828_v22 }
 0x161   : > { %v832_v49 = vadd.f32 %v3140_v44, %v3148_v55 }
 0x164   : > { %v1137_v59 = vpop.f32.mrf.mxu1  ;;  %v1606_v42 = vpop.f32.mrf.mxu0 }
 0x165   : > { %v1157_v60 = vadd.f32 %v1137_v59, %v995_v56  ;;  %v1281_v62 = vpop.f32.mrf.mxu2  ;;  %v1451_v28 = vpop.f32.mrf.mxu3  ;;  %v830_v56 = vadd.f32 %v3128_v63, %v3138_v43 }
 0x167   : > { %v1294_v0 = vadd.f32 %v1274_v37, %v1157_v60  ;;  %v1000_v59 = vadd.f32 %v3136_v40, %v830_v56 }
 0x169   : > { %v1464_v1 = vadd.f32 %v1444_v48, %v1294_v0 }
 0x16b   : > { %v1626_v5 = vadd.f32 %v1606_v42, %v1464_v1  ;;  %v831_v1 = vadd.f32 %v3134_v35, %v3144_v58 }
 0x16c   : > { %v1139_v61 = vpop.f32.mrf.mxu1  ;;  %v1608_v6 = vpop.f32.mrf.mxu0 }
 0x16d   : > { %v1638_v8 = vadd.f32 %v3153_v2, %v1626_v5  ;;  %v1158_v10 = vadd.f32 %v1139_v61, %v996_v3  ;;  %v1284_v38 = vpop.f32.mrf.mxu2  ;;  %v1454_v46 = vpop.f32.mrf.mxu3  ;;  %v1001_v40 = vadd.f32 %v3142_v47, %v831_v1  ;;  %v1002_v47 = vadd.f32 %v3146_v53, %v832_v49 }
 0x16f   : > { %v1646_v13 = vmax.f32 %v1638_v8, 0.0  ;;  %v1295_v4 = vadd.f32 %v1276_v45, %v1158_v10 }
 0x171   : > { %1654 = vst [vmem:[%s2903_s27] sm:$0xff] %v1646_v13  ;;  %v1465_v7 = vadd.f32 %v1446_v57, %v1295_v4 }
 0x173   : > { %v1627_v17 = vadd.f32 %v1608_v6, %v1465_v7 }
 0x174   : > { %v1142_v18 = vpop.f32.mrf.mxu1  ;;  %v1611_v20 = vpop.f32.mrf.mxu0 }
 0x175   : > { %v1639_v16 = vadd.f32 %v3153_v2, %v1627_v17  ;;  %v1159_v21 = vadd.f32 %v1142_v18, %v997_v15  ;;  %v1286_v23 = vpop.f32.mrf.mxu2  ;;  %v1456_v60 = vpop.f32.mrf.mxu3 }
 0x177   : > { %v1647_v25 = vmax.f32 %v1639_v16, 0.0  ;;  %v1296_v26 = vadd.f32 %v1279_v51, %v1159_v21 }
 0x179   : > { %1655 = vst [vmem:[%s2903_s27 + $0x8] sm:$0xff] %v1647_v25  ;;  %v1466_v11 = vadd.f32 %v1449_v12, %v1296_v26 }
 0x17b   : > { %v1628_v9 = vadd.f32 %v1611_v20, %v1466_v11 }
 0x17c   : > { %v1144_v34 = vpop.f32.mrf.mxu1  ;;  %v1613_v29 = vpop.f32.mrf.mxu0 }
 0x17d   : > { %v1640_v37 = vadd.f32 %v3153_v2, %v1628_v9  ;;  %v1160_v39 = vadd.f32 %v1144_v34, %v998_v31  ;;  %v1289_v51 = vpop.f32.mrf.mxu2  ;;  %v1459_v12 = vpop.f32.mrf.mxu3 }
 0x17f   : > { %v1648_v45 = vmax.f32 %v1640_v37, 0.0  ;;  %v1297_v14 = vadd.f32 %v1281_v62, %v1160_v39 }
 0x181   : > { %1656 = vst [vmem:[%s2903_s27 + $0x10] sm:$0xff] %v1648_v45  ;;  %v1467_v30 = vadd.f32 %v1451_v28, %v1297_v14 }
 0x183   : > { %v1629_v48 = vadd.f32 %v1613_v29, %v1467_v30 }
 0x184   : > { %v1147_v52 = vpop.f32.mrf.mxu1  ;;  %v1616_v54 = vpop.f32.mrf.mxu0 }
 0x185   : > { %v1641_v27 = vadd.f32 %v3153_v2, %v1629_v48  ;;  %v1161_v24 = vadd.f32 %v1147_v52, %v999_v50  ;;  %v1291_v0 = vpop.f32.mrf.mxu2  ;;  %v1461_v18 = vpop.f32.mrf.mxu3 }
 0x187   : > { %v1649_v19 = vmax.f32 %v1641_v27, 0.0  ;;  %v1298_v36 = vadd.f32 %v1284_v38, %v1161_v24 }
 0x189   : > { %1657 = vst [vmem:[%s2903_s27 + $0x18] sm:$0xff] %v1649_v19  ;;  %v1468_v57 = vadd.f32 %v1454_v46, %v1298_v36 }
 0x18b   : > { %v1630_v42 = vadd.f32 %v1616_v54, %v1468_v57 }
 0x18c   : > { %v1149_v33 = vpop.f32.mrf.mxu1  ;;  %v1618_v3 = vpop.f32.mrf.mxu0 }
 0x18d   : > { %v1642_v62 = vadd.f32 %v3153_v2, %v1630_v42  ;;  %v1162_v32 = vadd.f32 %v1149_v33, %v1000_v59  ;;  %v1621_v58 = vpop.f32.mrf.mxu2 }
 0x18f   : > { %v1650_v63 = vmax.f32 %v1642_v62, 0.0  ;;  %v1299_v43 = vadd.f32 %v1286_v23, %v1162_v32 }
 0x191   : > { %1658 = vst [vmem:[%s2903_s27 + $0x20] sm:$0xff] %v1650_v63  ;;  %v1469_v5 = vadd.f32 %v1456_v60, %v1299_v43 }
 0x193   : > { %v1631_v61 = vadd.f32 %v1618_v3, %v1469_v5 }
 0x194   : > { %v1152_v6 = vpop.f32.mrf.mxu1 }
 0x195   : > { %v1643_v8 = vadd.f32 %v3153_v2, %v1631_v61  ;;  %v1163_v10 = vadd.f32 %v1152_v6, %v1001_v40  ;;  %v1623_v16 = vpop.f32.mrf.mxu2 }
 0x197   : > { %v1651_v13 = vmax.f32 %v1643_v8, 0.0  ;;  %v1300_v35 = vadd.f32 %v1289_v51, %v1163_v10 }
 0x199   : > { %1659 = vst [vmem:[%s2903_s27 + $0x28] sm:$0xff] %v1651_v13  ;;  %v1470_v4 = vadd.f32 %v1459_v12, %v1300_v35 }
 0x19b   : > { %v1632_v38 = vadd.f32 %v1621_v58, %v1470_v4 }
 0x19c   : > { %v1154_v7 = vpop.f32.mrf.mxu1 }
 0x19d   : > { %v1644_v15 = vadd.f32 %v3153_v2, %v1632_v38  ;;  %v1164_v17 = vadd.f32 %v1154_v7, %v1002_v47 }
 0x19f   : > { %v1652_v44 = vmax.f32 %v1644_v15, 0.0  ;;  %v1301_v55 = vadd.f32 %v1291_v0, %v1164_v17 }
 0x1a1   : > { %1660 = vst [vmem:[%s2903_s27 + $0x30] sm:$0xff] %v1652_v44  ;;  %v1471_v20 = vadd.f32 %v1461_v18, %v1301_v55 }
 0x1a3   : > { %v1633_v53 = vadd.f32 %v1623_v16, %v1471_v20 }
 0x1a5   : > { %v1645_v21 = vadd.f32 %v3153_v2, %v1633_v53 }
 0x1a7   : > { %v1653_v22 = vmax.f32 %v1645_v21, 0.0 }
 0x1a9   : > { %1661 = vst [vmem:[%s2903_s27 + $0x38] sm:$0xff] %v1653_v22 }
 0x1aa   : > { %2589 = shalt.err (!%p2586_p1)
}
 0x1ab   : > { %s2684_s27 = smov 128   ;;  %s2685_s10 = smov 8  }
 0x1ac   : > { %2375 = dma.vmem_to_hbm [thread:$0]  (%p2777_p6), %s1681_s8, 1024, %s1683_s11, %s1663_s9, %s2684_s27, %s2684_s27, %s2685_s10  }
 0x1ad PF: > { %p2389_p2 = scmp.ge.s32.totalorder %s2678_s21, 2  ;;  %s1697_s29 = sand.u32 1, %s2642_s12  }
 0x1ae   : > { %p3271_p3 = scmp.ne.s32.totalorder %s3256_s7, 0  ;;  %s1698_s6 = scalar_lea.sflag [#allocation6], %s1697_s29 }
 0x1b0   : > { %p2382_p5 = pnand %p2389_p2, %p3271_p3 }
 0x1b2   : > { %p2383_p7 = pneg %p2382_p5 }
 0x1b4   : > { %2637 = dma.done.wait (%p2383_p7), %s1698_s6, 1024  }
 0x1b5   : > { %2639 = vsyncadd (%p2383_p7), %s1698_s6, 4294966272  ;;  %s17_s21 = sadd.s32 1, %s2678_s21   ;;  %s3272_s15 = sld [smem:[#allocation17_spill]] }
 0x1b6   : > { %p14_p8 = scmp.ge.s32.totalorder %s17_s21, 10   ;;  %s3273_s16 = sld [smem:[#allocation18_spill]] }
 0x1b7   : > { %s3274_s17 = sld [smem:[#allocation19_spill]]  ;;  %s3278_s12 = smov %s2646_s13 }
 0x1b8   : > { %s3275_s18 = sld [smem:[#allocation20_spill]]  ;;  %s3279_s13 = smov %s2650_s14 }
 0x1b9   : > { %s3276_s19 = sld [smem:[#allocation21_spill]]  ;;  %s3280_s14 = smov %s2808_s30 }
 0x1ba   : > { %s3277_s20 = sld [smem:[#allocation22_spill]]  ;;  %16 = sbr.rel (!%p14_p8) target bundleno = 9 (0x9), region = 100 }
 0x1bf   :  { %1704 = vsyncpa [#allocation5], 1 }
 0x1c0   :  { %1706 = vsyncpa [#allocation5 + $0x1], 1 }
 0x1c1   :  { %1707 = vsyncpa [#allocation6], 1 }
 0x1c2   :  { %1709 = vsyncpa [#allocation6 + $0x1], 1 }
 0x1c3   :  { %1710 = vsyncmov [#allocation3] }
 0x1c6   :  { %s1711_s4 = vpop.sfrf %1710 }
 0x1c7   :  { %p2261_p6 = scmp.ne.s32.totalorder %s1711_s4, 0 }
 0x1c9   :  { %1715 = shalt.err (%p2261_p6)  }
 0x1ca   :  { %1717 = vsyncmov [#allocation3 + $0x1] }
 0x1cd   :  { %s1718_s7 = vpop.sfrf %1717 }
 0x1ce   :  { %p2262_p4 = scmp.ne.s32.totalorder %s1718_s7, 0 }
 0x1d0   :  { %1722 = shalt.err (%p2262_p4)  }

// kernel: tpu_custom_call.1
= control target key start
LH: loop header
LB: loop body
LE: loop exit
PB: predicated region body
PF: predicated region fallthrough
CT: control target
= control target key end

     0   :  { %s3237_s0 = inlined_call_operand.hbm [shape: bf16[2,20,24,128], index: 0, kind: input, shape index: {}]   ;;  %s3238_s1 = inlined_call_operand.hbm [shape: bf16[3,3,128,128], index: 1, kind: input, shape index: {}]   ;;  %s3239_s2 = inlined_call_operand.vmem [shape: f32[1,128], index: 2, kind: input, shape index: {}]   ;;  %s3240_s3 = inlined_call_operand.hbm [shape: f32[2,16,16,128], index: 3, kind: output, shape index: {}]  }
   0x1   :  { %3249 = sst [smem:[#allocation23_spill]] %s3238_s1 }
   0x2   :  { %8 = vsyncpa [#allocation5], 0 }
   0x3   :  { %9 = vsyncpa [#allocation6], 0 }
   0x4   :  { %11 = vsyncpa [#allocation6 + $0x1], 0  ;;  %s2706_s12 = smov 0   ;;  %s2708_s13 = smov 0  }
   0x5   :  { %s2710_s14 = smov 0   ;;  %s2712_s15 = smov 0  }
   0x6   :  { %s2714_s16 = smov 0   ;;  %s2716_s17 = smov 0  }
   0x7   :  { %s2718_s18 = smov 0   ;;  %s2720_s19 = smov 0  }
   0x8   :  { %s2722_s20 = smov 0   ;;  %s2724_s21 = smov 0  }
   0x9 LB: > { %3250 = sst [smem:[#allocation17_spill]] %s2666_s18  ;;  %s1812_s22 = sadd.s32 4294967295, %s2678_s21   ;;  %s2678_s21 = sphi %s2724_s21, %s17_s21   ;;  %s2674_s20 = sphi %s2722_s20, %s3277_s20   ;;  %s2670_s19 = sphi %s2720_s19, %s3276_s19   ;;  %s2666_s18 = sphi %s2718_s18, %s3275_s18   ;;  %s2662_s17 = sphi %s2716_s17, %s3274_s17   ;;  %s2658_s16 = sphi %s2714_s16, %s3273_s16   ;;  %s2654_s15 = sphi %s2712_s15, %s3272_s15   ;;  %s2650_s14 = sphi %s2710_s14, %s3280_s14   ;;  %s2646_s13 = sphi %s2708_s13, %s3279_s13   ;;  %s2642_s12 = sphi %s2706_s12, %s3278_s12  }
   0xa   : > { %3251 = sst [smem:[#allocation18_spill]] %s2670_s19  ;;  %s1813_s23 = sadd.s32 4294967294, %s2678_s21  }
   0xb   : > { %3252 = sst [smem:[#allocation19_spill]] %s2674_s20  ;;  %s29_s24 = sadd.s32 1, %s2666_s18 }
   0xc   : > { %s32_s25 = sadd.s32 1, %s2670_s19  ;;  %p30_p0 = scmp.ge.s32.totalorder %s29_s24, 2 }
   0xd   : > { %s36_s26 = sadd.s32 1, %s2674_s20  ;;  %s1814_s27 = sshll.u32 %s2670_s19, 1 }
   0xe   : > { %s91_s28 = sadd.s32 1, %s2650_s14  ;;  %s3282_s24 = smov (%p30_p0, %s29_s24), 0 }
   0xf   : > { %3253 = sst [smem:[#allocation20_spill]] %s3282_s24  ;;  %s3284_s25 = smov (!%p30_p0, %s32_s25), %s2670_s19 }
  0x10   : > { %s83_s29 = sadd.s32 %s2666_s18, %s1814_s27  ;;  %p101_p1 = scmp.ne.s32.totalorder %s2650_s14, %s2646_s13 }
  0x11   : > { %p34_p2 = scmp.ge.s32.totalorder %s3284_s25, 2  ;;  %p102_p3 = scmp.eq.s32.totalorder %s1812_s22, 7 }
  0x12   : > { %p107_p4 = scmp.ne.s32.totalorder %s2646_s13, %s2642_s12  ;;  %p108_p5 = scmp.eq.s32.totalorder %s1813_s23, 7 }
  0x13   : > { %s3286_s25 = smov (%p34_p2, %s3284_s25), 0  ;;  %s3288_s26 = smov (!%p34_p2, %s36_s26), %s2674_s20 }
  0x14   : > { %3254 = sst [smem:[#allocation21_spill]] %s3286_s25  ;;  %s1815_s30 = sshll.u32 %s3286_s25, 1 }
  0x15   : > { %p2777_p6 = por %p102_p3, %p101_p1  ;;  %p38_p7 = scmp.ge.s32.totalorder %s3288_s26, 2 }
  0x16   : > { %s85_s5 = sadd.s32 %s1815_s30, %s3282_s24  ;;  %p2782_p8 = por %p108_p5, %p107_p4 }
  0x17   : > { %s87_s6 = ssub.s32 %s83_s29, %s85_s5  ;;  %s3290_s26 = smov (%p38_p7, %s3288_s26), 0 }
  0x18   : > { %s3256_s7 = scalar_select %p2782_p8, 1, 0 }
  0x19   : > { %3257 = sst [smem:[#allocation22_spill]] %s3290_s26  ;;  %p1816_p9 = scmp.ge.s32.totalorder %s2678_s21, 1 }
  0x1a   : > { %p115_p10 = scmp.lt.s32.totalorder %s2678_s21, 9  ;;  %s86_s8 = ssub.s32 %s2674_s20, %s3290_s26 }
  0x1b   : > { %s88_s9 = sor.u32 %s87_s6, %s86_s8  ;;  %p2798_p13 = scmp.eq.s32.totalorder %s1812_s22, 0 }
  0x1c   : > { %p2792_p11 = pnand %p1816_p9, %p115_p10  ;;  %p89_p12 = scmp.eq.s32.totalorder %s88_s9, 0 }
  0x1d   : > { %s3260_s1 = sld [smem:[#allocation23_spill]]  ;;  %s2680_s5 = smov [#allocation4]  }
  0x1e   : > { %p2377_p0 = pneg %p2792_p11  ;;  %s128_s6 = sshll.u32 %s2680_s5, 4  ;;  %s129_s6 = int_to_ptr.vmem [resolvable:$true] %s128_s6 }
  0x1f   : > { %s2808_s30 = scalar_select %p89_p12, %s2650_s14, %s91_s28  }
  0x20   : > { %p2378_p1 = pnand %p2798_p13, %p2377_p0  ;;  %s2681_s8 = smov 64  }
  0x21   : > { %s2682_s22 = smov 4   ;;  %147 = sbr.rel (%p2792_p11) target bundleno = 429 (0x1ad), region = 28 }
  0x23   : > { %s126_s29 = sshll.u32 %s3260_s1, 4  ;;  %s127_s29 = int_to_ptr.hbm [resolvable:$true] %s126_s29 }
  0x24   : > { %2380 = dma.hbm_to_vmem [thread:$0]  (!%p2378_p1), %s127_s29, 9216, %s129_s6, [#allocation5], %s2681_s8, %s2681_s8, %s2682_s22  }
  0x26   : > { %2631 = dma.done.wait (%p2798_p13), [#allocation5], 9216  }
  0x27   : > { %2633 = vsyncadd (%p2798_p13), [#allocation5], 4294958080  ;;  %s3242_s28 = sand.u32 1, %s2646_s13   ;;  %s1821_s9 = sshll.u32 %s2658_s16, 1 }
  0x28   : > { %s2822_s10 = sshll.u32 %s3242_s28, 6  ;;  %s2825_s23 = sadd.s32 %s2654_s15, %s1821_s9 }
  0x29   : > { %p170_p2 = scmp.lt.s32.totalorder %s2654_s15, 0  ;;  %s171_s11 = ssub.s32 0, %s2654_s15 }
  0x2a   : > { %s1822_s27 = smin.u32 %s2654_s15, %s171_s11  ;;  %s1827_s5 = smul.u32 12, %s2825_s23 }
  0x2b   : > { %s173_s29 = sand.u32 1, %s1822_s27   ;;  %s188_s8 = smul.u32 60, %s2662_s17 }
  0x2c   : > { %s174_s6 = ssub.s32 0, %s173_s29  ;;  %p2387_p4 = scmp.eq.s32.totalorder %s2654_s15, 0 }
  0x2d   : > { %s3292_s6 = smov (!%p170_p2, %s174_s6), %s173_s29  ;;  %s189_s22 = sadd.s32 %s1827_s5, %s188_s8 }
  0x2e   : > { %p1824_p3 = scmp.lt.s32.totalorder %s3292_s6, 0  ;;  %s180_s26 = sadd.s32 2, %s3292_s6 }
  0x2f   : > { %s1828_s16 = sshll.u32 %s189_s22, 2 }
  0x30   : > { %s3294_s26 = smov (!%p1824_p3, %s180_s26), %s3292_s6  ;;  %s191_s11 = scalar_lea.hbm %s3237_s0, %s1828_s16 }
  0x31   : > { %s2263_s27 = smul.u32 96, %s3294_s26  ;;  %s203_s25 = sshll.u32 %s191_s11, 4  ;;  %s2840_s25 = int_to_ptr.hbm [resolvable:$true] %s203_s25 }
  0x32   : > { %s1743_s24 = scalar_lea.hbm %s191_s11, 48  ;;  %s2851_s22 = scalar_lea.sflag [#allocation3], %s3294_s26 }
  0x33   : > { %s2842_s29 = scalar_lea.vmem [#allocation2], %s2263_s27  ;;  %s2845_s6 = sshll.u32 %s1743_s24, 4  ;;  %s234_s6 = int_to_ptr.hbm [resolvable:$true] %s2845_s6 }
  0x34   : > { %s205_s5 = sshll.u32 %s2842_s29, 4  ;;  %s2506_s28 = sshra.s32 %s2840_s25, 4  ;;  %s2847_s5 = int_to_ptr.vmem [resolvable:$true] %s205_s5  ;;  %s2507_s28 = int_to_ptr.hbm [resolvable:$true] %s2506_s28 }
  0x35   : > { %s2508_s16 = scalar_lea.hbm %s2507_s28, 96  ;;  %s3248_s27 = scalar_lea.hbm %s3237_s0, 480 }
  0x36   : > { %p2509_p5 = scmp.ne.s32.totalorder %s2507_s28, %s2508_s16  ;;  %p2513_p10 = scmp.lt.s32.totalorder %s2507_s28, %s3237_s0 }
  0x37   : > { %p2514_p11 = scmp.lt.s32.totalorder %s3248_s27, %s2508_s16 }
  0x38   : > { %p2510_p7 = pnand %p2509_p5, %p2387_p4 }
  0x39   : > { %p2515_p12 = por %p2514_p11, %p2513_p10 }
  0x3a   : > { %p2511_p9 = pneg %p2510_p7 }
  0x3c   : > { %p2516_p13 = pnand %p2515_p12, %p2511_p9 }
  0x3e   : > { %2519 = shalt.err (!%p2516_p13)  }
  0x3f   : > { %s2520_s8 = sshra.s32 %s2847_s5, 4  ;;  %s2683_s9 = smov [#allocation2]   ;;  %s2521_s8 = int_to_ptr.vmem [resolvable:$true] %s2520_s8 }
  0x40   : > { %s2522_s18 = scalar_lea.vmem %s2521_s8, 96  ;;  %s2869_s1 = scalar_lea.vmem %s2683_s9, 192 }
  0x41   : > { %p2523_p0 = scmp.ne.s32.totalorder %s2521_s8, %s2522_s18  ;;  %p2527_p3 = scmp.lt.s32.totalorder %s2521_s8, [#allocation2] }
  0x42   : > { %p2528_p5 = scmp.lt.s32.totalorder %s2869_s1, %s2522_s18 }
  0x43   : > { %p2524_p1 = pnand %p2523_p0, %p2387_p4 }
  0x44   : > { %p2529_p7 = por %p2528_p5, %p2527_p3 }
  0x45   : > { %p2525_p2 = pneg %p2524_p1 }
  0x47   : > { %p2530_p8 = pnand %p2529_p7, %p2525_p2 }
  0x49   : > { %2533 = shalt.err (!%p2530_p8)  }
  0x4a   : > { %2372 = dma.hbm_to_vmem [thread:$0]  (%p2387_p4), %s2840_s25, 1536, %s2847_s5, %s2851_s22 }
  0x4b   : > { %s3261_s19 = ssub.s32 1, %s3294_s26  ;;  %s3262_s28 = sadd.s32 1, %s2654_s15 }
  0x4c   : > { %s2264_s20 = smul.u32 96, %s3261_s19  ;;  %p2881_p9 = scmp.lt.s32.totalorder %s3262_s28, 2 }
  0x4d   : > { %s3264_s11 = smov %s3261_s19  ;;  %s2534_s9 = sshra.s32 %s234_s6, 4  ;;  %s2535_s9 = int_to_ptr.hbm [resolvable:$true] %s2534_s9 }
  0x4e   : > { %s224_s18 = scalar_lea.vmem [#allocation2], %s2264_s20  ;;  %s225_s24 = scalar_lea.sflag [#allocation3], %s3264_s11 }
  0x4f   : > { %s235_s8 = sshll.u32 %s224_s18, 4  ;;  %s2536_s27 = scalar_lea.hbm %s2535_s9, 96  ;;  %s236_s8 = int_to_ptr.vmem [resolvable:$true] %s235_s8 }
  0x50   : > { %p2537_p8 = scmp.ne.s32.totalorder %s2535_s9, %s2536_s27  ;;  %p2541_p11 = scmp.lt.s32.totalorder %s2535_s9, %s3237_s0 }
  0x51   : > { %s3265_s28 = scalar_lea.hbm %s3237_s0, 480 }
  0x52   : > { %p2538_p4 = pnand %p2537_p8, %p2881_p9  ;;  %p2542_p12 = scmp.lt.s32.totalorder %s3265_s28, %s2536_s27 }
  0x54   : > { %p2539_p10 = pneg %p2538_p4  ;;  %p2543_p13 = por %p2542_p12, %p2541_p11 }
  0x56   : > { %p2544_p0 = pnand %p2543_p13, %p2539_p10 }
  0x58   : > { %2547 = shalt.err (!%p2544_p0)  }
  0x59   : > { %s2548_s26 = sshra.s32 %s236_s8, 4  ;;  %s2549_s26 = int_to_ptr.vmem [resolvable:$true] %s2548_s26 }
  0x5a   : > { %s2550_s20 = scalar_lea.vmem %s2549_s26, 96  ;;  %p2555_p5 = scmp.lt.s32.totalorder %s2549_s26, [#allocation2] }
  0x5b   : > { %p2551_p1 = scmp.ne.s32.totalorder %s2549_s26, %s2550_s20  ;;  %p2556_p7 = scmp.lt.s32.totalorder %s2869_s1, %s2550_s20 }
  0x5d   : > { %p2552_p2 = pnand %p2551_p1, %p2881_p9  ;;  %p2557_p8 = por %p2556_p7, %p2555_p5 }
  0x5f   : > { %p2553_p3 = pneg %p2552_p2 }
  0x61   : > { %p2558_p4 = pnand %p2557_p8, %p2553_p3 }
  0x63   : > { %2561 = shalt.err (!%p2558_p4)  }
  0x64   : > { %2374 = dma.hbm_to_vmem [thread:$0]  (%p2881_p9), %s234_s6, 1536, %s236_s8, %s225_s24 }
  0x65   : > { %s2903_s27 = scalar_lea.vmem [#allocation7], %s2822_s10 }
  0x66   : > { %2634 = dma.done.wait %s2851_s22, 1536 }
  0x67   : > { %2635 = vsyncadd %s2851_s22, 4294965760  ;;  %v2285_v0 = vld [vmem:[#allocation4 + $0x78] sm:$0xff]  ;;  %v2284_v2 = vld [vmem:[#allocation4 + $0x70] sm:$0xff]  ;;  %vm293_vm0 = vcmask 1042432   ;;  %vm294_vm1 = vcmask 1046532   ;;  %vm547_vm2 = vcmask 1041408  }
  0x68   : > { %v2293_v1 = vld [vmem:[#allocation4 + $0xb8] sm:$0xff]  ;;  %2351 = vmatpush.bf16.msra.mxu1 %v2285_v0  ;;  %405 = vmatpush.bf16.msra.mxu0 %v2285_v0  ;;  %v2292_v3 = vld [vmem:[#allocation4 + $0xb0] sm:$0xff]  ;;  %v2283_v6 = vld [vmem:[#allocation4 + $0x68] sm:$0xff]  ;;  %vm548_vm3 = vcmask 1045508   ;;  %s2350_s6 = sshll.u32 %s2825_s23, 3  ;;  %s2257_s22 = sshll.u32 %s2662_s17, 5 }
  0x69   : > { %659 = vmatpush.bf16.msra.mxu2 %v2293_v1  ;;  %v2305_v4 = vld [vmem:[#allocation4 + $0xf8] sm:$0xff]  ;;  %v2304_v5 = vld [vmem:[#allocation4 + $0xf0] sm:$0xff]  ;;  %v2291_v7 = vld [vmem:[#allocation4 + $0xa8] sm:$0xff]  ;;  %s1677_s1 = sadd.s32 %s2350_s6, %s2257_s22  ;;  %s1680_s8 = sshll.u32 %s2903_s27, 4  ;;  %s1681_s8 = int_to_ptr.vmem [resolvable:$true] %s1680_s8 }
  0x6a   : > { %796 = vmatpush.bf16.msra.mxu3 %v2305_v4  ;;  %v2303_v8 = vld [vmem:[#allocation4 + $0xe8] sm:$0xff]  ;;  %v2282_v9 = vld [vmem:[#allocation4 + $0x60] sm:$0xff]  ;;  %v2908_v11 = vld [vmem:[%s2842_s29 + $0x1c] sm:$0xf]  ;;  %s2258_s16 = sshll.u32 %s1677_s1, 3  ;;  %s3270_s24 = sand.u32 1, %s2646_s13  }
  0x6b   : > { %v2290_v10 = vld [vmem:[#allocation4 + $0xa0] sm:$0xff]  ;;  %v2281_v13 = vld [vmem:[#allocation4 + $0x58] sm:$0xff]  ;;  %v312_v17 = vrot.slane %v2908_v11, 5  ;;  %v274_v21 = vld [vmem:[%s2842_s29 + $0x8] sm:$0x1]  ;;  %s1679_s18 = scalar_lea.hbm %s3240_s3, %s2258_s16  ;;  %s1663_s9 = scalar_lea.sflag [#allocation6], %s3270_s24 }
  0x6c   : > { %2352 = vmatpush.bf16.msra.mxu1 %v2284_v2  ;;  %406 = vmatpush.bf16.msra.mxu0 %v2284_v2  ;;  %v250_v12 = vld [vmem:[%s2842_s29 + $0x4] sm:$0xf]  ;;  %v277_v14 = vld [vmem:[%s2842_s29 + $0x18] sm:$0xe]  ;;  %v278_v16 = vld [vmem:[%s2842_s29 + $0x20] sm:$0x1] }
  0x6d   : > { %660 = vmatpush.bf16.msra.mxu2 %v2292_v3  ;;  %v2302_v15 = vld [vmem:[#allocation4 + $0xe0] sm:$0xff]  ;;  %v298_v18 = vrot.slane %v250_v12, 5  ;;  %v2289_v19 = vld [vmem:[#allocation4 + $0x98] sm:$0xff]  ;;  %v552_v22 = vrot.slane %v250_v12, 6  ;;  %v532_v24 = vld [vmem:[%s2842_s29 + $0x8] sm:$0x3] }
  0x6e   : > { %797 = vmatpush.bf16.msra.mxu3 %v2304_v5  ;;  %v273_v20 = vld [vmem:[%s2842_s29] sm:$0xe]  ;;  %v1837_v25 = vrot.slane %v277_v14, 9  ;;  %v315_v26 = vrot.slane %v278_v16, 5  ;;  %v2301_v27 = vld [vmem:[#allocation4 + $0xd8] sm:$0xff]  ;;  %v2280_v28 = vld [vmem:[#allocation4 + $0x50] sm:$0xff] }
  0x6f   : > { %v531_v23 = vld [vmem:[%s2842_s29] sm:$0xc]  ;;  %vm2920_vm4 = vmor %vm293_vm0, %vm294_vm1  ;;  %v314_v30 = vrot.slane %v312_v17, 4  ;;  %v1835_v31 = vrot.slane %v273_v20, 9  ;;  %v300_v32 = vrot.slane %v298_v18, 4  ;;  %v301_v33 = vrot.slane %v274_v21, 5 }
  0x70   : > { %2353 = vmatpush.bf16.msra.mxu1 %v2283_v6  ;;  %407 = vmatpush.bf16.msra.mxu0 %v2283_v6  ;;  %v2288_v34 = vld [vmem:[#allocation4 + $0x90] sm:$0xff]  ;;  %v1919_v35 = vrot.slane %v531_v23, 10  ;;  %v554_v36 = vrot.slane %v552_v22, 4  ;;  %v555_v37 = vrot.slane %v532_v24, 6  ;;  %vm2925_vm5 = vmor %vm547_vm2, %vm548_vm3  ;;  %v313_v39 = vsel %vm2920_vm4, %v1837_v25, %v312_v17  ;;  %v2279_v41 = vld [vmem:[#allocation4 + $0x48] sm:$0xff]  ;;  %s1682_s11 = sshll.u32 %s1679_s18, 4  ;;  %s1683_s11 = int_to_ptr.hbm [resolvable:$true] %s1682_s11 }
  0x71   : > { %661 = vmatpush.bf16.msra.mxu2 %v2291_v7  ;;  %v2300_v40 = vld [vmem:[#allocation4 + $0xd0] sm:$0xff]  ;;  %v316_v42 = vsel %vm2920_vm4, %v314_v30, %v315_v26  ;;  %v299_v43 = vsel %vm2920_vm4, %v1835_v31, %v298_v18  ;;  %v302_v44 = vsel %vm2920_vm4, %v300_v32, %v301_v33  ;;  %v2287_v45 = vld [vmem:[#allocation4 + $0x88] sm:$0xff]  ;;  %v345_v48 = vunpack.c.l.b16 %v313_v39  ;;  %v2278_v53 = vld [vmem:[#allocation4 + $0x40] sm:$0xff]  ;;  %s2576_s25 = sshra.s32 %s1683_s11, 4  ;;  %s2582_s28 = scalar_lea.hbm %s3240_s3, 512  ;;  %s2577_s25 = int_to_ptr.hbm [resolvable:$true] %s2576_s25 }
  0x72   : > { %798 = vmatpush.bf16.msra.mxu3 %v2303_v8  ;;  %v553_v46 = vsel %vm2925_vm5, %v1919_v35, %v552_v22  ;;  %v556_v47 = vsel %vm2925_vm5, %v554_v36, %v555_v37  ;;  %v346_v49 = vunpack.c.l.b16 %v316_v42  ;;  %v341_v50 = vunpack.c.l.b16 %v299_v43  ;;  %v2299_v52 = vld [vmem:[#allocation4 + $0xc8] sm:$0xff]  ;;  %v2277_v54 = vld [vmem:[#allocation4 + $0x38] sm:$0xff]  ;;  %v2286_v57 = vld [vmem:[#allocation4 + $0x80] sm:$0xff]  ;;  %s2578_s15 = scalar_lea.hbm %s2577_s25, 64  ;;  %p2583_p12 = scmp.lt.s32.totalorder %s2577_s25, %s3240_s3 }
  0x73   : > { %v342_v51 = vunpack.c.l.b16 %v302_v44  ;;  %v595_v55 = vunpack.c.l.b16 %v553_v46  ;;  %v596_v56 = vunpack.c.l.b16 %v556_v47  ;;  %v2942_v58 = vld [vmem:[%s2842_s29 + $0x28] sm:$0xf]  ;;  %v252_v59 = vld [vmem:[%s2842_s29 + $0x10] sm:$0xf]  ;;  %v2313_v60 = vld [vmem:[#allocation4 + $0x138] sm:$0xff]  ;;  %p2579_p9 = scmp.ne.s32.totalorder %s2577_s25, %s2578_s15  ;;  %p2584_p13 = scmp.lt.s32.totalorder %s2582_s28, %s2578_s15 }
  0x74   : > { %2354 = vmatpush.bf16.msra.mxu1 %v2282_v9  ;;  %408 = vmatpush.bf16.msra.mxu0 %v2282_v9  ;;  %v2333_v61 = vld [vmem:[#allocation4 + $0x1b8] sm:$0xff]  ;;  %v351_v62 = vpack.c.b16 %v346_v49, %v345_v48  ;;  %v2276_v63 = vld [vmem:[#allocation4 + $0x30] sm:$0xff]  ;;  %v279_v1 = vld [vmem:[%s2842_s29 + $0x24] sm:$0xe]  ;;  %v319_v5 = vrot.slane %v2942_v58, 5  ;;  %v305_v7 = vrot.slane %v252_v59, 5 }
  0x75   : > { %662 = vmatpush.bf16.msra.mxu2 %v2290_v10  ;;  %v349_v0 = vpack.c.b16 %v342_v51, %v341_v50  ;;  %v603_v2 = vpack.c.b16 %v596_v56, %v595_v55  ;;  %v2312_v3 = vld [vmem:[#allocation4 + $0x130] sm:$0xff]  ;;  %v280_v4 = vld [vmem:[%s2842_s29 + $0x2c] sm:$0x1]  ;;  %v2298_v6 = vld [vmem:[#allocation4 + $0xc0] sm:$0xff]  ;;  %v559_v10 = vrot.slane %v252_v59, 6  ;;  %v1838_v16 = vrot.slane %v279_v1, 9  ;;  %p2580_p10 = pnand %p2579_p9, %p2777_p6  ;;  %p2585_p0 = por %p2584_p13, %p2583_p12 }
  0x76   : > { %799 = vmatpush.bf16.msra.mxu3 %v2302_v15  ;;  %v275_v8 = vld [vmem:[%s2842_s29 + $0xc] sm:$0xe]  ;;  %v276_v9 = vld [vmem:[%s2842_s29 + $0x14] sm:$0x1]  ;;  %v2341_v12 = vld [vmem:[#allocation4 + $0x1f8] sm:$0xff]  ;;  %v322_v17 = vrot.slane %v280_v4, 5 }
  0x77   : > { %v534_v14 = vld [vmem:[%s2842_s29 + $0x14] sm:$0x3]  ;;  %v2294_v18 = vld [vmem:[%s2842_s29 + $0x18] sm:$0xff]  ;;  %v1836_v20 = vrot.slane %v275_v8, 9  ;;  %v307_v21 = vrot.slane %v305_v7, 4  ;;  %v308_v22 = vrot.slane %v276_v9, 5  ;;  %v320_v31 = vsel %vm2920_vm4, %v1838_v16, %v319_v5  ;;  %p2581_p11 = pneg %p2580_p10 }
  0x78   : > { %2355 = vmatpush.bf16.msra.mxu1 %v2281_v13  ;;  %409 = vmatpush.bf16.msra.mxu0 %v2281_v13  ;;  %v533_v13 = vld [vmem:[%s2842_s29 + $0xc] sm:$0xc]  ;;  %v2332_v15 = vld [vmem:[#allocation4 + $0x1b0] sm:$0xff]  ;;  %v561_v25 = vrot.slane %v559_v10, 4  ;;  %v562_v26 = vrot.slane %v534_v14, 6  ;;  %v2274_v35 = vld [vmem:[#allocation4 + $0x20] sm:$0xff]  ;;  %v347_v42 = vunpack.c.l.b16 %v320_v31 }
  0x79   : > { %663 = vmatpush.bf16.msra.mxu2 %v2289_v19  ;;  %v321_v19 = vrot.slane %v319_v5, 4  ;;  %v2275_v23 = vld [vmem:[#allocation4 + $0x28] sm:$0xff]  ;;  %v1920_v24 = vrot.slane %v533_v13, 10  ;;  %v306_v33 = vsel %vm2920_vm4, %v1836_v20, %v305_v7  ;;  %v2273_v48 = vld [vmem:[#allocation4 + $0x18] sm:$0xff]  ;;  %v2272_v55 = vld [vmem:[#allocation4 + $0x10] sm:$0xff]  ;;  %v566_v59 = vrot.slane %v2908_v11, 6  ;;  %p2586_p1 = pnand %p2585_p0, %p2581_p11 }
  0x7a   : > { %800 = vmatpush.bf16.msra.mxu3 %v2301_v27  ;;  %v2340_v27 = vld [vmem:[#allocation4 + $0x1f0] sm:$0xff]  ;;  %v2331_v30 = vld [vmem:[#allocation4 + $0x1a8] sm:$0xff]  ;;  %v563_v37 = vsel %vm2925_vm5, %v561_v25, %v562_v26  ;;  %v343_v44 = vunpack.c.l.b16 %v306_v33  ;;  %v2966_v49 = vld [vmem:[%s2842_s29 + $0x1c] sm:$0xf] }
  0x7b   : > { %v323_v32 = vsel %vm2920_vm4, %v321_v19, %v322_v17  ;;  %v560_v36 = vsel %vm2925_vm5, %v1920_v24, %v559_v10  ;;  %v2339_v39 = vld [vmem:[#allocation4 + $0x1e8] sm:$0xff]  ;;  %v598_v47 = vunpack.c.l.b16 %v563_v37  ;;  %v2309_v50 = vld [vmem:[#allocation4 + $0x118] sm:$0xff]  ;;  %v2338_v4 = vld [vmem:[#allocation4 + $0x1e0] sm:$0xff]  ;;  %v568_v7 = vrot.slane %v566_v59, 4 }
  0x7c   : > { %2356 = vmatpush.bf16.msra.mxu1 %v2280_v28  ;;  %410 = vmatpush.bf16.msra.mxu0 %v2280_v28  ;;  %v2311_v28 = vld [vmem:[#allocation4 + $0x128] sm:$0xff]  ;;  %v348_v43 = vunpack.c.l.b16 %v323_v32  ;;  %v597_v46 = vunpack.c.l.b16 %v560_v36  ;;  %v2012_v56 = vld [vmem:[%s2842_s29 + $0x18] sm:$0xe]  ;;  %v2328_v11 = vld [vmem:[#allocation4 + $0x190] sm:$0xff] }
  0x7d   : > { %664 = vmatpush.bf16.msra.mxu2 %v2288_v34  ;;  %v309_v34 = vsel %vm2920_vm4, %v307_v21, %v308_v22  ;;  %v2024_v1 = vrot.slane %v2012_v56, 9  ;;  %v2271_v5 = vld [vmem:[#allocation4 + $0x8] sm:$0xff]  ;;  %v2337_v10 = vld [vmem:[#allocation4 + $0x1d8] sm:$0xff]  ;;  %v2270_v14 = vld [vmem:[#allocation4] sm:$0xff] }
  0x7e   : > { %801 = vmatpush.bf16.msra.mxu3 %v2300_v40  ;;  %v2310_v40 = vld [vmem:[#allocation4 + $0x120] sm:$0xff]  ;;  %v352_v51 = vpack.c.b16 %v348_v43, %v347_v42  ;;  %v2307_v9 = vld [vmem:[#allocation4 + $0x108] sm:$0xff]  ;;  %v2321_v17 = vld [vmem:[#allocation4 + $0x178] sm:$0xff] }
  0x7f   : > { %v2349_v21 = vld [vmem:[#allocation4 + $0x238] sm:$0xff]  ;;  %v2984_v24 = vld [vmem:[%s2842_s29 + $0x28] sm:$0xf]  ;;  %v2320_v25 = vld [vmem:[#allocation4 + $0x170] sm:$0xff] }
  0x80   : > { %2357 = vmatpush.bf16.msra.mxu1 %v2279_v41  ;;  %411 = vmatpush.bf16.msra.mxu0 %v2279_v41  ;;  %v2330_v41 = vld [vmem:[#allocation4 + $0x1a0] sm:$0xff]  ;;  %v2348_v31 = vld [vmem:[#allocation4 + $0x230] sm:$0xff]  ;;  %v2319_v32 = vld [vmem:[#allocation4 + $0x168] sm:$0xff] }
  0x81   : > { %665 = vmatpush.bf16.msra.mxu2 %v2287_v45  ;;  %v344_v45 = vunpack.c.l.b16 %v309_v34  ;;  %v2266_v26 = vld [vmem:[%s2842_s29] sm:$0xff]  ;;  %v2017_v34 = vld [vmem:[%s2842_s29 + $0x2c] sm:$0x1] }
  0x82   : > { %802 = vmatpush.bf16.msra.mxu3 %v2299_v52  ;;  %v2015_v33 = vld [vmem:[%s2842_s29 + $0x24] sm:$0xe]  ;;  %v538_v37 = vld [vmem:[%s2842_s29 + $0x2c] sm:$0x3]  ;;  %v869_v43 = vrot.slane %v2017_v34, 5 }
  0x83   : > { %v350_v52 = vpack.c.b16 %v344_v45, %v343_v44  ;;  %v537_v36 = vld [vmem:[%s2842_s29 + $0x24] sm:$0xc]  ;;  %v2336_v44 = vld [vmem:[#allocation4 + $0x1d0] sm:$0xff]  ;;  %v2347_v45 = vld [vmem:[#allocation4 + $0x228] sm:$0xff] }
  0x84   : > { %2358 = vmatpush.bf16.msra.mxu1 %v2278_v53  ;;  %412 = vmatpush.bf16.msra.mxu0 %v2278_v53  ;;  %v604_v53 = vpack.c.b16 %v598_v47, %v597_v46  ;;  %v1922_v46 = vrot.slane %v537_v36, 10 }
  0x85   : > { %666 = vmatpush.bf16.msra.mxu2 %v2286_v57  ;;  %v2014_v57 = vld [vmem:[%s2842_s29 + $0x20] sm:$0x1] }
  0x86   : > { %803 = vmatpush.bf16.msra.mxu3 %v2298_v6 }
  0x87   : > { %423 = vmatmul.bf16.vlgmr.msra.gmra.mxu1 %v351_v62  ;;  %413 = vmatmul.bf16.vlgmr.msra.gmra.mxu0 %v349_v0  ;;  %v536_v62 = vld [vmem:[%s2842_s29 + $0x20] sm:$0x3]  ;;  %v2329_v0 = vld [vmem:[#allocation4 + $0x198] sm:$0xff] }
  0x88   : > { %502 = vmatpush.bf16.msrb.mxu1 %v2277_v54  ;;  %966 = vmatpush.bf16.msrb.mxu0 %v2313_v60  ;;  %v859_v54 = vrot.slane %v2966_v49, 5  ;;  %v2308_v60 = vld [vmem:[#allocation4 + $0x110] sm:$0xff]  ;;  %v569_v8 = vrot.slane %v536_v62, 6 }
  0x89   : > { %1265 = vmatpush.bf16.msrb.mxu2 %v2333_v61  ;;  %804 = vmatmul.bf16.vlgmr.msra.gmra.mxu3 %v2294_v18  ;;  %v535_v61 = vld [vmem:[%s2842_s29 + $0x18] sm:$0xc]  ;;  %v2306_v18 = vld [vmem:[#allocation4 + $0x100] sm:$0xff] }
  0x8a   : > { %667 = vmatmul.bf16.vlgmr.msra.gmra.mxu2 %v603_v2  ;;  %1435 = vmatpush.bf16.msrb.mxu3 %v2341_v12  ;;  %v861_v2 = vrot.slane %v859_v54, 4  ;;  %v1921_v6 = vrot.slane %v535_v61, 10  ;;  %v860_v12 = vsel %vm2920_vm4, %v2024_v1, %v859_v54  ;;  %v570_v16 = vsel %vm2925_vm5, %v568_v7, %v569_v8  ;;  %v2346_v54 = vld [vmem:[#allocation4 + $0x220] sm:$0xff]  ;;  %v2267_v1 = vld [vmem:[%s2842_s29 + $0xc] sm:$0xff]  ;;  %v3010_v7 = vld [vmem:[%s2842_s29 + $0x34] sm:$0xf] }
  0x8b   : > { %v902_v19 = vunpack.c.l.b16 %v860_v12  ;;  %v2297_v8 = vld [vmem:[%s2842_s29 + $0x3c] sm:$0xff] }
  0x8c   : > { %503 = vmatpush.bf16.msrb.mxu1 %v2276_v63  ;;  %967 = vmatpush.bf16.msrb.mxu0 %v2312_v3  ;;  %v2295_v63 = vld [vmem:[%s2842_s29 + $0x24] sm:$0xff]  ;;  %v862_v3 = vrot.slane %v2014_v57, 5  ;;  %v2317_v57 = vld [vmem:[#allocation4 + $0x158] sm:$0xff] }
  0x8d   : > { %1266 = vmatpush.bf16.msrb.mxu2 %v2332_v15  ;;  %v567_v15 = vsel %vm2925_vm5, %v1921_v6, %v566_v59  ;;  %v2020_v6 = vld [vmem:[%s2842_s29 + $0x38] sm:$0x1] }
  0x8e   : > { %1436 = vmatpush.bf16.msrb.mxu3 %v2340_v27  ;;  %v863_v13 = vsel %vm2920_vm4, %v861_v2, %v862_v3  ;;  %v599_v22 = vunpack.c.l.b16 %v567_v15  ;;  %v2345_v12 = vld [vmem:[#allocation4 + $0x218] sm:$0xff]  ;;  %v1328_v15 = vrot.slane %v3010_v7, 5 }
  0x8f   : > { %v903_v20 = vunpack.c.l.b16 %v863_v13 }
  0x90   : > { %504 = vmatpush.bf16.msrb.mxu1 %v2275_v23  ;;  %968 = vmatpush.bf16.msrb.mxu0 %v2311_v28  ;;  %v600_v23 = vunpack.c.l.b16 %v570_v16  ;;  %v2161_v16 = vld [vmem:[%s2842_s29 + $0x30] sm:$0xe] }
  0x91   : > { %1267 = vmatpush.bf16.msrb.mxu2 %v2331_v30  ;;  %v910_v27 = vpack.c.b16 %v903_v20, %v902_v19  ;;  %v866_v30 = vrot.slane %v2984_v24, 5  ;;  %v2314_v19 = vld [vmem:[#allocation4 + $0x140] sm:$0xff] }
  0x92   : > { %1437 = vmatpush.bf16.msrb.mxu3 %v2339_v39  ;;  %v605_v28 = vpack.c.b16 %v600_v23, %v599_v22  ;;  %v2327_v39 = vld [vmem:[#allocation4 + $0x188] sm:$0xff]  ;;  %v2173_v22 = vrot.slane %v2161_v16, 9  ;;  %v1330_v23 = vrot.slane %v1328_v15, 4 }
  0x93   : > { %v868_v42 = vrot.slane %v866_v30, 4 }
  0x94   : > { %505 = vmatpush.bf16.msrb.mxu1 %v2274_v35  ;;  %969 = vmatpush.bf16.msrb.mxu0 %v2310_v40  ;;  %v573_v35 = vrot.slane %v2942_v58, 6  ;;  %v2296_v40 = vld [vmem:[%s2842_s29 + $0x30] sm:$0xff]  ;;  %v2318_v58 = vld [vmem:[#allocation4 + $0x160] sm:$0xff] }
  0x95   : > { %1268 = vmatpush.bf16.msrb.mxu2 %v2330_v41  ;;  %v2025_v41 = vrot.slane %v2015_v33, 9  ;;  %v2268_v33 = vld [vmem:[%s2842_s29 + $0x18] sm:$0xff] }
  0x96   : > { %1438 = vmatpush.bf16.msrb.mxu3 %v2338_v4  ;;  %v575_v47 = vrot.slane %v573_v35, 4  ;;  %v2018_v4 = vld [vmem:[%s2842_s29 + $0x30] sm:$0xe] }
  0x97   : > { %428 = vmatmul.bf16.gmra.mxu1 %v352_v51  ;;  %418 = vmatmul.bf16.gmra.mxu0 %v350_v52  ;;  %v2335_v51 = vld [vmem:[#allocation4 + $0x1c8] sm:$0xff]  ;;  %v867_v52 = vsel %vm2920_vm4, %v2025_v41, %v866_v30  ;;  %v1329_v30 = vsel %vm2920_vm4, %v2173_v22, %v1328_v15  ;;  %v2023_v41 = vld [vmem:[%s2842_s29 + $0x44] sm:$0x1] }
  0x98   : > { %506 = vmatpush.bf16.msrb.mxu1 %v2273_v48  ;;  %970 = vmatpush.bf16.msrb.mxu0 %v2309_v50  ;;  %v576_v48 = vrot.slane %v538_v37, 6  ;;  %v2326_v50 = vld [vmem:[#allocation4 + $0x180] sm:$0xff]  ;;  %v904_v59 = vunpack.c.l.b16 %v867_v52  ;;  %v2322_v37 = vld [vmem:[%s2842_s29 + $0x30] sm:$0xff] }
  0x99   : > { %1269 = vmatpush.bf16.msrb.mxu2 %v2329_v0  ;;  %809 = vmatmul.bf16.gmra.mxu3 %v2295_v63  ;;  %v3003_v63 = vld [vmem:[%s2842_s29 + $0x34] sm:$0xf] }
  0x9a   : > { %672 = vmatmul.bf16.gmra.mxu2 %v604_v53  ;;  %1439 = vmatpush.bf16.msrb.mxu3 %v2337_v10  ;;  %v870_v53 = vsel %vm2920_vm4, %v868_v42, %v869_v43  ;;  %v577_v56 = vsel %vm2925_vm5, %v575_v47, %v576_v48  ;;  %v2316_v0 = vld [vmem:[#allocation4 + $0x150] sm:$0xff]  ;;  %v2334_v10 = vld [vmem:[#allocation4 + $0x1c0] sm:$0xff]  ;;  %v883_v47 = vrot.slane %v2023_v41, 5 }
  0x9b   : > { %v602_v62 = vunpack.c.l.b16 %v577_v56  ;;  %v3033_v42 = vld [vmem:[%s2842_s29 + $0x40] sm:$0xf] }
  0x9c   : > { %507 = vmatpush.bf16.msrb.mxu1 %v2272_v55  ;;  %971 = vmatpush.bf16.msrb.mxu0 %v2308_v60  ;;  %v574_v55 = vsel %vm2925_vm5, %v1922_v46, %v573_v35  ;;  %v905_v60 = vunpack.c.l.b16 %v870_v53  ;;  %v1371_v35 = vunpack.c.l.b16 %v1329_v30  ;;  %v1335_v48 = vrot.slane %v3033_v42, 5 }
  0x9d   : > { %1270 = vmatpush.bf16.msrb.mxu2 %v2328_v11  ;;  %v601_v61 = vunpack.c.l.b16 %v574_v55  ;;  %v2026_v11 = vrot.slane %v2018_v4, 9 }
  0x9e   : > { %1440 = vmatpush.bf16.msrb.mxu3 %v2336_v44  ;;  %v911_v2 = vpack.c.b16 %v905_v60, %v904_v59 }
  0x9f   : > { %v606_v3 = vpack.c.b16 %v602_v62, %v601_v61  ;;  %v1021_v61 = vrot.slane %v2966_v49, 6  ;;  %v2269_v62 = vld [vmem:[%s2842_s29 + $0x24] sm:$0xff] }
  0xa0   : > { %508 = vmatpush.bf16.msrb.mxu1 %v2271_v5  ;;  %972 = vmatpush.bf16.msrb.mxu0 %v2307_v9  ;;  %v873_v5 = vrot.slane %v3003_v63, 5  ;;  %v2315_v9 = vld [vmem:[#allocation4 + $0x148] sm:$0xff] }
  0xa1   : > { %1271 = vmatpush.bf16.msrb.mxu2 %v2327_v39  ;;  %v2021_v39 = vld [vmem:[%s2842_s29 + $0x3c] sm:$0xe] }
  0xa2   : > { %1441 = vmatpush.bf16.msrb.mxu3 %v2335_v51  ;;  %v875_v13 = vrot.slane %v873_v5, 4  ;;  %v874_v20 = vsel %vm2920_vm4, %v2026_v11, %v873_v5  ;;  %v2027_v43 = vrot.slane %v2021_v39, 9  ;;  %v2060_v5 = vld [vmem:[%s2842_s29 + $0x18] sm:$0xc]  ;;  %v2210_v11 = vld [vmem:[%s2842_s29 + $0x38] sm:$0x3] }
  0xa3   : > { %v1493_v15 = vrot.slane %v2210_v11, 6  ;;  %v1028_v39 = vrot.slane %v2984_v24, 6 }
  0xa4   : > { %509 = vmatpush.bf16.msrb.mxu1 %v2270_v14  ;;  %973 = vmatpush.bf16.msrb.mxu0 %v2306_v18  ;;  %v876_v14 = vrot.slane %v2020_v6, 5  ;;  %v2344_v18 = vld [vmem:[#allocation4 + $0x210] sm:$0xff]  ;;  %v2061_v6 = vld [vmem:[%s2842_s29 + $0x20] sm:$0x3] }
  0xa5   : > { %1272 = vmatpush.bf16.msrb.mxu2 %v2326_v50  ;;  %v2164_v50 = vld [vmem:[%s2842_s29 + $0x3c] sm:$0xe]  ;;  %v1024_v49 = vrot.slane %v2061_v6, 6 }
  0xa6   : > { %1442 = vmatpush.bf16.msrb.mxu3 %v2334_v10  ;;  %v2174_v53 = vrot.slane %v2164_v50, 9  ;;  %v1023_v10 = vrot.slane %v1021_v61, 4 }
  0xa7   : > { %510 = vmatmul.bf16.vlgmr.msrb.gmra.mxu1 %v2266_v26  ;;  %974 = vmatmul.bf16.vlgmr.msrb.gmra.mxu0 %v910_v27  ;;  %v2343_v26 = vld [vmem:[#allocation4 + $0x208] sm:$0xff]  ;;  %v906_v27 = vunpack.c.l.b16 %v874_v20 }
  0xa8   : > { %1128 = vmatpush.bf16.msra.mxu1 %v2321_v17  ;;  %1597 = vmatpush.bf16.msra.mxu0 %v2349_v21  ;;  %v2163_v17 = vld [vmem:[%s2842_s29 + $0x38] sm:$0x1]  ;;  %v1336_v59 = vsel %vm2920_vm4, %v2174_v53, %v1335_v48  ;;  %v1025_v20 = vsel %vm2925_vm5, %v1023_v10, %v1024_v49 }
  0xa9   : > { %814 = vmatmul.bf16.gmra.mxu3 %v2296_v40  ;;  %2359 = vmatpush.bf16.msra.mxu2 %v2349_v21  ;;  %v877_v21 = vsel %vm2920_vm4, %v875_v13, %v876_v14 }
  0xaa   : > { %677 = vmatmul.bf16.gmra.mxu2 %v605_v28  ;;  %v907_v28 = vunpack.c.l.b16 %v877_v21 }
  0xac   : > { %1129 = vmatpush.bf16.msra.mxu1 %v2320_v25  ;;  %1598 = vmatpush.bf16.msra.mxu0 %v2348_v31  ;;  %v1331_v25 = vrot.slane %v2163_v17, 5  ;;  %v912_v34 = vpack.c.b16 %v907_v28, %v906_v27  ;;  %v2167_v17 = vld [vmem:[%s2842_s29 + $0x48] sm:$0xe]  ;;  %v1065_v28 = vunpack.c.l.b16 %v1025_v20  ;;  %v2215_v20 = vld [vmem:[%s2842_s29 + $0x54] sm:$0xc] }
  0xad   : > { %2360 = vmatpush.bf16.msra.mxu2 %v2348_v31 }
  0xae   : > { %v1332_v31 = vsel %vm2920_vm4, %v1330_v23, %v1331_v25  ;;  %v2175_v23 = vrot.slane %v2167_v17, 9 }
  0xaf   : > { %v1372_v36 = vunpack.c.l.b16 %v1332_v31 }
  0xb0   : > { %1130 = vmatpush.bf16.msra.mxu1 %v2319_v32  ;;  %1599 = vmatpush.bf16.msra.mxu0 %v2347_v45  ;;  %v3025_v32 = vld [vmem:[%s2842_s29 + $0x40] sm:$0xf] }
  0xb1   : > { %2361 = vmatpush.bf16.msra.mxu2 %v2347_v45  ;;  %v880_v40 = vrot.slane %v3025_v32, 5  ;;  %v1379_v44 = vpack.c.b16 %v1372_v36, %v1371_v35  ;;  %v2342_v45 = vld [vmem:[#allocation4 + $0x200] sm:$0xff] }
  0xb3   : > { %v882_v46 = vrot.slane %v880_v40, 4  ;;  %v881_v51 = vsel %vm2920_vm4, %v2027_v43, %v880_v40  ;;  %v2324_v43 = vld [vmem:[%s2842_s29 + $0x48] sm:$0xff] }
  0xb4   : > { %1131 = vmatpush.bf16.msra.mxu1 %v2318_v58  ;;  %1600 = vmatpush.bf16.msra.mxu0 %v2346_v54  ;;  %v2166_v58 = vld [vmem:[%s2842_s29 + $0x44] sm:$0x1]  ;;  %v908_v56 = vunpack.c.l.b16 %v881_v51 }
  0xb5   : > { %2362 = vmatpush.bf16.msra.mxu2 %v2346_v54  ;;  %v884_v52 = vsel %vm2920_vm4, %v882_v46, %v883_v47  ;;  %v1337_v54 = vrot.slane %v1335_v48, 4  ;;  %v1338_v55 = vrot.slane %v2166_v58, 5  ;;  %v1497_v46 = vrot.slane %v3033_v42, 6  ;;  %v2212_v47 = vld [vmem:[%s2842_s29 + $0x44] sm:$0x3] }
  0xb6   : > { %v2171_v48 = vld [vmem:[%s2842_s29 + $0x58] sm:$0xf]  ;;  %v1030_v58 = vrot.slane %v1028_v39, 4 }
  0xb7   : > { %515 = vmatmul.bf16.gmra.mxu1 %v2267_v1  ;;  %979 = vmatmul.bf16.gmra.mxu0 %v911_v2  ;;  %v1339_v60 = vsel %vm2920_vm4, %v1337_v54, %v1338_v55  ;;  %v1490_v1 = vrot.slane %v3010_v7, 6  ;;  %v2323_v2 = vld [vmem:[%s2842_s29 + $0x3c] sm:$0xff]  ;;  %v1499_v24 = vrot.slane %v1497_v46, 4  ;;  %v1500_v54 = vrot.slane %v2212_v47, 6 }
  0xb8   : > { %1132 = vmatpush.bf16.msra.mxu1 %v2317_v57  ;;  %1601 = vmatpush.bf16.msra.mxu0 %v2345_v12  ;;  %v909_v57 = vunpack.c.l.b16 %v884_v52  ;;  %v1374_v4 = vunpack.c.l.b16 %v1339_v60  ;;  %v1349_v55 = vrot.slane %v2171_v48, 5  ;;  %v1511_v17 = vrot.slane %v2171_v48, 6 }
  0xb9   : > { %819 = vmatmul.bf16.gmra.mxu3 %v2297_v8  ;;  %2363 = vmatpush.bf16.msra.mxu2 %v2345_v12  ;;  %v2209_v8 = vld [vmem:[%s2842_s29 + $0x30] sm:$0xc]  ;;  %v2068_v12 = vrot.slane %v2060_v5, 10  ;;  %v1492_v7 = vrot.slane %v1490_v1, 4 }
  0xba   : > { %682 = vmatmul.bf16.gmra.mxu2 %v606_v3  ;;  %v1373_v3 = vunpack.c.l.b16 %v1336_v59  ;;  %v2217_v14 = vrot.slane %v2209_v8, 10 }
  0xbb   : > { %v1494_v22 = vsel %vm2925_vm5, %v1492_v7, %v1493_v15  ;;  %v2064_v7 = vld [vmem:[%s2842_s29 + $0x30] sm:$0xc]  ;;  %v2065_v15 = vld [vmem:[%s2842_s29 + $0x38] sm:$0x3] }
  0xbc   : > { %1133 = vmatpush.bf16.msra.mxu1 %v2316_v0  ;;  %1602 = vmatpush.bf16.msra.mxu0 %v2344_v18  ;;  %v913_v0 = vpack.c.b16 %v909_v57, %v908_v56  ;;  %v1380_v13 = vpack.c.b16 %v1374_v4, %v1373_v3  ;;  %v1491_v21 = vsel %vm2925_vm5, %v2217_v14, %v1490_v1  ;;  %v1534_v31 = vunpack.c.l.b16 %v1494_v22  ;;  %v2170_v56 = vld [vmem:[%s2842_s29 + $0x54] sm:$0xe]  ;;  %v2172_v57 = vld [vmem:[%s2842_s29 + $0x5c] sm:$0x1] }
  0xbd   : > { %2364 = vmatpush.bf16.msra.mxu2 %v2344_v18  ;;  %v2169_v18 = vld [vmem:[%s2842_s29 + $0x50] sm:$0x1]  ;;  %v1533_v30 = vunpack.c.l.b16 %v1491_v21  ;;  %v1352_v1 = vrot.slane %v2172_v57, 5  ;;  %v2325_v14 = vld [vmem:[%s2842_s29 + $0x54] sm:$0xff]  ;;  %v2216_v21 = vld [vmem:[%s2842_s29 + $0x5c] sm:$0x3] }
  0xbe   : > { %v2070_v29 = vrot.slane %v2064_v7, 10 }
  0xbf   : > { %v1541_v36 = vpack.c.b16 %v1534_v31, %v1533_v30  ;;  %v2220_v30 = vrot.slane %v2215_v20, 10  ;;  %v1514_v31 = vrot.slane %v2216_v21, 6 }
  0xc0   : > { %1134 = vmatpush.bf16.msra.mxu1 %v2315_v9  ;;  %1603 = vmatpush.bf16.msra.mxu0 %v2343_v26  ;;  %v3055_v9 = vld [vmem:[%s2842_s29 + $0x4c] sm:$0xf] }
  0xc1   : > { %2365 = vmatpush.bf16.msra.mxu2 %v2343_v26  ;;  %v1342_v16 = vrot.slane %v3055_v9, 5  ;;  %v1345_v26 = vrot.slane %v2169_v18, 5  ;;  %v2213_v18 = vld [vmem:[%s2842_s29 + $0x48] sm:$0xc] }
  0xc3   : > { %v1344_v25 = vrot.slane %v1342_v16, 4 }
  0xc4   : > { %1135 = vmatpush.bf16.msra.mxu1 %v2314_v19  ;;  %1604 = vmatpush.bf16.msra.mxu0 %v2342_v45  ;;  %v1022_v19 = vsel %vm2925_vm5, %v2068_v12, %v1021_v61  ;;  %v1501_v61 = vsel %vm2925_vm5, %v1499_v24, %v1500_v54  ;;  %v1035_v12 = vrot.slane %v3003_v63, 6  ;;  %v2219_v63 = vrot.slane %v2213_v18, 10 }
  0xc5   : > { %2366 = vmatpush.bf16.msra.mxu2 %v2342_v45  ;;  %v1064_v27 = vunpack.c.l.b16 %v1022_v19  ;;  %v2211_v45 = vld [vmem:[%s2842_s29 + $0x3c] sm:$0xc]  ;;  %v1536_v5 = vunpack.c.l.b16 %v1501_v61  ;;  %v2214_v19 = vld [vmem:[%s2842_s29 + $0x50] sm:$0x3] }
  0xc6   : > { %v2218_v53 = vrot.slane %v2211_v45, 10  ;;  %v1037_v22 = vrot.slane %v1035_v12, 4 }
  0xc7   : > { %520 = vmatmul.bf16.gmra.mxu1 %v2268_v33  ;;  %984 = vmatmul.bf16.gmra.mxu0 %v912_v34  ;;  %v1343_v33 = vsel %vm2920_vm4, %v2175_v23, %v1342_v16  ;;  %v1346_v34 = vsel %vm2920_vm4, %v1344_v25, %v1345_v26  ;;  %v1072_v35 = vpack.c.b16 %v1065_v28, %v1064_v27  ;;  %v1504_v16 = vrot.slane %v3055_v9, 6 }
  0xc8   : > { %v1375_v40 = vunpack.c.l.b16 %v1343_v33  ;;  %v1376_v41 = vunpack.c.l.b16 %v1346_v34  ;;  %v1498_v60 = vsel %vm2925_vm5, %v2218_v53, %v1497_v46  ;;  %v1038_v25 = vrot.slane %v2065_v15, 6  ;;  %v2067_v53 = vld [vmem:[%s2842_s29 + $0x44] sm:$0x3] }
  0xc9   : > { %1443 = vmatmul.bf16.vlgmr.msrb.gmra.mxu3 %v1379_v44  ;;  %v2063_v44 = vld [vmem:[%s2842_s29 + $0x2c] sm:$0x3]  ;;  %v1535_v4 = vunpack.c.l.b16 %v1498_v60  ;;  %v1506_v26 = vrot.slane %v1504_v16, 4  ;;  %v1507_v27 = vrot.slane %v2214_v19, 6  ;;  %v1513_v28 = vrot.slane %v1511_v17, 4 }
  0xca   : > { %1273 = vmatmul.bf16.vlgmr.msrb.gmra.mxu2 %v2322_v37  ;;  %v2062_v37 = vld [vmem:[%s2842_s29 + $0x24] sm:$0xc]  ;;  %v1031_v51 = vrot.slane %v2063_v44, 6  ;;  %v1381_v52 = vpack.c.b16 %v1376_v41, %v1375_v40  ;;  %v1036_v9 = vsel %vm2925_vm5, %v2070_v29, %v1035_v12  ;;  %v1039_v33 = vsel %vm2925_vm5, %v1037_v22, %v1038_v25 }
  0xcb   : > { %v2069_v50 = vrot.slane %v2062_v37, 10  ;;  %v1542_v10 = vpack.c.b16 %v1536_v5, %v1535_v4  ;;  %v1505_v34 = vsel %vm2925_vm5, %v2219_v63, %v1504_v16  ;;  %v1515_v37 = vsel %vm2925_vm5, %v1513_v28, %v1514_v31 }
  0xcc   : > { %v1032_v42 = vsel %vm2925_vm5, %v1030_v58, %v1031_v51  ;;  %v1069_v40 = vunpack.c.l.b16 %v1039_v33  ;;  %v1537_v41 = vunpack.c.l.b16 %v1505_v34  ;;  %v1540_v45 = vunpack.c.l.b16 %v1515_v37 }
  0xcd   : > { %v1029_v59 = vsel %vm2925_vm5, %v2069_v50, %v1028_v39  ;;  %v1067_v3 = vunpack.c.l.b16 %v1032_v42  ;;  %v1068_v39 = vunpack.c.l.b16 %v1036_v9  ;;  %v1042_v51 = vrot.slane %v3025_v32, 6 }
  0xcf   : > { %v1074_v46 = vpack.c.b16 %v1069_v40, %v1068_v39  ;;  %v1044_v54 = vrot.slane %v1042_v51, 4 }
  0xd7   : > { %525 = vmatmul.bf16.gmra.mxu1 %v2269_v62  ;;  %989 = vmatmul.bf16.gmra.mxu0 %v913_v0  ;;  %v2176_v62 = vrot.slane %v2170_v56, 9  ;;  %v1351_v0 = vrot.slane %v1349_v55, 4 }
  0xd9   : > { %1448 = vmatmul.bf16.gmra.mxu3 %v1380_v13  ;;  %v1350_v6 = vsel %vm2920_vm4, %v2176_v62, %v1349_v55  ;;  %v1353_v8 = vsel %vm2920_vm4, %v1351_v0, %v1352_v1  ;;  %v1045_v55 = vrot.slane %v2067_v53, 6 }
  0xda   : > { %1278 = vmatmul.bf16.gmra.mxu2 %v2323_v2  ;;  %v1066_v2 = vunpack.c.l.b16 %v1029_v59  ;;  %v1377_v49 = vunpack.c.l.b16 %v1350_v6  ;;  %v1378_v13 = vunpack.c.l.b16 %v1353_v8 }
  0xdb   : > { %v1046_v60 = vsel %vm2925_vm5, %v1044_v54, %v1045_v55 }
  0xdc   : > { %v1073_v11 = vpack.c.b16 %v1067_v3, %v1066_v2  ;;  %v1382_v23 = vpack.c.b16 %v1378_v13, %v1377_v49  ;;  %v1071_v32 = vunpack.c.l.b16 %v1046_v60 }
  0xe7   : > { %1136 = vmatmul.bf16.vlgmr.msra.gmra.mxu1 %v1072_v35  ;;  %1605 = vmatmul.bf16.vlgmr.msra.gmra.mxu0 %v1541_v36  ;;  %v1508_v35 = vsel %vm2925_vm5, %v1506_v26, %v1507_v27  ;;  %v1512_v36 = vsel %vm2925_vm5, %v2220_v30, %v1511_v17 }
  0xe8   : > { %v1539_v44 = vunpack.c.l.b16 %v1512_v36 }
  0xe9   : > { %1453 = vmatmul.bf16.gmra.mxu3 %v1381_v52  ;;  %v2066_v52 = vld [vmem:[%s2842_s29 + $0x3c] sm:$0xc] }
  0xea   : > { %1283 = vmatmul.bf16.gmra.mxu2 %v2324_v43  ;;  %v1538_v43 = vunpack.c.l.b16 %v1508_v35  ;;  %v1544_v58 = vpack.c.b16 %v1540_v45, %v1539_v44  ;;  %v2071_v24 = vrot.slane %v2066_v52, 10 }
  0xec   : > { %v1543_v47 = vpack.c.b16 %v1538_v43, %v1537_v41  ;;  %v1043_v42 = vsel %vm2925_vm5, %v2071_v24, %v1042_v51 }
  0xed   : > { %v1070_v62 = vunpack.c.l.b16 %v1043_v42 }
  0xef   : > { %v1075_v0 = vpack.c.b16 %v1071_v32, %v1070_v62 }
  0xf7   : > { %1141 = vmatmul.bf16.gmra.mxu1 %v1073_v11  ;;  %1610 = vmatmul.bf16.gmra.mxu0 %v1542_v10 }
  0xf9   : > { %1458 = vmatmul.bf16.gmra.mxu3 %v1382_v23 }
  0xfa   : > { %1288 = vmatmul.bf16.gmra.mxu2 %v2325_v14 }
 0x104   : > { %v424_v48 = vpop.f32.mrf.mxu1  ;;  %v414_v50 = vpop.f32.mrf.mxu0 }
 0x107   : > { %1146 = vmatmul.bf16.gmra.mxu1 %v1074_v46  ;;  %1615 = vmatmul.bf16.gmra.mxu0 %v1543_v47 }
 0x10a   : > { %1620 = vmatmul.bf16.vlgmr.msra.gmra.mxu2 %v1544_v58 }
 0x10c   : > { %v426_v57 = vpop.f32.mrf.mxu1  ;;  %v416_v59 = vpop.f32.mrf.mxu0 }
 0x10d   : > { %v668_v56 = vpop.f32.mrf.mxu2  ;;  %v805_v61 = vpop.f32.mrf.mxu3 }
 0x114   : > { %v429_v2 = vpop.f32.mrf.mxu1  ;;  %v419_v3 = vpop.f32.mrf.mxu0 }
 0x115   : > { %v670_v1 = vpop.f32.mrf.mxu2  ;;  %v807_v4 = vpop.f32.mrf.mxu3 }
 0x117   : > { %1151 = vmatmul.bf16.gmra.mxu1 %v1075_v0 }
 0x11c   : > { %v431_v6 = vpop.f32.mrf.mxu1  ;;  %v421_v8 = vpop.f32.mrf.mxu0 }
 0x11d   : > { %v673_v5 = vpop.f32.mrf.mxu2  ;;  %v3122_v11 = vpop.f32.mrf.mxu3 }
 0x124   : > { %v511_v12 = vpop.f32.mrf.mxu1  ;;  %v975_v49 = vpop.f32.mrf.mxu0 }
 0x125   : > { %v675_v10 = vpop.f32.mrf.mxu2  ;;  %v512_v13 = vadd.f32 %v511_v12, %v414_v50  ;;  %v3124_v14 = vpop.f32.mrf.mxu3 }
 0x127   : > { %v688_v38 = vadd.f32 %v668_v56, %v512_v13 }
 0x129   : > { %v825_v54 = vadd.f32 %v805_v61, %v688_v38 }
 0x12b   : > { %v995_v56 = vadd.f32 %v975_v49, %v825_v54 }
 0x12c   : > { %v513_v15 = vpop.f32.mrf.mxu1  ;;  %v977_v16 = vpop.f32.mrf.mxu0 }
 0x12d   : > { %v678_v7 = vpop.f32.mrf.mxu2  ;;  %v514_v17 = vadd.f32 %v513_v15, %v416_v59  ;;  %v3126_v19 = vpop.f32.mrf.mxu3 }
 0x12f   : > { %v689_v18 = vadd.f32 %v670_v1, %v514_v17 }
 0x131   : > { %v826_v32 = vadd.f32 %v807_v4, %v689_v18 }
 0x134   : > { %v516_v21 = vpop.f32.mrf.mxu1  ;;  %v980_v29 = vpop.f32.mrf.mxu0 }
 0x135   : > { %v680_v20 = vpop.f32.mrf.mxu2  ;;  %v517_v22 = vadd.f32 %v516_v21, %v419_v3  ;;  %v3128_v63 = vpop.f32.mrf.mxu3  ;;  %v996_v3 = vadd.f32 %v977_v16, %v826_v32 }
 0x137   : > { %v690_v23 = vadd.f32 %v673_v5, %v517_v22 }
 0x139   : > { %v827_v49 = vadd.f32 %v3122_v11, %v690_v23 }
 0x13b   : > { %v997_v15 = vadd.f32 %v980_v29, %v827_v49 }
 0x13c   : > { %v518_v26 = vpop.f32.mrf.mxu1  ;;  %v3130_v27 = vpop.f32.mrf.mxu0 }
 0x13d   : > { %v683_v25 = vpop.f32.mrf.mxu2  ;;  %v519_v28 = vadd.f32 %v518_v26, %v421_v8  ;;  %v3134_v35 = vpop.f32.mrf.mxu3 }
 0x13f   : > { %v691_v30 = vadd.f32 %v675_v10, %v519_v28 }
 0x141   : > { %v828_v22 = vadd.f32 %v3124_v14, %v691_v30 }
 0x144   : > { %v521_v9 = vpop.f32.mrf.mxu1  ;;  %v3132_v33 = vpop.f32.mrf.mxu0 }
 0x145   : > { %v685_v31 = vpop.f32.mrf.mxu2  ;;  %v522_v34 = vadd.f32 %v521_v9, %v424_v48  ;;  %v3140_v44 = vpop.f32.mrf.mxu3 }
 0x147   : > { %v692_v36 = vadd.f32 %v678_v7, %v522_v34 }
 0x14c   : > { %v523_v39 = vpop.f32.mrf.mxu1  ;;  %v3136_v40 = vpop.f32.mrf.mxu0 }
 0x14d   : > { %v1274_v37 = vpop.f32.mrf.mxu2  ;;  %v524_v41 = vadd.f32 %v523_v39, %v426_v57  ;;  %v1444_v48 = vpop.f32.mrf.mxu3 }
 0x14f   : > { %v3138_v43 = vadd.f32 %v680_v20, %v524_v41  ;;  %v829_v41 = vadd.f32 %v3126_v19, %v692_v36 }
 0x154   : > { %v526_v46 = vpop.f32.mrf.mxu1  ;;  %v3142_v47 = vpop.f32.mrf.mxu0 }
 0x155   : > { %v1276_v45 = vpop.f32.mrf.mxu2  ;;  %v527_v50 = vadd.f32 %v526_v46, %v429_v2  ;;  %v1446_v57 = vpop.f32.mrf.mxu3  ;;  %v3153_v2 = vld [vmem:[%s3239_s2] ss:$0 sm:$0xff] }
 0x157   : > { %v3144_v58 = vadd.f32 %v683_v25, %v527_v50  ;;  %v999_v50 = vadd.f32 %v3132_v33, %v829_v41 }
 0x15c   : > { %v528_v52 = vpop.f32.mrf.mxu1  ;;  %v3146_v53 = vpop.f32.mrf.mxu0 }
 0x15d   : > { %v1279_v51 = vpop.f32.mrf.mxu2  ;;  %v529_v24 = vadd.f32 %v528_v52, %v431_v6  ;;  %v1449_v12 = vpop.f32.mrf.mxu3 }
 0x15f   : > { %v3148_v55 = vadd.f32 %v685_v31, %v529_v24  ;;  %v998_v31 = vadd.f32 %v3130_v27, %v828_v22 }
 0x161   : > { %v832_v49 = vadd.f32 %v3140_v44, %v3148_v55 }
 0x164   : > { %v1137_v59 = vpop.f32.mrf.mxu1  ;;  %v1606_v42 = vpop.f32.mrf.mxu0 }
 0x165   : > { %v1157_v60 = vadd.f32 %v1137_v59, %v995_v56  ;;  %v1281_v62 = vpop.f32.mrf.mxu2  ;;  %v1451_v28 = vpop.f32.mrf.mxu3  ;;  %v830_v56 = vadd.f32 %v3128_v63, %v3138_v43 }
 0x167   : > { %v1294_v0 = vadd.f32 %v1274_v37, %v1157_v60  ;;  %v1000_v59 = vadd.f32 %v3136_v40, %v830_v56 }
 0x169   : > { %v1464_v1 = vadd.f32 %v1444_v48, %v1294_v0 }
 0x16b   : > { %v1626_v5 = vadd.f32 %v1606_v42, %v1464_v1  ;;  %v831_v1 = vadd.f32 %v3134_v35, %v3144_v58 }
 0x16c   : > { %v1139_v61 = vpop.f32.mrf.mxu1  ;;  %v1608_v6 = vpop.f32.mrf.mxu0 }
 0x16d   : > { %v1638_v8 = vadd.f32 %v3153_v2, %v1626_v5  ;;  %v1158_v10 = vadd.f32 %v1139_v61, %v996_v3  ;;  %v1284_v38 = vpop.f32.mrf.mxu2  ;;  %v1454_v46 = vpop.f32.mrf.mxu3  ;;  %v1001_v40 = vadd.f32 %v3142_v47, %v831_v1  ;;  %v1002_v47 = vadd.f32 %v3146_v53, %v832_v49 }
 0x16f   : > { %v1646_v13 = vmax.f32 %v1638_v8, 0.0  ;;  %v1295_v4 = vadd.f32 %v1276_v45, %v1158_v10 }
 0x171   : > { %1654 = vst [vmem:[%s2903_s27] sm:$0xff] %v1646_v13  ;;  %v1465_v7 = vadd.f32 %v1446_v57, %v1295_v4 }
 0x173   : > { %v1627_v17 = vadd.f32 %v1608_v6, %v1465_v7 }
 0x174   : > { %v1142_v18 = vpop.f32.mrf.mxu1  ;;  %v1611_v20 = vpop.f32.mrf.mxu0 }
 0x175   : > { %v1639_v16 = vadd.f32 %v3153_v2, %v1627_v17  ;;  %v1159_v21 = vadd.f32 %v1142_v18, %v997_v15  ;;  %v1286_v23 = vpop.f32.mrf.mxu2  ;;  %v1456_v60 = vpop.f32.mrf.mxu3 }
 0x177   : > { %v1647_v25 = vmax.f32 %v1639_v16, 0.0  ;;  %v1296_v26 = vadd.f32 %v1279_v51, %v1159_v21 }
 0x179   : > { %1655 = vst [vmem:[%s2903_s27 + $0x8] sm:$0xff] %v1647_v25  ;;  %v1466_v11 = vadd.f32 %v1449_v12, %v1296_v26 }
 0x17b   : > { %v1628_v9 = vadd.f32 %v1611_v20, %v1466_v11 }
 0x17c   : > { %v1144_v34 = vpop.f32.mrf.mxu1  ;;  %v1613_v29 = vpop.f32.mrf.mxu0 }
 0x17d   : > { %v1640_v37 = vadd.f32 %v3153_v2, %v1628_v9  ;;  %v1160_v39 = vadd.f32 %v1144_v34, %v998_v31  ;;  %v1289_v51 = vpop.f32.mrf.mxu2  ;;  %v1459_v12 = vpop.f32.mrf.mxu3 }
 0x17f   : > { %v1648_v45 = vmax.f32 %v1640_v37, 0.0  ;;  %v1297_v14 = vadd.f32 %v1281_v62, %v1160_v39 }
 0x181   : > { %1656 = vst [vmem:[%s2903_s27 + $0x10] sm:$0xff] %v1648_v45  ;;  %v1467_v30 = vadd.f32 %v1451_v28, %v1297_v14 }
 0x183   : > { %v1629_v48 = vadd.f32 %v1613_v29, %v1467_v30 }
 0x184   : > { %v1147_v52 = vpop.f32.mrf.mxu1  ;;  %v1616_v54 = vpop.f32.mrf.mxu0 }
 0x185   : > { %v1641_v27 = vadd.f32 %v3153_v2, %v1629_v48  ;;  %v1161_v24 = vadd.f32 %v1147_v52, %v999_v50  ;;  %v1291_v0 = vpop.f32.mrf.mxu2  ;;  %v1461_v18 = vpop.f32.mrf.mxu3 }
 0x187   : > { %v1649_v19 = vmax.f32 %v1641_v27, 0.0  ;;  %v1298_v36 = vadd.f32 %v1284_v38, %v1161_v24 }
 0x189   : > { %1657 = vst [vmem:[%s2903_s27 + $0x18] sm:$0xff] %v1649_v19  ;;  %v1468_v57 = vadd.f32 %v1454_v46, %v1298_v36 }
 0x18b   : > { %v1630_v42 = vadd.f32 %v1616_v54, %v1468_v57 }
 0x18c   : > { %v1149_v33 = vpop.f32.mrf.mxu1  ;;  %v1618_v3 = vpop.f32.mrf.mxu0 }
 0x18d   : > { %v1642_v62 = vadd.f32 %v3153_v2, %v1630_v42  ;;  %v1162_v32 = vadd.f32 %v1149_v33, %v1000_v59  ;;  %v1621_v58 = vpop.f32.mrf.mxu2 }
 0x18f   : > { %v1650_v63 = vmax.f32 %v1642_v62, 0.0  ;;  %v1299_v43 = vadd.f32 %v1286_v23, %v1162_v32 }
 0x191   : > { %1658 = vst [vmem:[%s2903_s27 + $0x20] sm:$0xff] %v1650_v63  ;;  %v1469_v5 = vadd.f32 %v1456_v60, %v1299_v43 }
 0x193   : > { %v1631_v61 = vadd.f32 %v1618_v3, %v1469_v5 }
 0x194   : > { %v1152_v6 = vpop.f32.mrf.mxu1 }
 0x195   : > { %v1643_v8 = vadd.f32 %v3153_v2, %v1631_v61  ;;  %v1163_v10 = vadd.f32 %v1152_v6, %v1001_v40  ;;  %v1623_v16 = vpop.f32.mrf.mxu2 }
 0x197   : > { %v1651_v13 = vmax.f32 %v1643_v8, 0.0  ;;  %v1300_v35 = vadd.f32 %v1289_v51, %v1163_v10 }
 0x199   : > { %1659 = vst [vmem:[%s2903_s27 + $0x28] sm:$0xff] %v1651_v13  ;;  %v1470_v4 = vadd.f32 %v1459_v12, %v1300_v35 }
 0x19b   : > { %v1632_v38 = vadd.f32 %v1621_v58, %v1470_v4 }
 0x19c   : > { %v1154_v7 = vpop.f32.mrf.mxu1 }
 0x19d   : > { %v1644_v15 = vadd.f32 %v3153_v2, %v1632_v38  ;;  %v1164_v17 = vadd.f32 %v1154_v7, %v1002_v47 }
 0x19f   : > { %v1652_v44 = vmax.f32 %v1644_v15, 0.0  ;;  %v1301_v55 = vadd.f32 %v1291_v0, %v1164_v17 }
 0x1a1   : > { %1660 = vst [vmem:[%s2903_s27 + $0x30] sm:$0xff] %v1652_v44  ;;  %v1471_v20 = vadd.f32 %v1461_v18, %v1301_v55 }
 0x1a3   : > { %v1633_v53 = vadd.f32 %v1623_v16, %v1471_v20 }
 0x1a5   : > { %v1645_v21 = vadd.f32 %v3153_v2, %v1633_v53 }
 0x1a7   : > { %v1653_v22 = vmax.f32 %v1645_v21, 0.0 }
 0x1a9   : > { %1661 = vst [vmem:[%s2903_s27 + $0x38] sm:$0xff] %v1653_v22 }
 0x1aa   : > { %2589 = shalt.err (!%p2586_p1)
}
 0x1ab   : > { %s2684_s27 = smov 128   ;;  %s2685_s10 = smov 8  }
 0x1ac   : > { %2375 = dma.vmem_to_hbm [thread:$0]  (%p2777_p6), %s1681_s8, 1024, %s1683_s11, %s1663_s9, %s2684_s27, %s2684_s27, %s2685_s10  }
 0x1ad PF: > { %p2389_p2 = scmp.ge.s32.totalorder %s2678_s21, 2  ;;  %s1697_s29 = sand.u32 1, %s2642_s12  }
 0x1ae   : > { %p3271_p3 = scmp.ne.s32.totalorder %s3256_s7, 0  ;;  %s1698_s6 = scalar_lea.sflag [#allocation6], %s1697_s29 }
 0x1b0   : > { %p2382_p5 = pnand %p2389_p2, %p3271_p3 }
 0x1b2   : > { %p2383_p7 = pneg %p2382_p5 }
 0x1b4   : > { %2637 = dma.done.wait (%p2383_p7), %s1698_s6, 1024  }
 0x1b5   : > { %2639 = vsyncadd (%p2383_p7), %s1698_s6, 4294966272  ;;  %s17_s21 = sadd.s32 1, %s2678_s21   ;;  %s3272_s15 = sld [smem:[#allocation17_spill]] }
 0x1b6   : > { %p14_p8 = scmp.ge.s32.totalorder %s17_s21, 10   ;;  %s3273_s16 = sld [smem:[#allocation18_spill]] }
 0x1b7   : > { %s3274_s17 = sld [smem:[#allocation19_spill]]  ;;  %s3278_s12 = smov %s2646_s13 }
 0x1b8   : > { %s3275_s18 = sld [smem:[#allocation20_spill]]  ;;  %s3279_s13 = smov %s2650_s14 }
 0x1b9   : > { %s3276_s19 = sld [smem:[#allocation21_spill]]  ;;  %s3280_s14 = smov %s2808_s30 }
 0x1ba   : > { %s3277_s20 = sld [smem:[#allocation22_spill]]  ;;  %16 = sbr.rel (!%p14_p8) target bundleno = 9 (0x9), region = 100 }
 0x1bf   :  { %1704 = vsyncpa [#allocation5], 1 }
 0x1c0   :  { %1706 = vsyncpa [#allocation5 + $0x1], 1 }
 0x1c1   :  { %1707 = vsyncpa [#allocation6], 1 }
 0x1c2   :  { %1709 = vsyncpa [#allocation6 + $0x1], 1 }
 0x1c3   :  { %1710 = vsyncmov [#allocation3] }
 0x1c6   :  { %s1711_s4 = vpop.sfrf %1710 }
 0x1c7   :  { %p2261_p6 = scmp.ne.s32.totalorder %s1711_s4, 0 }
 0x1c9   :  { %1715 = shalt.err (%p2261_p6)  }
 0x1ca   :  { %1717 = vsyncmov [#allocation3 + $0x1] }
 0x1cd   :  { %s1718_s7 = vpop.sfrf %1717 }
 0x1ce   :  { %p2262_p4 = scmp.ne.s32.totalorder %s1718_s7, 0 }
 0x1d0   :  { %1722 = shalt.err (%p2262_p4)  }

</bundles_post_ra>
